<compile_context>
chip_gen: v7x
topology: tpu7x:2x2x1
jax: 0.10.0
libtpu: 0.0.40
codegen_flags: <defaults>
</compile_context>

<pallas_src>
import math

import jax
import jax.numpy as jnp
from jax.experimental import pallas as pl
from jax.experimental.pallas import tpu as pltpu  # noqa: F401  (TPU backend import)

# ---------------- config (small, consistent with the module) ----------------
BATCH = 2
N_CHANNELS = 4
SEQ_LEN = 64
PATCH_LEN = 8
PATCH_STRIDE = 8
N_PATCHES = (SEQ_LEN - PATCH_LEN) // PATCH_STRIDE + 1   # 8
D_MODEL = 32
N_HEADS = 4
D_KV = 8
INNER = N_HEADS * D_KV                                   # 32
D_FF = 64
N_LAYERS = 2
REL_BUCKETS = 32
REL_MAX_DIST = 128
EPS_REVIN = 1e-5
EPS_LN = 1e-6
GELU_C = math.sqrt(2.0 / math.pi)
NEG_INF = -1e9

_F32 = jnp.float32
_BF16 = jnp.bfloat16


# ---------------- fused Pallas kernel (whole forward pass) ----------------
def _moment_forward_kernel(
    x_seq_ref,     # (BC, S)          f32   lane-dense raw series (RevIN stats)
    x_patch_ref,   # (BC*P, p_len)    f32   raw patches, token-major
    value_w_ref,   # (p_len, D)       f32   value embedding (bias-free)
    pos_emb_ref,   # (BC*P, D)        f32   positional embedding pre-tiled over BC
    bias_ref,      # (H, T, T)        f32   block-diag rel-pos bias, -1e9 off block
    ln1_ref,       # (L, 1, D)        f32
    wqkv_ref,      # (L*3H, D, Dkv)   bf16  per-head stacked q|k|v weights
    wo_ref,        # (L*H, Dkv, D)    bf16  per-head stacked out-proj weights
    ln2_ref,       # (L, 1, D)        f32
    wi_ref,        # (L, D, 2*Dff)    bf16  fused wi_0 | wi_1
    wo_ff_ref,     # (L, Dff, D)      bf16
    final_ln_ref,  # (1, D)           f32
    head_w_ref,    # (D, p_len)       f32
    head_b_ref,    # (1, p_len)       f32
    out_ref,       # (BC*P, p_len)    f32
):
    f32, bf16 = jnp.float32, jnp.bfloat16
    bc = x_seq_ref.shape[0]
    tok, _ = x_patch_ref.shape
    n_p = tok // bc

    def rms(h, w):
        return h * jax.lax.rsqrt(jnp.mean(h * h, axis=-1, keepdims=True) + EPS_LN) * w

    # ---- RevIN normalization (forecast path: all-ones mask -> plain stats, one reduce) ----
    xs = x_seq_ref[...]
    mean = jnp.mean(xs, axis=-1, keepdims=True)                        # (BC, 1)
    var = jnp.mean((xs - mean) * (xs - mean), axis=-1, keepdims=True)
    std = jnp.sqrt(var + EPS_REVIN)                                    # RevIN: sqrt(var + eps)
    # per-token stats (leading-dim broadcast + merge only -> no lane relayout)
    mean_t = jnp.broadcast_to(mean[:, None, :], (bc, n_p, 1)).reshape(tok, 1)
    std_t = jnp.broadcast_to(std[:, None, :], (bc, n_p, 1)).reshape(tok, 1)
    # TODO(synk): torch.nan_to_num scrub elided; std >= sqrt(eps) keeps xn finite for finite x.
    xn = (x_patch_ref[...] - mean_t) * (1.0 / std_t)                   # (T, p_len)

    # ---- patch value embedding + positional embedding (dropout inactive in eval) ----
    hidden = jnp.dot(xn, value_w_ref[...], preferred_element_type=f32) + pos_emb_ref[...]

    bias = bias_ref[...]                                               # (H, T, T) hoisted
    wqkv_all = wqkv_ref[...]                                           # (L*3H, D, Dkv) bf16
    wo_all = wo_ref[...]                                               # (L*H, Dkv, D)  bf16

    for l in range(N_LAYERS):
        # --- T5 self-attention: all heads & all BC sequences in one batched block ---
        normed = rms(hidden, ln1_ref[l])
        nb = jnp.broadcast_to(normed.astype(bf16), (3 * N_HEADS, tok, D_MODEL))
        w_qkv = wqkv_all[l * 3 * N_HEADS:(l + 1) * 3 * N_HEADS]        # (3H, D, Dkv)
        qkv = jnp.einsum("htd,hdk->htk", nb, w_qkv,
                         preferred_element_type=f32)                   # (3H, T, Dkv)
        q = qkv[0:N_HEADS].astype(bf16)
        k = qkv[N_HEADS:2 * N_HEADS].astype(bf16)
        v = qkv[2 * N_HEADS:3 * N_HEADS].astype(bf16)
        # T5: no 1/sqrt(d_kv) scaling; bias already carries the block-diagonal -1e9 mask.
        s = jnp.einsum("hqd,hkd->hqk", q, k, preferred_element_type=f32) + bias
        m = jnp.max(s, axis=-1, keepdims=True)
        e = jnp.exp(s - m)
        p = e * pl.reciprocal(jnp.sum(e, axis=-1, keepdims=True), approx=True)
        ctx = jnp.einsum("hqk,hkd->hqd", p.astype(bf16), v,
                         preferred_element_type=f32)                   # (H, T, Dkv)
        w_o = wo_all[l * N_HEADS:(l + 1) * N_HEADS]                    # (H, Dkv, D)
        proj = jnp.einsum("hqd,hdm->hqm", ctx.astype(bf16), w_o,
                          preferred_element_type=f32)                  # (H, T, D)
        attn = proj[0]
        for h in range(1, N_HEADS):
            attn = attn + proj[h]
        hidden = hidden + attn

        # --- gated-GELU FFN (fused wi_0|wi_1 -> one lane-dense (T,128) matmul) ---
        normed = rms(hidden, ln2_ref[l])
        h01 = jnp.dot(normed.astype(bf16), wi_ref[l], preferred_element_type=f32)
        h0 = h01[:, :D_FF]
        h1 = h01[:, D_FF:]
        g = 0.5 * h0 * (1.0 + jnp.tanh(GELU_C * (h0 + 0.044715 * h0 * h0 * h0)))
        hidden = hidden + jnp.dot((g * h1).astype(bf16), wo_ff_ref[l],
                                  preferred_element_type=f32)

    # ---- final RMSNorm + PretrainHead + RevIN denorm ----
    hidden = rms(hidden, final_ln_ref[...])
    dec = jnp.dot(hidden, head_w_ref[...], preferred_element_type=f32) + head_b_ref[...]
    out_ref[...] = dec * std_t + mean_t


# ---------------- JAX glue (index math / layout only) ----------------
def t5_relative_position_bias(rel_table, qlen, klen):
    # T5 bidirectional relative position bucket + bias lookup (pure index math).
    ctx = jnp.arange(qlen)[:, None]
    mem = jnp.arange(klen)[None, :]
    rel = mem - ctx
    nb = REL_BUCKETS // 2
    buckets = (rel > 0).astype(jnp.int32) * nb
    rp = jnp.abs(rel)
    max_exact = nb // 2
    is_small = rp < max_exact
    rp_large = max_exact + (
        jnp.log(jnp.maximum(rp, 1).astype(_F32) / max_exact)
        / math.log(REL_MAX_DIST / max_exact)
        * (nb - max_exact)
    ).astype(jnp.int32)
    rp_large = jnp.minimum(rp_large, nb - 1)
    buckets = buckets + jnp.where(is_small, rp, rp_large)
    bias = rel_table[buckets]                 # (qlen, klen, H)
    return jnp.transpose(bias, (2, 0, 1))     # (H, qlen, klen)


def build_attention_bias(rel_table, bc):
    """(H, bc*P, bc*P): rel-pos bias on the bc block diagonal, -1e9 off-block."""
    pos_bias = t5_relative_position_bias(rel_table, N_PATCHES, N_PATCHES)   # (H, P, P)
    t = jnp.arange(bc * N_PATCHES)
    blk = t // N_PATCHES
    pos = t % N_PATCHES
    same = blk[:, None] == blk[None, :]
    bias = pos_bias[:, pos[:, None], pos[None, :]]                          # (H, T, T)
    return jnp.where(same[None, :, :], bias, jnp.float32(NEG_INF))


def sinusoidal_pos_embedding(n_pos, d_model):
    position = jnp.arange(n_pos, dtype=_F32)[:, None]
    div_term = jnp.exp(jnp.arange(0, d_model, 2, dtype=_F32) * -(math.log(10000.0) / d_model))
    pe = jnp.zeros((n_pos, d_model), _F32)
    pe = pe.at[:, 0::2].set(jnp.sin(position * div_term))
    pe = pe.at[:, 1::2].set(jnp.cos(position * div_term))
    return pe


def init_params(key):
    def nrm(k, shape, scale=0.05):
        return scale * jax.random.normal(k, shape, _F32)

    keys = iter(jax.random.split(key, 3 + 7 * N_LAYERS))
    params = {
        "value_w": nrm(next(keys), (PATCH_LEN, D_MODEL)),     # value_embedding (no bias)
        "pos_emb": sinusoidal_pos_embedding(N_PATCHES, D_MODEL),
        "rel_bias": nrm(next(keys), (REL_BUCKETS, N_HEADS)),  # layer-0 relative attention bias
        "final_ln": jnp.ones((1, D_MODEL), _F32),
        "head_w": nrm(next(keys), (D_MODEL, PATCH_LEN)),      # PretrainHead linear
        "head_b": jnp.zeros((1, PATCH_LEN), _F32),
    }
    # TODO(synk): torch orthogonal_ init of head / value-embedding weights replaced by a
    # deterministic normal init (values arbitrary, shapes faithful).
    ln1, wq, wk, wv, wo, ln2, wi0, wi1, wo_ff = ([] for _ in range(9))
    for _ in range(N_LAYERS):
        ln1.append(jnp.ones((1, D_MODEL), _F32))
        wq.append(nrm(next(keys), (D_MODEL, INNER)))
        wk.append(nrm(next(keys), (D_MODEL, INNER)))
        wv.append(nrm(next(keys), (D_MODEL, INNER)))
        wo.append(nrm(next(keys), (INNER, D_MODEL)))
        ln2.append(jnp.ones((1, D_MODEL), _F32))
        wi0.append(nrm(next(keys), (D_MODEL, D_FF)))
        wi1.append(nrm(next(keys), (D_MODEL, D_FF)))
        wo_ff.append(nrm(next(keys), (D_FF, D_MODEL)))
    params.update(
        ln1=jnp.stack(ln1), wq=jnp.stack(wq), wk=jnp.stack(wk), wv=jnp.stack(wv),
        wo=jnp.stack(wo), ln2=jnp.stack(ln2), wi0=jnp.stack(wi0), wi1=jnp.stack(wi1),
        wo_ff=jnp.stack(wo_ff),
    )
    return params


def _stack_heads_qkv(w):
    # (L, D, INNER) -> (L, H, D, Dkv); head h slab == w[:, :, h*Dkv:(h+1)*Dkv]
    return jnp.transpose(w.reshape(N_LAYERS, D_MODEL, N_HEADS, D_KV), (0, 2, 1, 3))


def model_forward(params, x_enc):
    """Model.forward for task 'long_term_forecast': x_enc (B, S, C) -> (B, S, C)."""
    b, s, c = x_enc.shape
    bc = b * c
    tok = bc * N_PATCHES

    # channel-major series + pre-patched token view (pure layout work, stays in XLA glue)
    x_seq = jnp.transpose(x_enc, (0, 2, 1)).reshape(bc, s)            # (BC, S) lane-dense
    x_patch = x_seq.reshape(tok, PATCH_LEN)                           # (BC*P, p_len)

    pos_emb_tok = jnp.tile(params["pos_emb"], (bc, 1))                # (BC*P, D)
    attn_bias = build_attention_bias(params["rel_bias"], bc)          # (H, T, T)

    # per-head stacked, bf16 weights for the MXU (f32 accumulation inside the kernel)
    wqkv = jnp.concatenate(
        [_stack_heads_qkv(params["wq"]),
         _stack_heads_qkv(params["wk"]),
         _stack_heads_qkv(params["wv"])], axis=1,
    ).reshape(N_LAYERS * 3 * N_HEADS, D_MODEL, D_KV).astype(_BF16)
    wo = params["wo"].reshape(N_LAYERS * N_HEADS, D_KV, D_MODEL).astype(_BF16)
    wi = jnp.concatenate([params["wi0"], params["wi1"]], axis=-1).astype(_BF16)
    wo_ff = params["wo_ff"].astype(_BF16)

    out_tok = pl.pallas_call(
        _moment_forward_kernel,
        out_shape=jax.ShapeDtypeStruct((tok, PATCH_LEN), _F32),
    )(
        x_seq, x_patch,
        params["value_w"], pos_emb_tok, attn_bias,
        params["ln1"], wqkv, wo, params["ln2"], wi, wo_ff,
        params["final_ln"], params["head_w"], params["head_b"],
    )
    return jnp.transpose(out_tok.reshape(b, c, s), (0, 2, 1))


# ---------------- pure-JAX f32 reference (for self-check) ----------------
def reference_forward(params, x_enc):
    b, s, c = x_enc.shape
    bc = b * c
    x = jnp.transpose(x_enc, (0, 2, 1)).reshape(bc, s)
    mean = jnp.mean(x, axis=-1, keepdims=True)
    var = jnp.mean((x - mean) ** 2, axis=-1, keepdims=True)
    std = jnp.sqrt(var + EPS_REVIN)
    xn = (x - mean) / std

    patches = xn.reshape(bc * N_PATCHES, PATCH_LEN)
    emb = patches @ params["value_w"]
    emb = (emb.reshape(bc, N_PATCHES, D_MODEL) + params["pos_emb"][None]).reshape(-1, D_MODEL)
    pos_bias = t5_relative_position_bias(params["rel_bias"], N_PATCHES, N_PATCHES)

    def rms(h, w):
        return h * jax.lax.rsqrt(jnp.mean(h * h, axis=-1, keepdims=True) + EPS_LN) * w

    hidden = emb
    for l in range(N_LAYERS):
        normed = rms(hidden, params["ln1"][l])
        q = (normed @ params["wq"][l]).reshape(bc, N_PATCHES, N_HEADS, D_KV)
        k = (normed @ params["wk"][l]).reshape(bc, N_PATCHES, N_HEADS, D_KV)
        v = (normed @ params["wv"][l]).reshape(bc, N_PATCHES, N_HEADS, D_KV)
        sc = jnp.einsum("bqhd,bkhd->bhqk", q, k) + pos_bias[None]
        p = jax.nn.softmax(sc, axis=-1)
        ctx = jnp.einsum("bhqk,bkhd->bqhd", p, v).reshape(bc * N_PATCHES, INNER)
        hidden = hidden + ctx @ params["wo"][l]
        normed = rms(hidden, params["ln2"][l])
        h0 = normed @ params["wi0"][l]
        h1 = normed @ params["wi1"][l]
        g = 0.5 * h0 * (1.0 + jnp.tanh(GELU_C * (h0 + 0.044715 * h0 ** 3)))
        hidden = hidden + (g * h1) @ params["wo_ff"][l]

    hidden = rms(hidden, params["final_ln"])
    dec = hidden @ params["head_w"] + params["head_b"]
    dec = dec.reshape(bc, s) * std + mean
    return jnp.transpose(dec.reshape(b, c, s), (0, 2, 1))


if __name__ == "__main__":
    key = jax.random.PRNGKey(0)
    pkey, xkey = jax.random.split(key)
    params = init_params(pkey)

    x_enc = jax.random.normal(xkey, (BATCH, SEQ_LEN, N_CHANNELS), _F32)
    # x_mark_enc / x_dec / x_mark_dec are unused by the forecast path of Model.forward.

    fwd = jax.jit(model_forward)
    out = fwd(params, x_enc)
    jax.block_until_ready(out)
    assert out.shape == (BATCH, SEQ_LEN, N_CHANNELS)
    assert bool(jnp.all(jnp.isfinite(out)))

    ref = jax.jit(reference_forward)(params, x_enc)
    err = float(jnp.max(jnp.abs(out - ref)))
    # bf16 MXU operands + approx softmax reciprocal account for ~1e-3 abs error on O(1) outputs
    assert err < 3e-2, f"kernel/reference mismatch: {err}"

    print("KERNEL_OK")
</pallas_src>

<mosaic_0001>
module attributes {stable_mosaic.version = 11 : i64} {
  func.func @_moment_forward_kernel(%arg0: memref<8x64xf32, #tpu.memory_space<vmem>>, %arg1: memref<64x8xf32, #tpu.memory_space<vmem>>, %arg2: memref<8x32xf32, #tpu.memory_space<vmem>>, %arg3: memref<64x32xf32, #tpu.memory_space<vmem>>, %arg4: memref<4x64x64xf32, #tpu.memory_space<vmem>>, %arg5: memref<2x1x32xf32, #tpu.memory_space<vmem>>, %arg6: memref<24x32x8xbf16, #tpu.memory_space<vmem>>, %arg7: memref<8x8x32xbf16, #tpu.memory_space<vmem>>, %arg8: memref<2x1x32xf32, #tpu.memory_space<vmem>>, %arg9: memref<2x32x128xbf16, #tpu.memory_space<vmem>>, %arg10: memref<2x64x32xbf16, #tpu.memory_space<vmem>>, %arg11: memref<1x32xf32, #tpu.memory_space<vmem>>, %arg12: memref<32x8xf32, #tpu.memory_space<vmem>>, %arg13: memref<1x8xf32, #tpu.memory_space<vmem>>, %arg14: memref<64x8xf32, #tpu.memory_space<vmem>>) attributes {dimension_semantics = [], scalar_prefetch = 0 : i64, scratch_operands = 0 : i64, tpu.core_type = #tpu.core_type<tc>} {
    %c0 = arith.constant 0 : index
    %c0_0 = arith.constant 0 : index
    %0 = vector.load %arg0[%c0, %c0_0] : memref<8x64xf32, #tpu.memory_space<vmem>>, vector<8x64xf32>
    %cst = arith.constant dense<0.000000e+00> : vector<8xf32>
    %1 = vector.multi_reduction <add>, %0, %cst [1] : vector<8x64xf32> to vector<8xf32>
    %2 = vector.shape_cast %1 : vector<8xf32> to vector<8x1xf32>
    %cst_1 = arith.constant 6.400000e+01 : f32
    %3 = vector.broadcast %cst_1 : f32 to vector<8x1xf32>
    %4 = arith.divf %2, %3 : vector<8x1xf32>
    %5 = vector.broadcast %4 : vector<8x1xf32> to vector<8x64xf32>
    %6 = arith.subf %0, %5 : vector<8x64xf32>
    %7 = vector.broadcast %4 : vector<8x1xf32> to vector<8x64xf32>
    %8 = arith.subf %0, %7 : vector<8x64xf32>
    %9 = arith.mulf %6, %8 : vector<8x64xf32>
    %cst_2 = arith.constant dense<0.000000e+00> : vector<8xf32>
    %10 = vector.multi_reduction <add>, %9, %cst_2 [1] : vector<8x64xf32> to vector<8xf32>
    %11 = vector.shape_cast %10 : vector<8xf32> to vector<8x1xf32>
    %cst_3 = arith.constant 6.400000e+01 : f32
    %12 = vector.broadcast %cst_3 : f32 to vector<8x1xf32>
    %13 = arith.divf %11, %12 : vector<8x1xf32>
    %cst_4 = arith.constant 9.99999974E-6 : f32
    %14 = vector.broadcast %cst_4 : f32 to vector<8x1xf32>
    %15 = arith.addf %13, %14 : vector<8x1xf32>
    %16 = math.sqrt %15 : vector<8x1xf32>
    %17 = vector.shape_cast %4 : vector<8x1xf32> to vector<8x1x1xf32>
    %18 = vector.shape_cast %17 : vector<8x1x1xf32> to vector<8x1x1xf32>
    %19 = vector.broadcast %18 : vector<8x1x1xf32> to vector<8x8x1xf32>
    %20 = vector.shape_cast %19 : vector<8x8x1xf32> to vector<64x1xf32>
    %21 = vector.shape_cast %16 : vector<8x1xf32> to vector<8x1x1xf32>
    %22 = vector.shape_cast %21 : vector<8x1x1xf32> to vector<8x1x1xf32>
    %23 = vector.broadcast %22 : vector<8x1x1xf32> to vector<8x8x1xf32>
    %24 = vector.shape_cast %23 : vector<8x8x1xf32> to vector<64x1xf32>
    %c0_5 = arith.constant 0 : index
    %c0_6 = arith.constant 0 : index
    %25 = vector.load %arg1[%c0_5, %c0_6] : memref<64x8xf32, #tpu.memory_space<vmem>>, vector<64x8xf32>
    %26 = vector.broadcast %20 : vector<64x1xf32> to vector<64x8xf32>
    %27 = arith.subf %25, %26 : vector<64x8xf32>
    %cst_7 = arith.constant 1.000000e+00 : f32
    %28 = vector.broadcast %cst_7 : f32 to vector<64x1xf32>
    %29 = arith.divf %28, %24 : vector<64x1xf32>
    %30 = vector.broadcast %29 : vector<64x1xf32> to vector<64x8xf32>
    %31 = arith.mulf %27, %30 : vector<64x8xf32>
    %c0_8 = arith.constant 0 : index
    %c0_9 = arith.constant 0 : index
    %32 = vector.load %arg2[%c0_8, %c0_9] : memref<8x32xf32, #tpu.memory_space<vmem>>, vector<8x32xf32>
    %cst_10 = arith.constant dense<0.000000e+00> : vector<64x32xf32>
    %33 = tpu.matmul %31, %32, %cst_10 {dimension_numbers = #tpu.dot_dimension_numbers<[1], [0], [0], [1], [0, 0, 1, 1], [], []>} : vector<64x8xf32>, vector<8x32xf32>, vector<64x32xf32> -> vector<64x32xf32>
    %c0_11 = arith.constant 0 : index
    %c0_12 = arith.constant 0 : index
    %34 = vector.load %arg3[%c0_11, %c0_12] : memref<64x32xf32, #tpu.memory_space<vmem>>, vector<64x32xf32>
    %35 = arith.addf %33, %34 : vector<64x32xf32>
    %c0_13 = arith.constant 0 : index
    %c0_14 = arith.constant 0 : index
    %c0_15 = arith.constant 0 : index
    %36 = vector.load %arg4[%c0_13, %c0_14, %c0_15] : memref<4x64x64xf32, #tpu.memory_space<vmem>>, vector<4x64x64xf32>
    %c0_16 = arith.constant 0 : index
    %c0_17 = arith.constant 0 : index
    %c0_18 = arith.constant 0 : index
    %37 = vector.load %arg6[%c0_16, %c0_17, %c0_18] : memref<24x32x8xbf16, #tpu.memory_space<vmem>>, vector<24x32x8xbf16>
    %c0_19 = arith.constant 0 : index
    %c0_20 = arith.constant 0 : index
    %c0_21 = arith.constant 0 : index
    %38 = vector.load %arg7[%c0_19, %c0_20, %c0_21] : memref<8x8x32xbf16, #tpu.memory_space<vmem>>, vector<8x8x32xbf16>
    %c0_22 = arith.constant 0 : index
    %c0_23 = arith.constant 0 : index
    %c0_24 = arith.constant 0 : index
    %39 = vector.load %arg5[%c0_22, %c0_23, %c0_24] : memref<2x1x32xf32, #tpu.memory_space<vmem>>, vector<1x1x32xf32>
    %40 = vector.shape_cast %39 : vector<1x1x32xf32> to vector<1x32xf32>
    %41 = arith.mulf %35, %35 : vector<64x32xf32>
    %cst_25 = arith.constant dense<0.000000e+00> : vector<64xf32>
    %42 = vector.multi_reduction <add>, %41, %cst_25 [1] : vector<64x32xf32> to vector<64xf32>
    %43 = vector.shape_cast %42 : vector<64xf32> to vector<64x1xf32>
    %cst_26 = arith.constant 3.200000e+01 : f32
    %44 = vector.broadcast %cst_26 : f32 to vector<64x1xf32>
    %45 = arith.divf %43, %44 : vector<64x1xf32>
    %cst_27 = arith.constant 9.99999997E-7 : f32
    %46 = vector.broadcast %cst_27 : f32 to vector<64x1xf32>
    %47 = arith.addf %45, %46 : vector<64x1xf32>
    %48 = math.rsqrt %47 : vector<64x1xf32>
    %49 = vector.broadcast %48 : vector<64x1xf32> to vector<64x32xf32>
    %50 = arith.mulf %35, %49 : vector<64x32xf32>
    %51 = vector.broadcast %40 : vector<1x32xf32> to vector<64x32xf32>
    %52 = arith.mulf %50, %51 : vector<64x32xf32>
    %53 = arith.truncf %52 : vector<64x32xf32> to vector<64x32xbf16>
    %54 = vector.shape_cast %53 : vector<64x32xbf16> to vector<1x64x32xbf16>
    %55 = vector.broadcast %54 : vector<1x64x32xbf16> to vector<12x64x32xbf16>
    %56 = vector.extract_strided_slice %37 {offsets = [0, 0, 0], sizes = [12, 32, 8], strides = [1, 1, 1]} : vector<24x32x8xbf16> to vector<12x32x8xbf16>
    "tpu.trace_start"() <{level = 10 : i32, message = "htd,hdk->htk"}> : () -> ()
    %cst_28 = arith.constant dense<0.000000e+00> : vector<12x64x8xf32>
    %57 = tpu.matmul %55, %56, %cst_28 {dimension_numbers = #tpu.dot_dimension_numbers<[2], [1], [1], [2], [0, 0, 0, 1, 1, 2], [0], [0]>} : vector<12x64x32xbf16>, vector<12x32x8xbf16>, vector<12x64x8xf32> -> vector<12x64x8xf32>
    "tpu.trace_stop"() : () -> ()
    %58 = vector.extract_strided_slice %57 {offsets = [0, 0, 0], sizes = [4, 64, 8], strides = [1, 1, 1]} : vector<12x64x8xf32> to vector<4x64x8xf32>
    %59 = arith.truncf %58 : vector<4x64x8xf32> to vector<4x64x8xbf16>
    %60 = vector.extract_strided_slice %57 {offsets = [4, 0, 0], sizes = [4, 64, 8], strides = [1, 1, 1]} : vector<12x64x8xf32> to vector<4x64x8xf32>
    %61 = arith.truncf %60 : vector<4x64x8xf32> to vector<4x64x8xbf16>
    %62 = vector.extract_strided_slice %57 {offsets = [8, 0, 0], sizes = [4, 64, 8], strides = [1, 1, 1]} : vector<12x64x8xf32> to vector<4x64x8xf32>
    %63 = arith.truncf %62 : vector<4x64x8xf32> to vector<4x64x8xbf16>
    "tpu.trace_start"() <{level = 10 : i32, message = "hqd,hkd->hqk"}> : () -> ()
    %cst_29 = arith.constant dense<0.000000e+00> : vector<4x64x64xf32>
    %64 = tpu.matmul %59, %61, %cst_29 {dimension_numbers = #tpu.dot_dimension_numbers<[2], [2], [1], [1], [0, 0, 0, 1, 1, 1], [0], [0]>} : vector<4x64x8xbf16>, vector<4x64x8xbf16>, vector<4x64x64xf32> -> vector<4x64x64xf32>
    "tpu.trace_stop"() : () -> ()
    %65 = arith.addf %64, %36 : vector<4x64x64xf32>
    %cst_30 = arith.constant dense<0xFF800000> : vector<4x64xf32>
    %66 = vector.multi_reduction <maximumf>, %65, %cst_30 [2] : vector<4x64x64xf32> to vector<4x64xf32>
    %67 = vector.shape_cast %66 : vector<4x64xf32> to vector<4x64x1xf32>
    %68 = vector.broadcast %67 : vector<4x64x1xf32> to vector<4x64x64xf32>
    %69 = arith.subf %65, %68 : vector<4x64x64xf32>
    %70 = math.exp %69 : vector<4x64x64xf32>
    %cst_31 = arith.constant dense<0.000000e+00> : vector<4x64xf32>
    %71 = vector.multi_reduction <add>, %70, %cst_31 [2] : vector<4x64x64xf32> to vector<4x64xf32>
    %72 = vector.shape_cast %71 : vector<4x64xf32> to vector<4x64x1xf32>
    %73 = tpu.reciprocal %72 {approx = true} : vector<4x64x1xf32> -> vector<4x64x1xf32>
    %74 = vector.broadcast %73 : vector<4x64x1xf32> to vector<4x64x64xf32>
    %75 = arith.mulf %70, %74 : vector<4x64x64xf32>
    %76 = arith.truncf %75 : vector<4x64x64xf32> to vector<4x64x64xbf16>
    "tpu.trace_start"() <{level = 10 : i32, message = "hqk,hkd->hqd"}> : () -> ()
    %cst_32 = arith.constant dense<0.000000e+00> : vector<4x64x8xf32>
    %77 = tpu.matmul %76, %63, %cst_32 {dimension_numbers = #tpu.dot_dimension_numbers<[2], [1], [1], [2], [0, 0, 0, 1, 1, 2], [0], [0]>} : vector<4x64x64xbf16>, vector<4x64x8xbf16>, vector<4x64x8xf32> -> vector<4x64x8xf32>
    "tpu.trace_stop"() : () -> ()
    %78 = vector.extract_strided_slice %38 {offsets = [0, 0, 0], sizes = [4, 8, 32], strides = [1, 1, 1]} : vector<8x8x32xbf16> to vector<4x8x32xbf16>
    %79 = arith.truncf %77 : vector<4x64x8xf32> to vector<4x64x8xbf16>
    "tpu.trace_start"() <{level = 10 : i32, message = "hqd,hdm->hqm"}> : () -> ()
    %cst_33 = arith.constant dense<0.000000e+00> : vector<4x64x32xf32>
    %80 = tpu.matmul %79, %78, %cst_33 {dimension_numbers = #tpu.dot_dimension_numbers<[2], [1], [1], [2], [0, 0, 0, 1, 1, 2], [0], [0]>} : vector<4x64x8xbf16>, vector<4x8x32xbf16>, vector<4x64x32xf32> -> vector<4x64x32xf32>
    "tpu.trace_stop"() : () -> ()
    %81 = vector.extract_strided_slice %80 {offsets = [0, 0, 0], sizes = [1, 64, 32], strides = [1, 1, 1]} : vector<4x64x32xf32> to vector<1x64x32xf32>
    %82 = vector.shape_cast %81 : vector<1x64x32xf32> to vector<64x32xf32>
    %83 = vector.extract_strided_slice %80 {offsets = [1, 0, 0], sizes = [1, 64, 32], strides = [1, 1, 1]} : vector<4x64x32xf32> to vector<1x64x32xf32>
    %84 = vector.shape_cast %83 : vector<1x64x32xf32> to vector<64x32xf32>
    %85 = arith.addf %82, %84 : vector<64x32xf32>
    %86 = vector.extract_strided_slice %80 {offsets = [2, 0, 0], sizes = [1, 64, 32], strides = [1, 1, 1]} : vector<4x64x32xf32> to vector<1x64x32xf32>
    %87 = vector.shape_cast %86 : vector<1x64x32xf32> to vector<64x32xf32>
    %88 = arith.addf %85, %87 : vector<64x32xf32>
    %89 = vector.extract_strided_slice %80 {offsets = [3, 0, 0], sizes = [1, 64, 32], strides = [1, 1, 1]} : vector<4x64x32xf32> to vector<1x64x32xf32>
    %90 = vector.shape_cast %89 : vector<1x64x32xf32> to vector<64x32xf32>
    %91 = arith.addf %88, %90 : vector<64x32xf32>
    %92 = arith.addf %35, %91 : vector<64x32xf32>
    %c0_34 = arith.constant 0 : index
    %c0_35 = arith.constant 0 : index
    %c0_36 = arith.constant 0 : index
    %93 = vector.load %arg8[%c0_34, %c0_35, %c0_36] : memref<2x1x32xf32, #tpu.memory_space<vmem>>, vector<1x1x32xf32>
    %94 = vector.shape_cast %93 : vector<1x1x32xf32> to vector<1x32xf32>
    %95 = arith.mulf %92, %92 : vector<64x32xf32>
    %cst_37 = arith.constant dense<0.000000e+00> : vector<64xf32>
    %96 = vector.multi_reduction <add>, %95, %cst_37 [1] : vector<64x32xf32> to vector<64xf32>
    %97 = vector.shape_cast %96 : vector<64xf32> to vector<64x1xf32>
    %cst_38 = arith.constant 3.200000e+01 : f32
    %98 = vector.broadcast %cst_38 : f32 to vector<64x1xf32>
    %99 = arith.divf %97, %98 : vector<64x1xf32>
    %cst_39 = arith.constant 9.99999997E-7 : f32
    %100 = vector.broadcast %cst_39 : f32 to vector<64x1xf32>
    %101 = arith.addf %99, %100 : vector<64x1xf32>
    %102 = math.rsqrt %101 : vector<64x1xf32>
    %103 = vector.broadcast %102 : vector<64x1xf32> to vector<64x32xf32>
    %104 = arith.mulf %92, %103 : vector<64x32xf32>
    %105 = vector.broadcast %94 : vector<1x32xf32> to vector<64x32xf32>
    %106 = arith.mulf %104, %105 : vector<64x32xf32>
    %107 = arith.truncf %106 : vector<64x32xf32> to vector<64x32xbf16>
    %c0_40 = arith.constant 0 : index
    %c0_41 = arith.constant 0 : index
    %c0_42 = arith.constant 0 : index
    %108 = vector.load %arg9[%c0_40, %c0_41, %c0_42] : memref<2x32x128xbf16, #tpu.memory_space<vmem>>, vector<1x32x128xbf16>
    %109 = vector.shape_cast %108 : vector<1x32x128xbf16> to vector<32x128xbf16>
    %cst_43 = arith.constant dense<0.000000e+00> : vector<64x128xf32>
    %110 = tpu.matmul %107, %109, %cst_43 {dimension_numbers = #tpu.dot_dimension_numbers<[1], [0], [0], [1], [0, 0, 1, 1], [], []>} : vector<64x32xbf16>, vector<32x128xbf16>, vector<64x128xf32> -> vector<64x128xf32>
    %111 = vector.extract_strided_slice %110 {offsets = [0, 0], sizes = [64, 64], strides = [1, 1]} : vector<64x128xf32> to vector<64x64xf32>
    %112 = vector.extract_strided_slice %110 {offsets = [0, 64], sizes = [64, 64], strides = [1, 1]} : vector<64x128xf32> to vector<64x64xf32>
    %cst_44 = arith.constant 5.000000e-01 : f32
    %113 = vector.broadcast %cst_44 : f32 to vector<64x64xf32>
    %114 = arith.mulf %113, %111 : vector<64x64xf32>
    %cst_45 = arith.constant 4.471500e-02 : f32
    %115 = vector.broadcast %cst_45 : f32 to vector<64x64xf32>
    %116 = arith.mulf %115, %111 : vector<64x64xf32>
    %117 = arith.mulf %116, %111 : vector<64x64xf32>
    %118 = arith.mulf %117, %111 : vector<64x64xf32>
    %119 = arith.addf %111, %118 : vector<64x64xf32>
    %cst_46 = arith.constant 0.797884583 : f32
    %120 = vector.broadcast %cst_46 : f32 to vector<64x64xf32>
    %121 = arith.mulf %120, %119 : vector<64x64xf32>
    %122 = math.tanh %121 : vector<64x64xf32>
    %cst_47 = arith.constant 1.000000e+00 : f32
    %123 = vector.broadcast %cst_47 : f32 to vector<64x64xf32>
    %124 = arith.addf %123, %122 : vector<64x64xf32>
    %125 = arith.mulf %114, %124 : vector<64x64xf32>
    %126 = arith.mulf %125, %112 : vector<64x64xf32>
    %127 = arith.truncf %126 : vector<64x64xf32> to vector<64x64xbf16>
    %c0_48 = arith.constant 0 : index
    %c0_49 = arith.constant 0 : index
    %c0_50 = arith.constant 0 : index
    %128 = vector.load %arg10[%c0_48, %c0_49, %c0_50] : memref<2x64x32xbf16, #tpu.memory_space<vmem>>, vector<1x64x32xbf16>
    %129 = vector.shape_cast %128 : vector<1x64x32xbf16> to vector<64x32xbf16>
    %cst_51 = arith.constant dense<0.000000e+00> : vector<64x32xf32>
    %130 = tpu.matmul %127, %129, %cst_51 {dimension_numbers = #tpu.dot_dimension_numbers<[1], [0], [0], [1], [0, 0, 1, 1], [], []>} : vector<64x64xbf16>, vector<64x32xbf16>, vector<64x32xf32> -> vector<64x32xf32>
    %131 = arith.addf %92, %130 : vector<64x32xf32>
    %c1 = arith.constant 1 : index
    %c0_52 = arith.constant 0 : index
    %c0_53 = arith.constant 0 : index
    %132 = vector.load %arg5[%c1, %c0_52, %c0_53] : memref<2x1x32xf32, #tpu.memory_space<vmem>>, vector<1x1x32xf32>
    %133 = vector.shape_cast %132 : vector<1x1x32xf32> to vector<1x32xf32>
    %134 = arith.mulf %131, %131 : vector<64x32xf32>
    %cst_54 = arith.constant dense<0.000000e+00> : vector<64xf32>
    %135 = vector.multi_reduction <add>, %134, %cst_54 [1] : vector<64x32xf32> to vector<64xf32>
    %136 = vector.shape_cast %135 : vector<64xf32> to vector<64x1xf32>
    %cst_55 = arith.constant 3.200000e+01 : f32
    %137 = vector.broadcast %cst_55 : f32 to vector<64x1xf32>
    %138 = arith.divf %136, %137 : vector<64x1xf32>
    %cst_56 = arith.constant 9.99999997E-7 : f32
    %139 = vector.broadcast %cst_56 : f32 to vector<64x1xf32>
    %140 = arith.addf %138, %139 : vector<64x1xf32>
    %141 = math.rsqrt %140 : vector<64x1xf32>
    %142 = vector.broadcast %141 : vector<64x1xf32> to vector<64x32xf32>
    %143 = arith.mulf %131, %142 : vector<64x32xf32>
    %144 = vector.broadcast %133 : vector<1x32xf32> to vector<64x32xf32>
    %145 = arith.mulf %143, %144 : vector<64x32xf32>
    %146 = arith.truncf %145 : vector<64x32xf32> to vector<64x32xbf16>
    %147 = vector.shape_cast %146 : vector<64x32xbf16> to vector<1x64x32xbf16>
    %148 = vector.broadcast %147 : vector<1x64x32xbf16> to vector<12x64x32xbf16>
    %149 = vector.extract_strided_slice %37 {offsets = [12, 0, 0], sizes = [12, 32, 8], strides = [1, 1, 1]} : vector<24x32x8xbf16> to vector<12x32x8xbf16>
    "tpu.trace_start"() <{level = 10 : i32, message = "htd,hdk->htk"}> : () -> ()
    %cst_57 = arith.constant dense<0.000000e+00> : vector<12x64x8xf32>
    %150 = tpu.matmul %148, %149, %cst_57 {dimension_numbers = #tpu.dot_dimension_numbers<[2], [1], [1], [2], [0, 0, 0, 1, 1, 2], [0], [0]>} : vector<12x64x32xbf16>, vector<12x32x8xbf16>, vector<12x64x8xf32> -> vector<12x64x8xf32>
    "tpu.trace_stop"() : () -> ()
    %151 = vector.extract_strided_slice %150 {offsets = [0, 0, 0], sizes = [4, 64, 8], strides = [1, 1, 1]} : vector<12x64x8xf32> to vector<4x64x8xf32>
    %152 = arith.truncf %151 : vector<4x64x8xf32> to vector<4x64x8xbf16>
    %153 = vector.extract_strided_slice %150 {offsets = [4, 0, 0], sizes = [4, 64, 8], strides = [1, 1, 1]} : vector<12x64x8xf32> to vector<4x64x8xf32>
    %154 = arith.truncf %153 : vector<4x64x8xf32> to vector<4x64x8xbf16>
    %155 = vector.extract_strided_slice %150 {offsets = [8, 0, 0], sizes = [4, 64, 8], strides = [1, 1, 1]} : vector<12x64x8xf32> to vector<4x64x8xf32>
    %156 = arith.truncf %155 : vector<4x64x8xf32> to vector<4x64x8xbf16>
    "tpu.trace_start"() <{level = 10 : i32, message = "hqd,hkd->hqk"}> : () -> ()
    %cst_58 = arith.constant dense<0.000000e+00> : vector<4x64x64xf32>
    %157 = tpu.matmul %152, %154, %cst_58 {dimension_numbers = #tpu.dot_dimension_numbers<[2], [2], [1], [1], [0, 0, 0, 1, 1, 1], [0], [0]>} : vector<4x64x8xbf16>, vector<4x64x8xbf16>, vector<4x64x64xf32> -> vector<4x64x64xf32>
    "tpu.trace_stop"() : () -> ()
    %158 = arith.addf %157, %36 : vector<4x64x64xf32>
    %cst_59 = arith.constant dense<0xFF800000> : vector<4x64xf32>
    %159 = vector.multi_reduction <maximumf>, %158, %cst_59 [2] : vector<4x64x64xf32> to vector<4x64xf32>
    %160 = vector.shape_cast %159 : vector<4x64xf32> to vector<4x64x1xf32>
    %161 = vector.broadcast %160 : vector<4x64x1xf32> to vector<4x64x64xf32>
    %162 = arith.subf %158, %161 : vector<4x64x64xf32>
    %163 = math.exp %162 : vector<4x64x64xf32>
    %cst_60 = arith.constant dense<0.000000e+00> : vector<4x64xf32>
    %164 = vector.multi_reduction <add>, %163, %cst_60 [2] : vector<4x64x64xf32> to vector<4x64xf32>
    %165 = vector.shape_cast %164 : vector<4x64xf32> to vector<4x64x1xf32>
    %166 = tpu.reciprocal %165 {approx = true} : vector<4x64x1xf32> -> vector<4x64x1xf32>
    %167 = vector.broadcast %166 : vector<4x64x1xf32> to vector<4x64x64xf32>
    %168 = arith.mulf %163, %167 : vector<4x64x64xf32>
    %169 = arith.truncf %168 : vector<4x64x64xf32> to vector<4x64x64xbf16>
    "tpu.trace_start"() <{level = 10 : i32, message = "hqk,hkd->hqd"}> : () -> ()
    %cst_61 = arith.constant dense<0.000000e+00> : vector<4x64x8xf32>
    %170 = tpu.matmul %169, %156, %cst_61 {dimension_numbers = #tpu.dot_dimension_numbers<[2], [1], [1], [2], [0, 0, 0, 1, 1, 2], [0], [0]>} : vector<4x64x64xbf16>, vector<4x64x8xbf16>, vector<4x64x8xf32> -> vector<4x64x8xf32>
    "tpu.trace_stop"() : () -> ()
    %171 = vector.extract_strided_slice %38 {offsets = [4, 0, 0], sizes = [4, 8, 32], strides = [1, 1, 1]} : vector<8x8x32xbf16> to vector<4x8x32xbf16>
    %172 = arith.truncf %170 : vector<4x64x8xf32> to vector<4x64x8xbf16>
    "tpu.trace_start"() <{level = 10 : i32, message = "hqd,hdm->hqm"}> : () -> ()
    %cst_62 = arith.constant dense<0.000000e+00> : vector<4x64x32xf32>
    %173 = tpu.matmul %172, %171, %cst_62 {dimension_numbers = #tpu.dot_dimension_numbers<[2], [1], [1], [2], [0, 0, 0, 1, 1, 2], [0], [0]>} : vector<4x64x8xbf16>, vector<4x8x32xbf16>, vector<4x64x32xf32> -> vector<4x64x32xf32>
    "tpu.trace_stop"() : () -> ()
    %174 = vector.extract_strided_slice %173 {offsets = [0, 0, 0], sizes = [1, 64, 32], strides = [1, 1, 1]} : vector<4x64x32xf32> to vector<1x64x32xf32>
    %175 = vector.shape_cast %174 : vector<1x64x32xf32> to vector<64x32xf32>
    %176 = vector.extract_strided_slice %173 {offsets = [1, 0, 0], sizes = [1, 64, 32], strides = [1, 1, 1]} : vector<4x64x32xf32> to vector<1x64x32xf32>
    %177 = vector.shape_cast %176 : vector<1x64x32xf32> to vector<64x32xf32>
    %178 = arith.addf %175, %177 : vector<64x32xf32>
    %179 = vector.extract_strided_slice %173 {offsets = [2, 0, 0], sizes = [1, 64, 32], strides = [1, 1, 1]} : vector<4x64x32xf32> to vector<1x64x32xf32>
    %180 = vector.shape_cast %179 : vector<1x64x32xf32> to vector<64x32xf32>
    %181 = arith.addf %178, %180 : vector<64x32xf32>
    %182 = vector.extract_strided_slice %173 {offsets = [3, 0, 0], sizes = [1, 64, 32], strides = [1, 1, 1]} : vector<4x64x32xf32> to vector<1x64x32xf32>
    %183 = vector.shape_cast %182 : vector<1x64x32xf32> to vector<64x32xf32>
    %184 = arith.addf %181, %183 : vector<64x32xf32>
    %185 = arith.addf %131, %184 : vector<64x32xf32>
    %c1_63 = arith.constant 1 : index
    %c0_64 = arith.constant 0 : index
    %c0_65 = arith.constant 0 : index
    %186 = vector.load %arg8[%c1_63, %c0_64, %c0_65] : memref<2x1x32xf32, #tpu.memory_space<vmem>>, vector<1x1x32xf32>
    %187 = vector.shape_cast %186 : vector<1x1x32xf32> to vector<1x32xf32>
    %188 = arith.mulf %185, %185 : vector<64x32xf32>
    %cst_66 = arith.constant dense<0.000000e+00> : vector<64xf32>
    %189 = vector.multi_reduction <add>, %188, %cst_66 [1] : vector<64x32xf32> to vector<64xf32>
    %190 = vector.shape_cast %189 : vector<64xf32> to vector<64x1xf32>
    %cst_67 = arith.constant 3.200000e+01 : f32
    %191 = vector.broadcast %cst_67 : f32 to vector<64x1xf32>
    %192 = arith.divf %190, %191 : vector<64x1xf32>
    %cst_68 = arith.constant 9.99999997E-7 : f32
    %193 = vector.broadcast %cst_68 : f32 to vector<64x1xf32>
    %194 = arith.addf %192, %193 : vector<64x1xf32>
    %195 = math.rsqrt %194 : vector<64x1xf32>
    %196 = vector.broadcast %195 : vector<64x1xf32> to vector<64x32xf32>
    %197 = arith.mulf %185, %196 : vector<64x32xf32>
    %198 = vector.broadcast %187 : vector<1x32xf32> to vector<64x32xf32>
    %199 = arith.mulf %197, %198 : vector<64x32xf32>
    %200 = arith.truncf %199 : vector<64x32xf32> to vector<64x32xbf16>
    %c1_69 = arith.constant 1 : index
    %c0_70 = arith.constant 0 : index
    %c0_71 = arith.constant 0 : index
    %201 = vector.load %arg9[%c1_69, %c0_70, %c0_71] : memref<2x32x128xbf16, #tpu.memory_space<vmem>>, vector<1x32x128xbf16>
    %202 = vector.shape_cast %201 : vector<1x32x128xbf16> to vector<32x128xbf16>
    %cst_72 = arith.constant dense<0.000000e+00> : vector<64x128xf32>
    %203 = tpu.matmul %200, %202, %cst_72 {dimension_numbers = #tpu.dot_dimension_numbers<[1], [0], [0], [1], [0, 0, 1, 1], [], []>} : vector<64x32xbf16>, vector<32x128xbf16>, vector<64x128xf32> -> vector<64x128xf32>
    %204 = vector.extract_strided_slice %203 {offsets = [0, 0], sizes = [64, 64], strides = [1, 1]} : vector<64x128xf32> to vector<64x64xf32>
    %205 = vector.extract_strided_slice %203 {offsets = [0, 64], sizes = [64, 64], strides = [1, 1]} : vector<64x128xf32> to vector<64x64xf32>
    %cst_73 = arith.constant 5.000000e-01 : f32
    %206 = vector.broadcast %cst_73 : f32 to vector<64x64xf32>
    %207 = arith.mulf %206, %204 : vector<64x64xf32>
    %cst_74 = arith.constant 4.471500e-02 : f32
    %208 = vector.broadcast %cst_74 : f32 to vector<64x64xf32>
    %209 = arith.mulf %208, %204 : vector<64x64xf32>
    %210 = arith.mulf %209, %204 : vector<64x64xf32>
    %211 = arith.mulf %210, %204 : vector<64x64xf32>
    %212 = arith.addf %204, %211 : vector<64x64xf32>
    %cst_75 = arith.constant 0.797884583 : f32
    %213 = vector.broadcast %cst_75 : f32 to vector<64x64xf32>
    %214 = arith.mulf %213, %212 : vector<64x64xf32>
    %215 = math.tanh %214 : vector<64x64xf32>
    %cst_76 = arith.constant 1.000000e+00 : f32
    %216 = vector.broadcast %cst_76 : f32 to vector<64x64xf32>
    %217 = arith.addf %216, %215 : vector<64x64xf32>
    %218 = arith.mulf %207, %217 : vector<64x64xf32>
    %219 = arith.mulf %218, %205 : vector<64x64xf32>
    %220 = arith.truncf %219 : vector<64x64xf32> to vector<64x64xbf16>
    %c1_77 = arith.constant 1 : index
    %c0_78 = arith.constant 0 : index
    %c0_79 = arith.constant 0 : index
    %221 = vector.load %arg10[%c1_77, %c0_78, %c0_79] : memref<2x64x32xbf16, #tpu.memory_space<vmem>>, vector<1x64x32xbf16>
    %222 = vector.shape_cast %221 : vector<1x64x32xbf16> to vector<64x32xbf16>
    %cst_80 = arith.constant dense<0.000000e+00> : vector<64x32xf32>
    %223 = tpu.matmul %220, %222, %cst_80 {dimension_numbers = #tpu.dot_dimension_numbers<[1], [0], [0], [1], [0, 0, 1, 1], [], []>} : vector<64x64xbf16>, vector<64x32xbf16>, vector<64x32xf32> -> vector<64x32xf32>
    %224 = arith.addf %185, %223 : vector<64x32xf32>
    %c0_81 = arith.constant 0 : index
    %c0_82 = arith.constant 0 : index
    %225 = vector.load %arg11[%c0_81, %c0_82] : memref<1x32xf32, #tpu.memory_space<vmem>>, vector<1x32xf32>
    %226 = arith.mulf %224, %224 : vector<64x32xf32>
    %cst_83 = arith.constant dense<0.000000e+00> : vector<64xf32>
    %227 = vector.multi_reduction <add>, %226, %cst_83 [1] : vector<64x32xf32> to vector<64xf32>
    %228 = vector.shape_cast %227 : vector<64xf32> to vector<64x1xf32>
    %cst_84 = arith.constant 3.200000e+01 : f32
    %229 = vector.broadcast %cst_84 : f32 to vector<64x1xf32>
    %230 = arith.divf %228, %229 : vector<64x1xf32>
    %cst_85 = arith.constant 9.99999997E-7 : f32
    %231 = vector.broadcast %cst_85 : f32 to vector<64x1xf32>
    %232 = arith.addf %230, %231 : vector<64x1xf32>
    %233 = math.rsqrt %232 : vector<64x1xf32>
    %234 = vector.broadcast %233 : vector<64x1xf32> to vector<64x32xf32>
    %235 = arith.mulf %224, %234 : vector<64x32xf32>
    %236 = vector.broadcast %225 : vector<1x32xf32> to vector<64x32xf32>
    %237 = arith.mulf %235, %236 : vector<64x32xf32>
    %c0_86 = arith.constant 0 : index
    %c0_87 = arith.constant 0 : index
    %238 = vector.load %arg12[%c0_86, %c0_87] : memref<32x8xf32, #tpu.memory_space<vmem>>, vector<32x8xf32>
    %cst_88 = arith.constant dense<0.000000e+00> : vector<64x8xf32>
    %239 = tpu.matmul %237, %238, %cst_88 {dimension_numbers = #tpu.dot_dimension_numbers<[1], [0], [0], [1], [0, 0, 1, 1], [], []>} : vector<64x32xf32>, vector<32x8xf32>, vector<64x8xf32> -> vector<64x8xf32>
    %c0_89 = arith.constant 0 : index
    %c0_90 = arith.constant 0 : index
    %240 = vector.load %arg13[%c0_89, %c0_90] : memref<1x8xf32, #tpu.memory_space<vmem>>, vector<1x8xf32>
    %241 = vector.broadcast %240 : vector<1x8xf32> to vector<64x8xf32>
    %242 = arith.addf %239, %241 : vector<64x8xf32>
    %243 = vector.broadcast %24 : vector<64x1xf32> to vector<64x8xf32>
    %244 = arith.mulf %242, %243 : vector<64x8xf32>
    %245 = vector.broadcast %20 : vector<64x1xf32> to vector<64x8xf32>
    %246 = arith.addf %244, %245 : vector<64x8xf32>
    %c0_91 = arith.constant 0 : index
    %c0_92 = arith.constant 0 : index
    %247 = vector.load %arg14[%c0_91, %c0_92] : memref<64x8xf32, #tpu.memory_space<vmem>>, vector<64x8xf32>
    tpu.vector_store %arg14[%c0_91, %c0_92], %246 {strides = array<i32>} : memref<64x8xf32, #tpu.memory_space<vmem>>, vector<64x8xf32>,
    return
  }
}

</mosaic_0001>

<bundles_post_ra>
// kernel: model_forward.1
= control target key start
LH: loop header
LB: loop body
LE: loop exit
PB: predicated region body
PF: predicated region fallthrough
CT: control target
= control target key end

     0   :  { %vm49_vm0 = vcmask 523264   ;;  %v70_v11 = vlaneseq  ;;  %vm200_vm3 = vcmask 64512   ;;  %vm475_vm4 = vcmask 261120   ;;  %s8426_s24 = smov 64   ;;  %s10973_s0 = inlined_call_operand.vmem [shape: f32[8,64], index: 0, kind: input, shape index: {}]   ;;  %s10974_s2 = inlined_call_operand.vmem [shape: f32[8,32], index: 2, kind: input, shape index: {}]   ;;  %s10975_s1 = inlined_call_operand.vmem [shape: f32[64,8], index: 1, kind: input, shape index: {}]   ;;  %s10976_s3 = inlined_call_operand.vmem [shape: f32[64,32], index: 3, kind: input, shape index: {}]   ;;  %s10977_s6 = inlined_call_operand.vmem [shape: bf16[24,32,8], index: 6, kind: input, shape index: {}]   ;;  %s10978_s5 = inlined_call_operand.vmem [shape: f32[2,1,32], index: 5, kind: input, shape index: {}]   ;;  %s10979_s4 = inlined_call_operand.vmem [shape: f32[4,64,64], index: 4, kind: input, shape index: {}]   ;;  %s10980_s7 = inlined_call_operand.vmem [shape: bf16[8,8,32], index: 7, kind: input, shape index: {}]   ;;  %s10981_s9 = inlined_call_operand.vmem [shape: bf16[2,32,128], index: 9, kind: input, shape index: {}]   ;;  %s10982_s8 = inlined_call_operand.vmem [shape: f32[2,1,32], index: 8, kind: input, shape index: {}]   ;;  %s10983_s10 = inlined_call_operand.vmem [shape: bf16[2,64,32], index: 10, kind: input, shape index: {}]   ;;  %s10984_s12 = inlined_call_operand.vmem [shape: f32[32,8], index: 12, kind: input, shape index: {}]   ;;  %s10985_s11 = inlined_call_operand.vmem [shape: f32[1,32], index: 11, kind: input, shape index: {}]   ;;  %s10986_s13 = inlined_call_operand.vmem [shape: f32[1,8], index: 13, kind: input, shape index: {}]   ;;  %s10987_s14 = inlined_call_operand.vmem [shape: f32[64,8], index: 14, kind: output, shape index: {}]  }
   0x1   :  { %v48_v0 = vld [vmem:[%s10973_s0] sm:$0xff]  ;;  %v152_v36 = vld [vmem:[%s10975_s1 + $0x8] sm:$0xff]  ;;  %v153_v39 = vld [vmem:[%s10975_s1 + $0x10] sm:$0xff]  ;;  %vm2595_vm5 = vcmask 1043456  }
   0x2   :  { %v50_v1 = vsel %vm49_vm0, %v48_v0, 0.0  ;;  %v191_v7 = vld [vmem:[%s10974_s2] sm:$0xff]  ;;  %v8513_v12 = vshrl.u32 %v70_v11, 7  ;;  %v154_v47 = vld [vmem:[%s10975_s1 + $0x18] sm:$0xff]  ;;  %v156_v58 = vld [vmem:[%s10975_s1 + $0x28] sm:$0xff] }
   0x3   :  { %51 = vadd.xlane.f32.xlu0 %v50_v1  ;;  %7137 = vmatprep.subr.mxu0 %v191_v7  ;;  %v151_v34 = vld [vmem:[%s10975_s1] sm:$0xff]  ;;  %v157_v61 = vld [vmem:[%s10975_s1 + $0x30] sm:$0xff] }
   0x4   :  { %7138 = vmatpush3.msra.mxu0 %v191_v7  ;;  %v72_v16 = vsub.s32 0, %v8513_v12  ;;  %v76_v18 = vsub.s32 1, %v8513_v12  ;;  %v80_v19 = vsub.s32 2, %v8513_v12  ;;  %v84_v21 = vsub.s32 3, %v8513_v12  ;;  %v155_v51 = vld [vmem:[%s10975_s1 + $0x20] sm:$0xff] }
   0x5   :  { %v88_v25 = vsub.s32 4, %v8513_v12  ;;  %v92_v28 = vsub.s32 5, %v8513_v12  ;;  %v96_v29 = vsub.s32 6, %v8513_v12  ;;  %v100_v33 = vsub.s32 7, %v8513_v12  ;;  %v192_v11 = vld [vmem:[%s10976_s3] sm:$0xff] }
  0x90   :  { %v52_v2 = vpop.xlane.xlu0 %51 }
  0x91   :  { %v8506_v3 = vmul.f32 0.015625, %v52_v2 }
  0x93   :  { %v55_v4 = vsub.f32 %v48_v0, %v8506_v3  ;;  %v8542_v32 = vrot.slane %v8506_v3, %v72_v16  ;;  %v8549_v35 = vrot.slane %v8506_v3, %v76_v18  ;;  %v8555_v37 = vrot.slane %v8506_v3, %v80_v19 }
  0x94   :  { %v8567_v43 = vrot.slane %v8506_v3, %v84_v21  ;;  %v8574_v48 = vrot.slane %v8506_v3, %v88_v25  ;;  %v8584_v56 = vrot.slane %v8506_v3, %v92_v28  ;;  %v8592_v59 = vrot.slane %v8506_v3, %v96_v29 }
  0x95   :  { %v56_v5 = vmul.f32 %v55_v4, %v55_v4  ;;  %11009 = vst [vmem:[#allocation8_spill] sm:$0xff] %v8542_v32  ;;  %11010 = vst [vmem:[#allocation9_spill] sm:$0xff] %v8549_v35  ;;  %v159_v40 = vsub.f32 %v151_v34, %v8542_v32  ;;  %v160_v42 = vsub.f32 %v152_v36, %v8549_v35  ;;  %v196_v34 = vld [vmem:[%s10976_s3 + $0x20] sm:$0xff] }
  0x96   :  { %11011 = vst [vmem:[#allocation10_spill] sm:$0xff] %v8555_v37  ;;  %11013 = vst [vmem:[#allocation12_spill] sm:$0xff] %v8567_v43  ;;  %v161_v46 = vsub.f32 %v153_v39, %v8555_v37  ;;  %v162_v55 = vsub.f32 %v154_v47, %v8567_v43  ;;  %v163_v57 = vsub.f32 %v155_v51, %v8574_v48  ;;  %v199_v47 = vld [vmem:[%s10976_s3 + $0x38] sm:$0xff] }
  0x97   :  { %v57_v6 = vsel %vm49_vm0, %v56_v5, 0.0  ;;  %11014 = vst [vmem:[#allocation13_spill] sm:$0xff] %v8574_v48  ;;  %11015 = vst [vmem:[#allocation14_spill] sm:$0xff] %v8584_v56  ;;  %v164_v1 = vsub.f32 %v156_v58, %v8584_v56  ;;  %v8600_v2 = vrot.slane %v8506_v3, %v100_v33  ;;  %v165_v4 = vsub.f32 %v157_v61, %v8592_v59  ;;  %v158_v5 = vld [vmem:[%s10975_s1 + $0x38] sm:$0xff]  ;;  %v193_v3 = vld [vmem:[%s10976_s3 + $0x8] sm:$0xff] }
  0x98   :  { %58 = vadd.xlane.f32.xlu0 %v57_v6  ;;  %11016 = vst [vmem:[#allocation15_spill] sm:$0xff] %v8592_v59 }
  0x99   :  { %11017 = vst [vmem:[#allocation16_spill] sm:$0xff] %v8600_v2 }
 0x125   :  { %v59_v8 = vpop.xlane.xlu0 %58 }
 0x126   :  { %v60_v9 = vmul.f32 0.015625, %v59_v8 }
 0x128   :  { %v61_v10 = vadd.f32 1e-05, %v60_v9  ;;  %v166_v9 = vsub.f32 %v158_v5, %v8600_v2  ;;  %v7950_v5 = vld [vmem:[%s10977_s6 + $0x8] sm:$0xff]  }
 0x12a   :  { %8008 = vrsqrt.f32 %v61_v10  ;;  %vm64_vm1 = vcmp.eq.f32.partialorder %v61_v10, inf  ;;  %v67_v15 = vand.u32 2147483648, %v61_v10  ;;  %vm66_vm2 = vcmp.eq.f32.partialorder %v61_v10, 0.0 }
 0x134   :  { %v8009_v13 = vpop.eup %8008 }
 0x135   :  { %v63_v14 = vmul.f32 %v8009_v13, %v61_v10 }
 0x137   :  { %v65_v17 = vsel %vm64_vm1, %v61_v10, %v63_v14 }
 0x138   :  { %v68_v20 = vsel %vm66_vm2, %v67_v15, %v65_v17  ;;  %v194_v17 = vld [vmem:[%s10976_s3 + $0x10] sm:$0xff] }
 0x139   :  { %v8519_v22 = vrot.slane %v68_v20, %v72_v16  ;;  %v8521_v23 = vrot.slane %v68_v20, %v76_v18  ;;  %v8523_v24 = vrot.slane %v68_v20, %v80_v19  ;;  %v8526_v26 = vrot.slane %v68_v20, %v84_v21  ;;  %v195_v16 = vld [vmem:[%s10976_s3 + $0x18] sm:$0xff] }
 0x13a   :  { %v8529_v27 = vrot.slane %v68_v20, %v88_v25  ;;  %v8536_v30 = vrot.slane %v68_v20, %v92_v28  ;;  %v8539_v31 = vrot.slane %v68_v20, %v96_v29  ;;  %v8558_v38 = vrot.slane %v68_v20, %v100_v33  ;;  %v197_v33 = vld [vmem:[%s10976_s3 + $0x28] sm:$0xff] }
 0x13b   :  { %11003 = vst [vmem:[#allocation2_spill] sm:$0xff] %v8519_v22  ;;  %11004 = vst [vmem:[#allocation3_spill] sm:$0xff] %v8523_v24  ;;  %8010 = vrcp.f32 %v8519_v22 }
 0x13c   :  { %11005 = vst [vmem:[#allocation4_spill] sm:$0xff] %v8526_v26  ;;  %11006 = vst [vmem:[#allocation5_spill] sm:$0xff] %v8529_v27  ;;  %8012 = vrcp.f32 %v8521_v23 }
 0x13d   :  { %8014 = vrcp.f32 %v8523_v24  ;;  %11007 = vst [vmem:[#allocation6_spill] sm:$0xff] %v8536_v30  ;;  %11008 = vst [vmem:[#allocation7_spill] sm:$0xff] %v8539_v31 }
 0x13e   :  { %8016 = vrcp.f32 %v8526_v26  ;;  %11012 = vst [vmem:[#allocation11_spill] sm:$0xff] %v8558_v38 }
 0x13f   :  { %8018 = vrcp.f32 %v8529_v27 }
 0x140   :  { %8020 = vrcp.f32 %v8536_v30 }
 0x141   :  { %8022 = vrcp.f32 %v8539_v31 }
 0x142   :  { %8024 = vrcp.f32 %v8558_v38 }
 0x145   :  { %v8011_v41 = vpop.eup %8010 }
 0x146   :  { %v8013_v44 = vpop.eup %8012  ;;  %v183_v45 = vmul.f32 %v8011_v41, %v159_v40 }
 0x147   :  { %v8015_v49 = vpop.eup %8014  ;;  %v184_v50 = vmul.f32 %v8013_v44, %v160_v42 }
 0x148   :  { %v8017_v52 = vpop.eup %8016  ;;  %7139 = vmatprep.mubr.msk.f32.mxu0 %vm200_vm3, %v183_v45  ;;  %v185_v53 = vmul.f32 %v8015_v49, %v161_v46  ;;  %v198_v49 = vld [vmem:[%s10976_s3 + $0x30] sm:$0xff] }
 0x149   :  { %v8019_v54 = vpop.eup %8018  ;;  %7140 = vmatmul.mubr.msk.f32.vlgmr.msra.gmra.mrb[0].mxu0 %vm200_vm3, %v184_v50  ;;  %v186_v60 = vmul.f32 %v8017_v52, %v162_v55 }
 0x14a   :  { %7142 = vmatprep.mubr.msk.f32.mxu0 %vm200_vm3, %v185_v53  ;;  %v8021_v62 = vpop.eup %8020  ;;  %v187_v63 = vmul.f32 %v8019_v54, %v163_v57 }
 0x14b   :  { %v8023_v0 = vpop.eup %8022  ;;  %v188_v6 = vmul.f32 %v8021_v62, %v164_v1  ;;  %v7948_v1 = vld [vmem:[%s10977_s6] sm:$0xff]  }
 0x14c   :  { %v8025_v7 = vpop.eup %8024  ;;  %v189_v8 = vmul.f32 %v8023_v0, %v165_v4  ;;  %v7949_v4 = vld [vmem:[%s10977_s6 + $0x10] sm:$0xff]   ;;  %7151 = vmatprep.subr.bf16.mxu1 %v7948_v1 }
 0x14d   :  { %7143 = vmatmul.mubr.msk.f32.gmra.mrb[2].mxu0 %vm200_vm3, %v186_v60  ;;  %v190_v10 = vmul.f32 %v8025_v7, %v166_v9  ;;  %7152 = vmatpush3.bf16.msra.mxu1 %v7948_v1  ;;  %v8690_v7 = vld [vmem:[%s10977_s6 + $0x20] sm:$0xff]  }
 0x14e   :  { %7145 = vmatprep.mubr.msk.f32.mxu0 %vm200_vm3, %v187_v63  ;;  %7163 = vmatprep.subr.bf16.mxu0 %v7949_v4 }
 0x14f   :  { %7164 = vmatpush3.bf16.msra.mxu0 %v7949_v4  ;;  %7153 = vmatprep.subr.bf16.mxu1 %v7950_v5 }
 0x151   :  { %7146 = vmatmul.mubr.msk.f32.gmra.mrb[4].mxu0 %vm200_vm3, %v188_v6  ;;  %v7951_v6 = vld [vmem:[%s10977_s6 + $0x18] sm:$0xff]   ;;  %7154 = vmatpush3.bf16.msra.mxu1 %v7950_v5 }
 0x152   :  { %7148 = vmatprep.mubr.msk.f32.mxu0 %vm200_vm3, %v189_v8  ;;  %7165 = vmatprep.subr.bf16.mxu0 %v7951_v6  ;;  %v8696_v8 = vld [vmem:[%s10977_s6 + $0x30] sm:$0xff]  }
 0x153   :  { %7166 = vmatpush3.bf16.msra.mxu0 %v7951_v6  ;;  %7175 = vmatprep.subr.bf16.mxu1 %v8690_v7 }
 0x154   :  { %7187 = vmatprep.subr.bf16.mxu0 %v8696_v8 }
 0x155   :  { %7149 = vmatmul.mubr.msk.f32.gmra.mrb[6].mxu0 %vm200_vm3, %v190_v10 }
 0x21c   :  { %v7141_v12 = vpop.f32.mrb[0].mxu0 }
 0x21d   :  { %v8617_v13 = vadd.f32 %v7141_v12, %v193_v3  ;;  %v291_v14 = vpop.f32.mrb[1].mxu0 }
 0x21e   :  { %v8619_v15 = vadd.f32 %v291_v14, %v192_v11 }
 0x21f   :  { %v468_v18 = vmul.f32 %v8617_v13, %v8617_v13 }
 0x220   :  { %v7144_v19 = vpop.f32.mrb[2].mxu0  ;;  %v467_v28 = vmul.f32 %v8619_v15, %v8619_v15 }
 0x221   :  { %v8629_v20 = vadd.f32 %v7144_v19, %v195_v16  ;;  %v301_v21 = vpop.f32.mrb[3].mxu0  ;;  %v479_v25 = vsel %vm475_vm4, %v468_v18, 0.0 }
 0x222   :  { %v8634_v29 = vadd.f32 %v301_v21, %v194_v17  ;;  %480 = vadd.xlane.f32.xlu1 %v479_v25  ;;  %v476_v42 = vsel %vm475_vm4, %v467_v28, 0.0 }
 0x223   :  { %v470_v44 = vmul.f32 %v8629_v20, %v8629_v20 }
 0x224   :  { %v7147_v36 = vpop.f32.mrb[4].mxu0  ;;  %v469_v39 = vmul.f32 %v8634_v29, %v8634_v29 }
 0x225   :  { %v8644_v40 = vadd.f32 %v7147_v36, %v197_v33  ;;  %v311_v41 = vpop.f32.mrb[5].mxu0  ;;  %v485_v54 = vsel %vm475_vm4, %v470_v44, 0.0 }
 0x226   :  { %v8649_v45 = vadd.f32 %v311_v41, %v196_v34  ;;  %477 = vadd.xlane.f32.xlu1 %v476_v42  ;;  %v482_v46 = vsel %vm475_vm4, %v469_v39, 0.0 }
 0x227   :  { %483 = vadd.xlane.f32.xlu0 %v482_v46  ;;  %v472_v55 = vmul.f32 %v8644_v40, %v8644_v40 }
 0x228   :  { %v7150_v50 = vpop.f32.mrb[6].mxu0  ;;  %v471_v51 = vmul.f32 %v8649_v45, %v8649_v45 }
 0x229   :  { %v8660_v52 = vadd.f32 %v7150_v50, %v199_v47  ;;  %v321_v53 = vpop.f32.mrb[7].mxu0  ;;  %v491_v61 = vsel %vm475_vm4, %v472_v55, 0.0 }
 0x22a   :  { %v8665_v57 = vadd.f32 %v321_v53, %v198_v49  ;;  %486 = vadd.xlane.f32.xlu1 %v485_v54  ;;  %v488_v58 = vsel %vm475_vm4, %v471_v51, 0.0  ;;  %v6480_v54 = vld [vmem:[%s10978_s5] ss:$0 sm:$0xff] }
 0x22b   :  { %489 = vadd.xlane.f32.xlu0 %v488_v58  ;;  %v474_v62 = vmul.f32 %v8660_v52, %v8660_v52 }
 0x22c   :  { %v473_v60 = vmul.f32 %v8665_v57, %v8665_v57 }
 0x22d   :  { %v497_v0 = vsel %vm475_vm4, %v474_v62, 0.0 }
 0x22e   :  { %492 = vadd.xlane.f32.xlu1 %v491_v61  ;;  %v494_v63 = vsel %vm475_vm4, %v473_v60, 0.0 }
 0x22f   :  { %495 = vadd.xlane.f32.xlu0 %v494_v63 }
 0x232   :  { %498 = vadd.xlane.f32.xlu1 %v497_v0 }
 0x2af   :  { %v481_v9 = vpop.xlane.xlu1 %480 }
 0x2b0   :  { %v502_v10 = vmul.f32 0.03125, %v481_v9 }
 0x2b2   :  { %v510_v3 = vadd.f32 1e-06, %v502_v10 }
 0x2b3   :  { %v478_v11 = vpop.xlane.xlu1 %477 }
 0x2b4   :  { %8026 = vrsqrt.f32 %v510_v3  ;;  %v501_v12 = vmul.f32 0.03125, %v478_v11  ;;  %v484_v14 = vpop.xlane.xlu0 %483 }
 0x2b5   :  { %v503_v16 = vmul.f32 0.03125, %v484_v14 }
 0x2b6   :  { %v509_v17 = vadd.f32 1e-06, %v501_v12 }
 0x2b7   :  { %v511_v18 = vadd.f32 1e-06, %v503_v16  ;;  %v487_v19 = vpop.xlane.xlu1 %486  ;;  %v7953_v16 = vld [vmem:[%s10977_s6 + $0x28] sm:$0xff]  }
 0x2b8   :  { %8028 = vrsqrt.f32 %v509_v17  ;;  %v504_v21 = vmul.f32 0.03125, %v487_v19  ;;  %v490_v25 = vpop.xlane.xlu0 %489  ;;  %v7955_v17 = vld [vmem:[%s10977_s6 + $0x38] sm:$0xff]  }
 0x2b9   :  { %8030 = vrsqrt.f32 %v511_v18  ;;  %v505_v28 = vmul.f32 0.03125, %v490_v25 }
 0x2ba   :  { %v512_v33 = vadd.f32 1e-06, %v504_v21 }
 0x2bb   :  { %v513_v34 = vadd.f32 1e-06, %v505_v28  ;;  %v493_v36 = vpop.xlane.xlu1 %492 }
 0x2bc   :  { %8032 = vrsqrt.f32 %v512_v33  ;;  %v506_v39 = vmul.f32 0.03125, %v493_v36  ;;  %v496_v41 = vpop.xlane.xlu0 %495  ;;  %v7958_v36 = vld [vmem:[%s10977_s6 + $0x50] sm:$0xff]  }
 0x2bd   :  { %8034 = vrsqrt.f32 %v513_v34  ;;  %v507_v42 = vmul.f32 0.03125, %v496_v41  ;;  %v7956_v34 = vld [vmem:[%s10977_s6 + $0x40] sm:$0xff]  }
 0x2be   :  { %v8027_v44 = vpop.eup %8026  ;;  %v514_v46 = vadd.f32 1e-06, %v506_v39 }
 0x2bf   :  { %v515_v47 = vadd.f32 1e-06, %v507_v42  ;;  %v499_v49 = vpop.xlane.xlu1 %498  ;;  %v526_v51 = vmul.f32 %v8027_v44, %v8617_v13  ;;  %v7959_v42 = vld [vmem:[%s10977_s6 + $0x58] sm:$0xff]   ;;  %v7960_v44 = vld [vmem:[%s10977_s6 + $0x60] sm:$0xff]  }
 0x2c0   :  { %8036 = vrsqrt.f32 %v514_v46  ;;  %v508_v50 = vmul.f32 0.03125, %v499_v49  ;;  %v7961_v46 = vld [vmem:[%s10977_s6 + $0x70] sm:$0xff]   ;;  %v7963_v49 = vld [vmem:[%s10977_s6 + $0x78] sm:$0xff]  }
 0x2c1   :  { %8038 = vrsqrt.f32 %v515_v47  ;;  %v540_v61 = vmul.f32 %v6480_v54, %v526_v51  ;;  %v7962_v47 = vld [vmem:[%s10977_s6 + $0x68] sm:$0xff]   ;;  %v7965_v51 = vld [vmem:[%s10977_s6 + $0x90] sm:$0xff]  }
 0x2c2   :  { %v8029_v53 = vpop.eup %8028  ;;  %v516_v55 = vadd.f32 1e-06, %v508_v50  ;;  %v7964_v50 = vld [vmem:[%s10977_s6 + $0x80] sm:$0xff]  }
 0x2c3   :  { %v8031_v58 = vpop.eup %8030  ;;  %v525_v60 = vmul.f32 %v8029_v53, %v8619_v15  ;;  %v7966_v53 = vld [vmem:[%s10977_s6 + $0x88] sm:$0xff]  }
 0x2c4   :  { %8040 = vrsqrt.f32 %v516_v55  ;;  %v527_v63 = vmul.f32 %v8031_v58, %v8634_v29  ;;  %v7968_v55 = vld [vmem:[%s10977_s6 + $0xa0] sm:$0xff]   ;;  %v7969_v58 = vld [vmem:[%s10977_s6 + $0xb0] sm:$0xff]  }
 0x2c5   :  { %v539_v62 = vmul.f32 %v6480_v54, %v525_v60  ;;  %v7970_v60 = vld [vmem:[%s10977_s6 + $0xa8] sm:$0xff]  }
 0x2c6   :  { %v8033_v0 = vpop.eup %8032  ;;  %v541_v6 = vmul.f32 %v6480_v54, %v527_v63 }
 0x2c7   :  { %v8035_v1 = vpop.eup %8034  ;;  %v8705_v4 = vpack.c.bf16 %v540_v61, %v539_v62  ;;  %v528_v5 = vmul.f32 %v8033_v0, %v8629_v20  ;;  %v7971_v61 = vld [vmem:[%s10977_s6 + $0xb8] sm:$0xff]  }
 0x2c8   :  { %v529_v10 = vmul.f32 %v8035_v1, %v8649_v45 }
 0x2c9   :  { %v542_v9 = vmul.f32 %v6480_v54, %v528_v5  ;;  %7155 = vmatprep.mubr.msk.bf16.mxu1 %vm475_vm4, %v8705_v4  ;;  %7167 = vmatprep.mubr.msk.bf16.mxu0 %vm475_vm4, %v8705_v4 }
 0x2ca   :  { %v8037_v3 = vpop.eup %8036  ;;  %v543_v18 = vmul.f32 %v6480_v54, %v529_v10 }
 0x2cb   :  { %v8039_v11 = vpop.eup %8038  ;;  %v8713_v12 = vpack.c.bf16 %v542_v9, %v541_v6  ;;  %v530_v14 = vmul.f32 %v8037_v3, %v8644_v40 }
 0x2cc   :  { %v531_v21 = vmul.f32 %v8039_v11, %v8665_v57 }
 0x2cd   :  { %v544_v19 = vmul.f32 %v6480_v54, %v530_v14  ;;  %7156 = vmatmul.mubr.msk.bf16.vlgmr.msra.gmra.mrb[0].mxu1 %vm475_vm4, %v8713_v12  ;;  %7168 = vmatmul.mubr.msk.bf16.vlgmr.msra.gmra.mrb[8].mxu0 %vm475_vm4, %v8713_v12 }
 0x2ce   :  { %v8041_v25 = vpop.eup %8040  ;;  %7176 = vmatpush3.bf16.msra.mxu1 %v8690_v7  ;;  %7188 = vmatpush3.bf16.msra.mxu0 %v8696_v8  ;;  %v545_v39 = vmul.f32 %v6480_v54, %v531_v21  ;;  %v7957_v8 = vld [vmem:[%s10977_s6 + $0x48] sm:$0xff]  }
 0x2cf   :  { %v8729_v28 = vpack.c.bf16 %v544_v19, %v543_v18  ;;  %v532_v33 = vmul.f32 %v8041_v25, %v8660_v52  ;;  %7177 = vmatprep.subr.bf16.mxu1 %v7953_v16  ;;  %7189 = vmatprep.subr.bf16.mxu0 %v7955_v17 }
 0x2d1   :  { %v546_v41 = vmul.f32 %v6480_v54, %v532_v33  ;;  %7159 = vmatprep.mubr.msk.bf16.mxu1 %vm475_vm4, %v8729_v28  ;;  %7171 = vmatprep.mubr.msk.bf16.mxu0 %vm475_vm4, %v8729_v28  ;;  %v7967_v54 = vld [vmem:[%s10977_s6 + $0x98] sm:$0xff]  }
 0x2d2   :  { %7178 = vmatpush3.bf16.msra.mxu1 %v7953_v16  ;;  %7190 = vmatpush3.bf16.msra.mxu0 %v7955_v17 }
 0x2d3   :  { %v8742_v7 = vpack.c.bf16 %v546_v41, %v545_v39  ;;  %7199 = vmatprep.subr.bf16.mxu1 %v7956_v34  ;;  %7211 = vmatprep.subr.bf16.mxu0 %v7958_v36 }
 0x2d5   :  { %7160 = vmatmul.mubr.msk.bf16.gmra.mrb[4].mxu1 %vm475_vm4, %v8742_v7  ;;  %7172 = vmatmul.mubr.msk.bf16.gmra.mrb[12].mxu0 %vm475_vm4, %v8742_v7 }
 0x2d6   :  { %7179 = vmatprep.mubr.msk.bf16.mxu1 %vm475_vm4, %v8705_v4  ;;  %7191 = vmatprep.mubr.msk.bf16.mxu0 %vm475_vm4, %v8705_v4 }
 0x2dd   :  { %7180 = vmatmul.mubr.msk.bf16.vlgmr.msra.gmra.mrb[8].mxu1 %vm475_vm4, %v8713_v12  ;;  %7192 = vmatmul.mubr.msk.bf16.vlgmr.msra.gmra.mrb[16].mxu0 %vm475_vm4, %v8713_v12 }
 0x2de   :  { %7200 = vmatpush3.bf16.msra.mxu1 %v7956_v34  ;;  %7183 = vmatprep.mubr.msk.bf16.mxu1 %vm475_vm4, %v8729_v28 }
 0x2df   :  { %7195 = vmatprep.mubr.msk.bf16.mxu0 %vm475_vm4, %v8729_v28  ;;  %7201 = vmatprep.subr.bf16.mxu1 %v7957_v8 }
 0x2e0   :  { %7212 = vmatpush3.bf16.msra.mxu0 %v7958_v36 }
 0x2e1   :  { %7213 = vmatprep.subr.bf16.mxu0 %v7959_v42 }
 0x2e2   :  { %7202 = vmatpush3.bf16.msra.mxu1 %v7957_v8 }
 0x2e3   :  { %7223 = vmatprep.subr.bf16.mxu1 %v7960_v44 }
 0x2e4   :  { %7214 = vmatpush3.bf16.msra.mxu0 %v7959_v42 }
 0x2e5   :  { %7184 = vmatmul.mubr.msk.bf16.gmra.mrb[12].mxu1 %vm475_vm4, %v8742_v7  ;;  %7196 = vmatmul.mubr.msk.bf16.gmra.mrb[20].mxu0 %vm475_vm4, %v8742_v7 }
 0x2e6   :  { %7203 = vmatprep.mubr.msk.bf16.mxu1 %vm475_vm4, %v8705_v4  ;;  %7215 = vmatprep.mubr.msk.bf16.mxu0 %vm475_vm4, %v8705_v4 }
 0x2e7   :  { %7235 = vmatprep.subr.bf16.mxu0 %v7961_v46 }
 0x2ed   :  { %7204 = vmatmul.mubr.msk.bf16.vlgmr.msra.gmra.mrb[16].mxu1 %vm475_vm4, %v8713_v12  ;;  %7216 = vmatmul.mubr.msk.bf16.vlgmr.msra.gmra.mrb[24].mxu0 %vm475_vm4, %v8713_v12 }
 0x2ee   :  { %7207 = vmatprep.mubr.msk.bf16.mxu1 %vm475_vm4, %v8729_v28  ;;  %7219 = vmatprep.mubr.msk.bf16.mxu0 %vm475_vm4, %v8729_v28 }
 0x2ef   :  { %7224 = vmatpush3.bf16.msra.mxu1 %v7960_v44  ;;  %7236 = vmatpush3.bf16.msra.mxu0 %v7961_v46 }
 0x2f0   :  { %7225 = vmatprep.subr.bf16.mxu1 %v7962_v47  ;;  %7237 = vmatprep.subr.bf16.mxu0 %v7963_v49 }
 0x2f3   :  { %7226 = vmatpush3.bf16.msra.mxu1 %v7962_v47  ;;  %7238 = vmatpush3.bf16.msra.mxu0 %v7963_v49 }
 0x2f4   :  { %7247 = vmatprep.subr.bf16.mxu1 %v7964_v50  ;;  %7259 = vmatprep.subr.bf16.mxu0 %v7965_v51 }
 0x2f5   :  { %7208 = vmatmul.mubr.msk.bf16.gmra.mrb[20].mxu1 %vm475_vm4, %v8742_v7  ;;  %7220 = vmatmul.mubr.msk.bf16.gmra.mrb[28].mxu0 %vm475_vm4, %v8742_v7 }
 0x2f6   :  { %7227 = vmatprep.mubr.msk.bf16.mxu1 %vm475_vm4, %v8705_v4  ;;  %7239 = vmatprep.mubr.msk.bf16.mxu0 %vm475_vm4, %v8705_v4 }
 0x2fd   :  { %7228 = vmatmul.mubr.msk.bf16.vlgmr.msra.gmra.mrb[24].mxu1 %vm475_vm4, %v8713_v12  ;;  %7240 = vmatmul.mubr.msk.bf16.vlgmr.msra.gmra.mrb[32].mxu0 %vm475_vm4, %v8713_v12 }
 0x2fe   :  { %7231 = vmatprep.mubr.msk.bf16.mxu1 %vm475_vm4, %v8729_v28  ;;  %7243 = vmatprep.mubr.msk.bf16.mxu0 %vm475_vm4, %v8729_v28 }
 0x2ff   :  { %7248 = vmatpush3.bf16.msra.mxu1 %v7964_v50  ;;  %7260 = vmatpush3.bf16.msra.mxu0 %v7965_v51 }
 0x300   :  { %7249 = vmatprep.subr.bf16.mxu1 %v7966_v53  ;;  %7261 = vmatprep.subr.bf16.mxu0 %v7967_v54 }
 0x303   :  { %7250 = vmatpush3.bf16.msra.mxu1 %v7966_v53  ;;  %7262 = vmatpush3.bf16.msra.mxu0 %v7967_v54 }
 0x304   :  { %7271 = vmatprep.subr.bf16.mxu1 %v7968_v55  ;;  %7283 = vmatprep.subr.bf16.mxu0 %v7969_v58 }
 0x305   :  { %7232 = vmatmul.mubr.msk.bf16.gmra.mrb[28].mxu1 %vm475_vm4, %v8742_v7  ;;  %7244 = vmatmul.mubr.msk.bf16.gmra.mrb[36].mxu0 %vm475_vm4, %v8742_v7 }
 0x306   :  { %7251 = vmatprep.mubr.msk.bf16.mxu1 %vm475_vm4, %v8705_v4  ;;  %7263 = vmatprep.mubr.msk.bf16.mxu0 %vm475_vm4, %v8705_v4 }
 0x30d   :  { %7252 = vmatmul.mubr.msk.bf16.vlgmr.msra.gmra.mrb[32].mxu1 %vm475_vm4, %v8713_v12  ;;  %7264 = vmatmul.mubr.msk.bf16.vlgmr.msra.gmra.mrb[40].mxu0 %vm475_vm4, %v8713_v12 }
 0x30e   :  { %7255 = vmatprep.mubr.msk.bf16.mxu1 %vm475_vm4, %v8729_v28  ;;  %7267 = vmatprep.mubr.msk.bf16.mxu0 %vm475_vm4, %v8729_v28 }
 0x30f   :  { %7272 = vmatpush3.bf16.msra.mxu1 %v7968_v55  ;;  %7284 = vmatpush3.bf16.msra.mxu0 %v7969_v58 }
 0x310   :  { %7273 = vmatprep.subr.bf16.mxu1 %v7970_v60  ;;  %7285 = vmatprep.subr.bf16.mxu0 %v7971_v61 }
 0x313   :  { %7274 = vmatpush3.bf16.msra.mxu1 %v7970_v60  ;;  %7286 = vmatpush3.bf16.msra.mxu0 %v7971_v61 }
 0x315   :  { %7256 = vmatmul.mubr.msk.bf16.gmra.mrb[36].mxu1 %vm475_vm4, %v8742_v7  ;;  %7268 = vmatmul.mubr.msk.bf16.gmra.mrb[44].mxu0 %vm475_vm4, %v8742_v7 }
 0x316   :  { %7275 = vmatprep.mubr.msk.bf16.mxu1 %vm475_vm4, %v8705_v4  ;;  %7287 = vmatprep.mubr.msk.bf16.mxu0 %vm475_vm4, %v8705_v4 }
 0x31d   :  { %7276 = vmatmul.mubr.msk.bf16.vlgmr.msra.gmra.mrb[40].mxu1 %vm475_vm4, %v8713_v12  ;;  %7288 = vmatmul.mubr.msk.bf16.vlgmr.msra.gmra.mrb[48].mxu0 %vm475_vm4, %v8713_v12 }
 0x31e   :  { %7279 = vmatprep.mubr.msk.bf16.mxu1 %vm475_vm4, %v8729_v28  ;;  %7291 = vmatprep.mubr.msk.bf16.mxu0 %vm475_vm4, %v8729_v28 }
 0x325   :  { %7280 = vmatmul.mubr.msk.bf16.gmra.mrb[44].mxu1 %vm475_vm4, %v8742_v7  ;;  %7292 = vmatmul.mubr.msk.bf16.gmra.mrb[52].mxu0 %vm475_vm4, %v8742_v7 }
 0x3a0   :  { %v8870_v62 = vpop.f32.mrb[0].mxu1  ;;  %v8872_v63 = vpop.f32.mrb[8].mxu0 }
 0x3a1   :  { %v609_v0 = vpop.f32.mrb[1].mxu1  ;;  %v686_v1 = vpop.f32.mrb[9].mxu0 }
 0x3a2   :  { %v8874_v4 = vpop.f32.mrb[2].mxu1  ;;  %v8876_v5 = vpop.f32.mrb[10].mxu0 }
 0x3a3   :  { %v612_v10 = vpop.f32.mrb[3].mxu1  ;;  %v689_v3 = vpop.f32.mrb[11].mxu0 }
 0x3a4   :  { %v1487_v11 = vpack.c.bf16 %v612_v10, %v609_v0  ;;  %v1491_v12 = vpack.c.bf16 %v689_v3, %v686_v1 }
 0x3a6   :  { %7303 = vmatprep.mubr.msk.bf16.mxu1 %vm200_vm3, %v1487_v11  ;;  %7319 = vmatprep.mubr.msk.bf16.mxu0 %vm200_vm3, %v1491_v12 }
 0x3a8   :  { %v8884_v14 = vpop.f32.mrb[4].mxu1  ;;  %v8886_v16 = vpop.f32.mrb[12].mxu0 }
 0x3a9   :  { %v8888_v17 = vpop.f32.mrb[5].mxu1  ;;  %v8890_v18 = vpop.f32.mrb[13].mxu0 }
 0x3aa   :  { %v8892_v19 = vpop.f32.mrb[6].mxu1  ;;  %v8894_v21 = vpop.f32.mrb[14].mxu0 }
 0x3ab   :  { %v8900_v33 = vpop.f32.mrb[7].mxu1  ;;  %v8902_v34 = vpop.f32.mrb[15].mxu0 }
 0x3b0   :  { %v8908_v41 = vpop.f32.mrb[8].mxu1  ;;  %v8910_v7 = vpop.f32.mrb[16].mxu0 }
 0x3b1   :  { %v8912_v8 = vpop.f32.mrb[9].mxu1  ;;  %v8914_v42 = vpop.f32.mrb[17].mxu0 }
 0x3b2   :  { %v8916_v44 = vpop.f32.mrb[10].mxu1  ;;  %v8918_v46 = vpop.f32.mrb[18].mxu0 }
 0x3b3   :  { %v8924_v50 = vpop.f32.mrb[11].mxu1  ;;  %v8926_v51 = vpop.f32.mrb[19].mxu0 }
 0x3b8   :  { %v8932_v55 = vpop.f32.mrb[12].mxu1  ;;  %v8934_v58 = vpop.f32.mrb[20].mxu0 }
 0x3b9   :  { %v8936_v60 = vpop.f32.mrb[13].mxu1  ;;  %v8938_v61 = vpop.f32.mrb[21].mxu0 }
 0x3ba   :  { %v8940_v0 = vpop.f32.mrb[14].mxu1  ;;  %v8942_v1 = vpop.f32.mrb[22].mxu0 }
 0x3bb   :  { %v8948_v11 = vpop.f32.mrb[15].mxu1  ;;  %v8950_v12 = vpop.f32.mrb[23].mxu0 }
 0x3c0   :  { %v7205_v54 = vpop.f32.mrb[16].mxu1  ;;  %v7217_v53 = vpop.f32.mrb[24].mxu0 }
 0x3c1   :  { %v917_v28 = vpop.f32.mrb[17].mxu1  ;;  %v994_v25 = vpop.f32.mrb[25].mxu0 }
 0x3c2   :  { %v7206_v39 = vpop.f32.mrb[18].mxu1  ;;  %v7218_v36 = vpop.f32.mrb[26].mxu0 }
 0x3c3   :  { %v1504_v10 = vpack.c.bf16 %v7206_v39, %v7205_v54  ;;  %v1508_v9 = vpack.c.bf16 %v7218_v36, %v7217_v53  ;;  %v920_v6 = vpop.f32.mrb[19].mxu1  ;;  %v997_v3 = vpop.f32.mrb[27].mxu0 }
 0x3c4   :  { %v1503_v59 = vpack.c.bf16 %v920_v6, %v917_v28  ;;  %v1507_v2 = vpack.c.bf16 %v997_v3, %v994_v25 }
 0x3c6   :  { %v1548_v31 = vsel %vm200_vm3, %v1503_v59, 0  ;;  %v1637_v38 = vsel %vm200_vm3, %v1507_v2, 0  ;;  %7907 = vmatprep.subr.msk.bf16.mxu1 %vm200_vm3, %v1503_v59  ;;  %7911 = vmatprep.subr.msk.bf16.mxu0 %vm200_vm3, %v1507_v2  ;;  %v1551_v2 = vsel %vm200_vm3, %v1504_v10, 0 }
 0x3c7   :  { %7296 = vmatpush3.bf16.xpose.msra.mxu1 %v1548_v31  ;;  %7312 = vmatpush3.bf16.xpose.msra.mxu0 %v1637_v38  ;;  %v1640_v31 = vsel %vm200_vm3, %v1508_v9, 0 }
 0x3c8   :  { %v7209_v47 = vpop.f32.mrb[20].mxu1  ;;  %v7221_v49 = vpop.f32.mrb[28].mxu0  ;;  %7908 = vmatprep.subr.msk.bf16.mxu1 %vm200_vm3, %v1504_v10  ;;  %7912 = vmatprep.subr.msk.bf16.mxu0 %vm200_vm3, %v1508_v9 }
 0x3c9   :  { %v933_v36 = vpop.f32.mrb[21].mxu1  ;;  %v1010_v39 = vpop.f32.mrb[29].mxu0 }
 0x3ca   :  { %v7210_v6 = vpop.f32.mrb[22].mxu1  ;;  %v7222_v25 = vpop.f32.mrb[30].mxu0 }
 0x3cb   :  { %v1506_v28 = vpack.c.bf16 %v7210_v6, %v7209_v47  ;;  %v1510_v53 = vpack.c.bf16 %v7222_v25, %v7221_v49  ;;  %v936_v54 = vpop.f32.mrb[23].mxu1  ;;  %v1013_v3 = vpop.f32.mrb[31].mxu0 }
 0x3cc   :  { %v1505_v48 = vpack.c.bf16 %v936_v54, %v933_v36  ;;  %v1509_v59 = vpack.c.bf16 %v1013_v3, %v1010_v39 }
 0x3ce   :  { %v1554_v54 = vsel %vm200_vm3, %v1505_v48, 0  ;;  %v1643_v3 = vsel %vm200_vm3, %v1509_v59, 0 }
 0x3cf   :  { %7298 = vmatpush3.bf16.xpose.msra.mxu1 %v1551_v2  ;;  %7314 = vmatpush3.bf16.xpose.msra.mxu0 %v1640_v31 }
 0x3d0   :  { %v7229_v38 = vpop.f32.mrb[24].mxu1  ;;  %v7241_v56 = vpop.f32.mrb[32].mxu0  ;;  %7909 = vmatprep.subr.msk.bf16.mxu1 %vm200_vm3, %v1505_v48  ;;  %7913 = vmatprep.subr.msk.bf16.mxu0 %vm200_vm3, %v1509_v59 }
 0x3d1   :  { %v1071_v27 = vpop.f32.mrb[25].mxu1  ;;  %v1148_v30 = vpop.f32.mrb[33].mxu0 }
 0x3d2   :  { %v7230_v47 = vpop.f32.mrb[26].mxu1  ;;  %v7242_v49 = vpop.f32.mrb[34].mxu0 }
 0x3d3   :  { %v8966_v6 = vpack.c.bf16 %v7230_v47, %v7229_v38  ;;  %v8968_v36 = vpack.c.bf16 %v7242_v49, %v7241_v56  ;;  %v1074_v39 = vpop.f32.mrb[27].mxu1  ;;  %v1151_v10 = vpop.f32.mrb[35].mxu0 }
 0x3d4   :  { %v1511_v25 = vpack.c.bf16 %v1074_v39, %v1071_v27  ;;  %v1515_v9 = vpack.c.bf16 %v1151_v10, %v1148_v30  ;;  %v1557_v10 = vsel %vm200_vm3, %v1506_v28, 0 }
 0x3d7   :  { %7300 = vmatpush3.bf16.xpose.msra.mxu1 %v1554_v54  ;;  %7316 = vmatpush3.bf16.xpose.msra.mxu0 %v1643_v3  ;;  %v1646_v54 = vsel %vm200_vm3, %v1510_v53, 0 }
 0x3d8   :  { %v7233_v2 = vpop.f32.mrb[28].mxu1  ;;  %v7245_v31 = vpop.f32.mrb[36].mxu0  ;;  %7910 = vmatprep.subr.msk.bf16.mxu1 %vm200_vm3, %v1506_v28  ;;  %7914 = vmatprep.subr.msk.bf16.mxu0 %vm200_vm3, %v1510_v53 }
 0x3d9   :  { %v1087_v38 = vpop.f32.mrb[29].mxu1  ;;  %v1164_v47 = vpop.f32.mrb[37].mxu0 }
 0x3da   :  { %v7234_v56 = vpop.f32.mrb[30].mxu1  ;;  %v7246_v49 = vpop.f32.mrb[38].mxu0 }
 0x3db   :  { %v8974_v37 = vpack.c.bf16 %v7234_v56, %v7233_v2  ;;  %v8976_v27 = vpack.c.bf16 %v7246_v49, %v7245_v31  ;;  %v1090_v30 = vpop.f32.mrb[31].mxu1  ;;  %v1167_v48 = vpop.f32.mrb[39].mxu0 }
 0x3dc   :  { %v8978_v39 = vpack.c.bf16 %v1090_v30, %v1087_v38  ;;  %v8980_v59 = vpack.c.bf16 %v1167_v48, %v1164_v47 }
 0x3df   :  { %7302 = vmatpush3.bf16.xpose.msra.mxu1 %v1557_v10  ;;  %7318 = vmatpush3.bf16.xpose.msra.mxu0 %v1646_v54  ;;  %v11018_v10 = vpack.c.bf16 %v8874_v4, %v8870_v62  ;;  %v11019_v54 = vpack.c.bf16 %v8876_v5, %v8872_v63 }
 0x3e0   :  { %v7253_v3 = vpop.f32.mrb[32].mxu1  ;;  %v7265_v43 = vpop.f32.mrb[40].mxu0  ;;  %7915 = vmatprep.subr.msk.bf16.mxu1 %vm200_vm3, %v1511_v25  ;;  %7919 = vmatprep.subr.msk.bf16.mxu0 %vm200_vm3, %v1515_v9 }
 0x3e1   :  { %v1225_v2 = vpop.f32.mrb[33].mxu1  ;;  %v1302_v31 = vpop.f32.mrb[41].mxu0 }
 0x3e2   :  { %v7254_v56 = vpop.f32.mrb[34].mxu1  ;;  %v7266_v49 = vpop.f32.mrb[42].mxu0 }
 0x3e3   :  { %v8986_v38 = vpack.c.bf16 %v7254_v56, %v7253_v3  ;;  %v8988_v47 = vpack.c.bf16 %v7266_v49, %v7265_v43  ;;  %v1228_v30 = vpop.f32.mrb[35].mxu1  ;;  %v1305_v28 = vpop.f32.mrb[43].mxu0  ;;  %v1726_v3 = vsel %vm200_vm3, %v1511_v25, 0  ;;  %v1815_v43 = vsel %vm200_vm3, %v1515_v9, 0 }
 0x3e4   :  { %v8990_v48 = vpack.c.bf16 %v1228_v30, %v1225_v2  ;;  %v8992_v53 = vpack.c.bf16 %v1305_v28, %v1302_v31  ;;  %v11020_v2 = vpack.c.bf16 %v8900_v33, %v8888_v17  ;;  %v11021_v31 = vpack.c.bf16 %v8902_v34, %v8890_v18 }
 0x3e5   :  { %v11022_v30 = vpack.c.bf16 %v8892_v19, %v8884_v14  ;;  %v11023_v28 = vpack.c.bf16 %v8894_v21, %v8886_v16  ;;  %v11025_v14 = vpack.c.bf16 %v8926_v51, %v8914_v42 }
 0x3e6   :  { %7304 = vmatmul.mubr.msk.bf16.vlgmr.msra.gmra.mrb[48].mxu1 %vm200_vm3, %v11018_v10  ;;  %7320 = vmatmul.mubr.msk.bf16.vlgmr.msra.gmra.mrb[56].mxu0 %vm200_vm3, %v11019_v54  ;;  %v1729_v10 = vsel %vm200_vm3, %v8966_v6, 0  ;;  %v1818_v54 = vsel %vm200_vm3, %v8968_v36, 0 }
 0x3e7   :  { %7307 = vmatprep.mubr.msk.bf16.mxu1 %vm200_vm3, %v11020_v2  ;;  %7323 = vmatprep.mubr.msk.bf16.mxu0 %vm200_vm3, %v11021_v31 }
 0x3e8   :  { %7328 = vmatpush3.bf16.xpose.msra.mxu1 %v1726_v3  ;;  %7344 = vmatpush3.bf16.xpose.msra.mxu0 %v1815_v43  ;;  %v7257_v62 = vpop.f32.mrb[36].mxu1  ;;  %v7269_v63 = vpop.f32.mrb[44].mxu0  ;;  %v11024_v3 = vpack.c.bf16 %v8924_v50, %v8912_v8 }
 0x3e9   :  { %7916 = vmatprep.subr.msk.bf16.mxu1 %vm200_vm3, %v8966_v6  ;;  %7920 = vmatprep.subr.msk.bf16.mxu0 %vm200_vm3, %v8968_v36  ;;  %v1241_v4 = vpop.f32.mrb[37].mxu1  ;;  %v1318_v5 = vpop.f32.mrb[45].mxu0 }
 0x3ea   :  { %v7258_v17 = vpop.f32.mrb[38].mxu1  ;;  %v7270_v33 = vpop.f32.mrb[46].mxu0 }
 0x3eb   :  { %v9016_v25 = vpack.c.bf16 %v7258_v17, %v7257_v62  ;;  %v9018_v9 = vpack.c.bf16 %v7270_v33, %v7269_v63  ;;  %v1244_v18 = vpop.f32.mrb[39].mxu1  ;;  %v1321_v34 = vpop.f32.mrb[47].mxu0  ;;  %v1732_v62 = vsel %vm200_vm3, %v8978_v39, 0  ;;  %v1821_v63 = vsel %vm200_vm3, %v8980_v59, 0 }
 0x3ec   :  { %v1521_v56 = vpack.c.bf16 %v1244_v18, %v1241_v4  ;;  %v1525_v49 = vpack.c.bf16 %v1321_v34, %v1318_v5 }
 0x3ee   :  { %7308 = vmatmul.mubr.msk.bf16.gmra.mrb[52].mxu1 %vm200_vm3, %v11022_v30  ;;  %7324 = vmatmul.mubr.msk.bf16.gmra.mrb[60].mxu0 %vm200_vm3, %v11023_v28 }
 0x3ef   :  { %7335 = vmatprep.mubr.msk.bf16.mxu1 %vm200_vm3, %v11024_v3  ;;  %7351 = vmatprep.mubr.msk.bf16.mxu0 %vm200_vm3, %v11025_v14  ;;  %v1735_v3 = vsel %vm200_vm3, %v8974_v37, 0  ;;  %v1824_v14 = vsel %vm200_vm3, %v8976_v27, 0 }
 0x3f0   :  { %7330 = vmatpush3.bf16.xpose.msra.mxu1 %v1729_v10  ;;  %7346 = vmatpush3.bf16.xpose.msra.mxu0 %v1818_v54  ;;  %v7277_v16 = vpop.f32.mrb[40].mxu1  ;;  %v7289_v19 = vpop.f32.mrb[48].mxu0 }
 0x3f1   :  { %7917 = vmatprep.subr.msk.bf16.mxu1 %vm200_vm3, %v8978_v39  ;;  %7921 = vmatprep.subr.msk.bf16.mxu0 %vm200_vm3, %v8980_v59  ;;  %v1379_v21 = vpop.f32.mrb[41].mxu1  ;;  %v1456_v6 = vpop.f32.mrb[49].mxu0 }
 0x3f2   :  { %v7278_v8 = vpop.f32.mrb[42].mxu1  ;;  %v7290_v50 = vpop.f32.mrb[50].mxu0 }
 0x3f3   :  { %v9044_v36 = vpack.c.bf16 %v7278_v8, %v7277_v16  ;;  %v9046_v43 = vpack.c.bf16 %v7290_v50, %v7289_v19  ;;  %v1382_v42 = vpop.f32.mrb[43].mxu1  ;;  %v1459_v51 = vpop.f32.mrb[51].mxu0  ;;  %v11026_v16 = vpack.c.bf16 %v8916_v44, %v8908_v41  ;;  %v11027_v19 = vpack.c.bf16 %v8918_v46, %v8910_v7  ;;  %v330_v44 = vld [vmem:[%s10979_s4] sm:$0xff] }
 0x3f4   :  { %v9048_v2 = vpack.c.bf16 %v1382_v42, %v1379_v21  ;;  %v9050_v31 = vpack.c.bf16 %v1459_v51, %v1456_v6  ;;  %v11030_v41 = vpack.c.bf16 %v8940_v0, %v8932_v55  ;;  %v11031_v7 = vpack.c.bf16 %v8942_v1, %v8934_v58  ;;  %v332_v58 = vld [vmem:[%s10979_s4 + $0x10] sm:$0xff]  ;;  %v331_v0 = vld [vmem:[%s10979_s4 + $0x8] sm:$0xff]  ;;  %v334_v21 = vld [vmem:[%s10979_s4 + $0x20] sm:$0xff] }
 0x3f5   :  { %v336_v42 = vld [vmem:[%s10979_s4 + $0x30] sm:$0xff] }
 0x3f8   :  { %7332 = vmatpush3.bf16.xpose.msra.mxu1 %v1732_v62  ;;  %7348 = vmatpush3.bf16.xpose.msra.mxu0 %v1821_v63  ;;  %v7281_v4 = vpop.f32.mrb[44].mxu1  ;;  %v7293_v5 = vpop.f32.mrb[52].mxu0  ;;  %v335_v63 = vld [vmem:[%s10979_s4 + $0x28] sm:$0xff] }
 0x3f9   :  { %7918 = vmatprep.subr.msk.bf16.mxu1 %vm200_vm3, %v8974_v37  ;;  %7922 = vmatprep.subr.msk.bf16.mxu0 %vm200_vm3, %v8976_v27  ;;  %v1395_v17 = vpop.f32.mrb[45].mxu1  ;;  %v1472_v33 = vpop.f32.mrb[53].mxu0  ;;  %v11028_v37 = vpack.c.bf16 %v8948_v11, %v8936_v60  ;;  %v11029_v27 = vpack.c.bf16 %v8950_v12, %v8938_v61 }
 0x3fa   :  { %v7282_v18 = vpop.f32.mrb[46].mxu1  ;;  %v7294_v34 = vpop.f32.mrb[54].mxu0 }
 0x3fb   :  { %v9060_v30 = vpack.c.bf16 %v7282_v18, %v7281_v4  ;;  %v9062_v39 = vpack.c.bf16 %v7294_v34, %v7293_v5  ;;  %v1398_v28 = vpop.f32.mrb[47].mxu1  ;;  %v1475_v59 = vpop.f32.mrb[55].mxu0  ;;  %v337_v18 = vld [vmem:[%s10979_s4 + $0x38] sm:$0xff] }
 0x3fc   :  { %v9064_v10 = vpack.c.bf16 %v1398_v28, %v1395_v17  ;;  %v9066_v54 = vpack.c.bf16 %v1475_v59, %v1472_v33 }
 0x400   :  { %7334 = vmatpush3.bf16.xpose.msra.mxu1 %v1735_v3  ;;  %7350 = vmatpush3.bf16.xpose.msra.mxu0 %v1824_v14 }
 0x401   :  { %7359 = vmatprep.subr.bf16.mxu1 %v8990_v48  ;;  %7375 = vmatprep.subr.bf16.mxu0 %v8992_v53 }
 0x407   :  { %7336 = vmatmul.mubr.msk.bf16.vlgmr.msra.gmra.mrb[56].mxu1 %vm200_vm3, %v11026_v16  ;;  %7352 = vmatmul.mubr.msk.bf16.vlgmr.msra.gmra.mrb[64].mxu0 %vm200_vm3, %v11027_v19  ;;  %v338_v16 = vld [vmem:[%s10979_s4 + $0x40] sm:$0xff] }
 0x408   :  { %7339 = vmatprep.mubr.msk.bf16.mxu1 %vm200_vm3, %v11028_v37  ;;  %7355 = vmatprep.mubr.msk.bf16.mxu0 %vm200_vm3, %v11029_v27  ;;  %v339_v27 = vld [vmem:[%s10979_s4 + $0x48] sm:$0xff] }
 0x409   :  { %7360 = vmatpush3.bf16.msra.mxu1 %v8990_v48  ;;  %7376 = vmatpush3.bf16.msra.mxu0 %v8992_v53 }
 0x40a   :  { %7361 = vmatprep.subr.bf16.mxu1 %v8986_v38  ;;  %7377 = vmatprep.subr.bf16.mxu0 %v8988_v47 }
 0x40d   :  { %7362 = vmatpush3.bf16.msra.mxu1 %v8986_v38  ;;  %7378 = vmatpush3.bf16.msra.mxu0 %v8988_v47  ;;  %v333_v38 = vld [vmem:[%s10979_s4 + $0x18] sm:$0xff] }
 0x40e   :  { %7363 = vmatprep.subr.bf16.mxu1 %v1521_v56  ;;  %7379 = vmatprep.subr.bf16.mxu0 %v1525_v49 }
 0x40f   :  { %7340 = vmatmul.mubr.msk.bf16.gmra.mrb[60].mxu1 %vm200_vm3, %v11030_v41  ;;  %7356 = vmatmul.mubr.msk.bf16.gmra.mrb[68].mxu0 %vm200_vm3, %v11031_v7 }
 0x411   :  { %7364 = vmatpush3.bf16.msra.mxu1 %v1521_v56  ;;  %7380 = vmatpush3.bf16.msra.mxu0 %v1525_v49 }
 0x412   :  { %7365 = vmatprep.subr.bf16.mxu1 %v9016_v25  ;;  %7381 = vmatprep.subr.bf16.mxu0 %v9018_v9 }
 0x415   :  { %7366 = vmatpush3.bf16.msra.mxu1 %v9016_v25  ;;  %7382 = vmatpush3.bf16.msra.mxu0 %v9018_v9 }
 0x416   :  { %7391 = vmatprep.subr.bf16.mxu1 %v9048_v2  ;;  %7407 = vmatprep.subr.bf16.mxu0 %v9050_v31 }
 0x4b9   :  { %v7305_v46 = vpop.f32.mrb[48].mxu1  ;;  %v7321_v55 = vpop.f32.mrb[56].mxu0 }
 0x4ba   :  { %v1593_v60 = vpop.f32.mrb[49].mxu1  ;;  %v1682_v61 = vpop.f32.mrb[57].mxu0  ;;  %v9124_v53 = vadd.f32 %v7305_v46, %v332_v58 }
 0x4bb   :  { %v9119_v1 = vadd.f32 %v1593_v60, %v330_v44  ;;  %v7306_v11 = vpop.f32.mrb[50].mxu1  ;;  %v7322_v12 = vpop.f32.mrb[58].mxu0  ;;  %v9168_v41 = vadd.f32 %v1682_v61, %v338_v16  ;;  %v340_v44 = vld [vmem:[%s10979_s4 + $0x50] sm:$0xff]  ;;  %v341_v60 = vld [vmem:[%s10979_s4 + $0x58] sm:$0xff] }
 0x4bc   :  { %v1596_v47 = vpop.f32.mrb[51].mxu1  ;;  %v1685_v48 = vpop.f32.mrb[59].mxu0  ;;  %v9130_v56 = vadd.f32 %v7306_v11, %v333_v38  ;;  %v1897_v50 = vsel %vm49_vm0, %v9124_v53, -inf  ;;  %v9182_v61 = vadd.f32 %v7321_v55, %v340_v44  ;;  %v342_v11 = vld [vmem:[%s10979_s4 + $0x60] sm:$0xff]  ;;  %v9189_v38 = vadd.f32 %v7322_v12, %v341_v60 }
 0x4bd   :  { %v9126_v25 = vadd.f32 %v1596_v47, %v331_v0  ;;  %v1891_v9 = vsel %vm49_vm0, %v9119_v1, -inf  ;;  %v9175_v46 = vadd.f32 %v1685_v48, %v339_v27  ;;  %v1915_v0 = vsel %vm49_vm0, %v9168_v41, -inf  ;;  %v343_v48 = vld [vmem:[%s10979_s4 + $0x68] sm:$0xff] }
 0x4be   :  { %1892 = vmax.xlane.f32.xlu0 %v1891_v9  ;;  %v1900_v33 = vsel %vm49_vm0, %v9130_v56, -inf  ;;  %v1921_v9 = vsel %vm49_vm0, %v9182_v61, -inf }
 0x4bf   :  { %v1894_v49 = vsel %vm49_vm0, %v9126_v25, -inf  ;;  %v1918_v47 = vsel %vm49_vm0, %v9175_v46, -inf }
 0x4c0   :  { %1895 = vmax.xlane.f32.xlu1 %v1894_v49  ;;  %v344_v49 = vld [vmem:[%s10979_s4 + $0x70] sm:$0xff] }
 0x4c1   :  { %v7309_v6 = vpop.f32.mrb[52].mxu1  ;;  %v7325_v8 = vpop.f32.mrb[60].mxu0 }
 0x4c2   :  { %v1609_v51 = vpop.f32.mrb[53].mxu1  ;;  %v1698_v62 = vpop.f32.mrb[61].mxu0  ;;  %1898 = vmax.xlane.f32.xlu0 %v1897_v50  ;;  %v9152_v59 = vadd.f32 %v7309_v6, %v336_v42  ;;  %v345_v6 = vld [vmem:[%s10979_s4 + $0x78] sm:$0xff]  ;;  %v9210_v50 = vadd.f32 %v7325_v8, %v344_v49 }
 0x4c3   :  { %v9145_v4 = vadd.f32 %v1609_v51, %v334_v21  ;;  %v7310_v5 = vpop.f32.mrb[54].mxu1  ;;  %v7326_v17 = vpop.f32.mrb[62].mxu0  ;;  %v9196_v55 = vadd.f32 %v1698_v62, %v342_v11  ;;  %v1924_v21 = vsel %vm49_vm0, %v9189_v38, -inf }
 0x4c4   :  { %v1612_v34 = vpop.f32.mrb[55].mxu1  ;;  %v1701_v28 = vpop.f32.mrb[63].mxu0  ;;  %1901 = vmax.xlane.f32.xlu1 %v1900_v33  ;;  %v9161_v19 = vadd.f32 %v7310_v5, %v337_v18  ;;  %v1909_v7 = vsel %vm49_vm0, %v9152_v59, -inf  ;;  %v9214_v51 = vadd.f32 %v7326_v17, %v345_v6  ;;  %v1933_v5 = vsel %vm49_vm0, %v9210_v50, -inf  ;;  %v348_v18 = vld [vmem:[%s10979_s4 + $0x90] sm:$0xff] }
 0x4c5   :  { %v9154_v3 = vadd.f32 %v1612_v34, %v335_v63  ;;  %v1903_v14 = vsel %vm49_vm0, %v9145_v4, -inf  ;;  %v9203_v12 = vadd.f32 %v1701_v28, %v343_v48  ;;  %v1927_v42 = vsel %vm49_vm0, %v9196_v55, -inf  ;;  %v346_v63 = vld [vmem:[%s10979_s4 + $0x80] sm:$0xff]  ;;  %v347_v28 = vld [vmem:[%s10979_s4 + $0x88] sm:$0xff] }
 0x4c6   :  { %1904 = vmax.xlane.f32.xlu0 %v1903_v14  ;;  %v1912_v58 = vsel %vm49_vm0, %v9161_v19, -inf  ;;  %v1936_v14 = vsel %vm49_vm0, %v9214_v51, -inf }
 0x4c7   :  { %v1906_v37 = vsel %vm49_vm0, %v9154_v3, -inf  ;;  %v1930_v62 = vsel %vm49_vm0, %v9203_v12, -inf }
 0x4c8   :  { %1907 = vmax.xlane.f32.xlu1 %v1906_v37 }
 0x4ca   :  { %1910 = vmax.xlane.f32.xlu0 %v1909_v7  ;;  %v349_v7 = vld [vmem:[%s10979_s4 + $0x98] sm:$0xff] }
 0x4cc   :  { %1913 = vmax.xlane.f32.xlu1 %v1912_v58 }
 0x4ce   :  { %1916 = vmax.xlane.f32.xlu0 %v1915_v0 }
 0x4d0   :  { %1919 = vmax.xlane.f32.xlu1 %v1918_v47 }
 0x4d2   :  { %1922 = vmax.xlane.f32.xlu0 %v1921_v9  ;;  %v350_v9 = vld [vmem:[%s10979_s4 + $0xa0] sm:$0xff] }
 0x4d4   :  { %1925 = vmax.xlane.f32.xlu1 %v1924_v21 }
 0x4d6   :  { %1928 = vmax.xlane.f32.xlu0 %v1927_v42  ;;  %v352_v42 = vld [vmem:[%s10979_s4 + $0xb0] sm:$0xff] }
 0x4d8   :  { %1931 = vmax.xlane.f32.xlu1 %v1930_v62 }
 0x4da   :  { %v7337_v33 = vpop.f32.mrb[56].mxu1  ;;  %v7353_v8 = vpop.f32.mrb[64].mxu0  ;;  %1934 = vmax.xlane.f32.xlu0 %v1933_v5  ;;  %v351_v5 = vld [vmem:[%s10979_s4 + $0xa8] sm:$0xff] }
 0x4db   :  { %v1771_v17 = vpop.f32.mrb[57].mxu1  ;;  %v1860_v34 = vpop.f32.mrb[65].mxu0  ;;  %v9236_v60 = vadd.f32 %v7337_v33, %v348_v18 }
 0x4dc   :  { %v9231_v16 = vadd.f32 %v1771_v17, %v346_v63  ;;  %v7338_v37 = vpop.f32.mrb[58].mxu1  ;;  %v7354_v27 = vpop.f32.mrb[66].mxu0  ;;  %1937 = vmax.xlane.f32.xlu1 %v1936_v14  ;;  %v353_v14 = vld [vmem:[%s10979_s4 + $0xb8] sm:$0xff] }
 0x4dd   :  { %v1774_v44 = vpop.f32.mrb[59].mxu1  ;;  %v1863_v58 = vpop.f32.mrb[67].mxu0  ;;  %v9242_v47 = vadd.f32 %v7338_v37, %v349_v7  ;;  %v1945_v6 = vsel %vm49_vm0, %v9236_v60, -inf }
 0x4de   :  { %v9238_v0 = vadd.f32 %v1774_v44, %v347_v28  ;;  %v1939_v11 = vsel %vm49_vm0, %v9231_v16, -inf }
 0x4df   :  { %1940 = vmax.xlane.f32.xlu0 %v1939_v11  ;;  %v1948_v28 = vsel %vm49_vm0, %v9242_v47, -inf }
 0x4e0   :  { %v1942_v48 = vsel %vm49_vm0, %v9238_v0, -inf }
 0x4e1   :  { %1943 = vmax.xlane.f32.xlu1 %v1942_v48 }
 0x4e2   :  { %v7341_v49 = vpop.f32.mrb[60].mxu1  ;;  %v7357_v21 = vpop.f32.mrb[68].mxu0 }
 0x4e3   :  { %v1787_v62 = vpop.f32.mrb[61].mxu1  ;;  %v1876_v63 = vpop.f32.mrb[69].mxu0  ;;  %1946 = vmax.xlane.f32.xlu0 %v1945_v6  ;;  %v9264_v44 = vadd.f32 %v7341_v49, %v352_v42  ;;  %v355_v49 = vld [vmem:[%s10979_s4 + $0xc8] sm:$0xff] }
 0x4e4   :  { %v9257_v33 = vadd.f32 %v1787_v62, %v350_v9  ;;  %v7342_v18 = vpop.f32.mrb[62].mxu1  ;;  %v7358_v17 = vpop.f32.mrb[70].mxu0  ;;  %v354_v9 = vld [vmem:[%s10979_s4 + $0xc0] sm:$0xff] }
 0x4e5   :  { %v1790_v37 = vpop.f32.mrb[63].mxu1  ;;  %v1879_v7 = vpop.f32.mrb[71].mxu0  ;;  %1949 = vmax.xlane.f32.xlu1 %v1948_v28  ;;  %v9273_v6 = vadd.f32 %v7342_v18, %v353_v14  ;;  %v9280_v42 = vadd.f32 %v1860_v34, %v354_v9  ;;  %v356_v28 = vld [vmem:[%s10979_s4 + $0xd0] sm:$0xff]  ;;  %v9287_v18 = vadd.f32 %v1863_v58, %v355_v49  ;;  %v358_v9 = vld [vmem:[%s10979_s4 + $0xe0] sm:$0xff]  ;;  %v359_v49 = vld [vmem:[%s10979_s4 + $0xe8] sm:$0xff] }
 0x4e6   :  { %v9266_v11 = vadd.f32 %v1790_v37, %v351_v5  ;;  %v1951_v48 = vsel %vm49_vm0, %v9257_v33, -inf  ;;  %v1957_v5 = vsel %vm49_vm0, %v9264_v44, -inf  ;;  %v357_v37 = vld [vmem:[%s10979_s4 + $0xd8] sm:$0xff]  ;;  %v9294_v34 = vadd.f32 %v7353_v8, %v356_v28  ;;  %v360_v28 = vld [vmem:[%s10979_s4 + $0xf0] sm:$0xff] }
 0x4e7   :  { %1952 = vmax.xlane.f32.xlu0 %v1951_v48  ;;  %v1960_v14 = vsel %vm49_vm0, %v9273_v6, -inf  ;;  %v1963_v48 = vsel %vm49_vm0, %v9280_v42, -inf  ;;  %v9301_v58 = vadd.f32 %v7354_v27, %v357_v37  ;;  %v9308_v8 = vadd.f32 %v1876_v63, %v358_v9  ;;  %v361_v37 = vld [vmem:[%s10979_s4 + $0xf8] sm:$0xff] }
 0x4e8   :  { %v1954_v62 = vsel %vm49_vm0, %v9266_v11, -inf  ;;  %v9315_v27 = vadd.f32 %v1879_v7, %v359_v49  ;;  %v9322_v63 = vadd.f32 %v7357_v21, %v360_v28  ;;  %v9326_v9 = vadd.f32 %v7358_v17, %v361_v37 }
 0x4e9   :  { %1955 = vmax.xlane.f32.xlu1 %v1954_v62  ;;  %v1966_v62 = vsel %vm49_vm0, %v9287_v18, -inf }
 0x4ea   :  { %v1978_v7 = vsel %vm49_vm0, %v9315_v27, -inf  ;;  %v1984_v49 = vsel %vm49_vm0, %v9326_v9, -inf }
 0x4eb   :  { %1958 = vmax.xlane.f32.xlu0 %v1957_v5  ;;  %v1969_v5 = vsel %vm49_vm0, %v9294_v34, -inf }
 0x4ed   :  { %1961 = vmax.xlane.f32.xlu1 %v1960_v14  ;;  %v1972_v14 = vsel %vm49_vm0, %v9301_v58, -inf }
 0x4ef   :  { %1964 = vmax.xlane.f32.xlu0 %v1963_v48  ;;  %v1975_v48 = vsel %vm49_vm0, %v9308_v8, -inf }
 0x4f1   :  { %1967 = vmax.xlane.f32.xlu1 %v1966_v62  ;;  %v1981_v62 = vsel %vm49_vm0, %v9322_v63, -inf }
 0x4f3   :  { %1970 = vmax.xlane.f32.xlu0 %v1969_v5 }
 0x4f5   :  { %1973 = vmax.xlane.f32.xlu1 %v1972_v14 }
 0x4f7   :  { %1976 = vmax.xlane.f32.xlu0 %v1975_v48 }
 0x4f9   :  { %1979 = vmax.xlane.f32.xlu1 %v1978_v7 }
 0x4fb   :  { %1982 = vmax.xlane.f32.xlu0 %v1981_v62 }
 0x4fd   :  { %1985 = vmax.xlane.f32.xlu1 %v1984_v49 }
 0x54b   :  { %v1893_v21 = vpop.xlane.xlu0 %1892 }
 0x54c   :  { %v1987_v5 = vsub.f32 %v9119_v1, %v1893_v21 }
 0x54d   :  { %v1896_v28 = vpop.xlane.xlu1 %1895 }
 0x54e   :  { %v2019_v14 = vmul.f32 1.442695, %v1987_v5  ;;  %v1988_v17 = vsub.f32 %v9126_v25, %v1896_v28 }
 0x54f   :  { %v1899_v37 = vpop.xlane.xlu0 %1898 }
 0x550   :  { %8042 = vpow2.f32 %v2019_v14  ;;  %v2021_v48 = vmul.f32 1.442695, %v1988_v17  ;;  %v1989_v7 = vsub.f32 %v9124_v53, %v1899_v37 }
 0x551   :  { %v1902_v24 = vpop.xlane.xlu1 %1901 }
 0x552   :  { %8044 = vpow2.f32 %v2021_v48  ;;  %v2023_v26 = vmul.f32 1.442695, %v1989_v7  ;;  %v1990_v62 = vsub.f32 %v9130_v56, %v1902_v24 }
 0x553   :  { %v1905_v32 = vpop.xlane.xlu0 %1904 }
 0x554   :  { %8046 = vpow2.f32 %v2023_v26  ;;  %v2025_v49 = vmul.f32 1.442695, %v1990_v62  ;;  %v1991_v35 = vsub.f32 %v9145_v4, %v1905_v32 }
 0x555   :  { %v1908_v1 = vpop.xlane.xlu1 %1907 }
 0x556   :  { %8048 = vpow2.f32 %v2025_v49  ;;  %v2027_v21 = vmul.f32 1.442695, %v1991_v35  ;;  %v1992_v25 = vsub.f32 %v9154_v3, %v1908_v1 }
 0x557   :  { %v1911_v5 = vpop.xlane.xlu0 %1910 }
 0x558   :  { %8050 = vpow2.f32 %v2027_v21  ;;  %v2029_v28 = vmul.f32 1.442695, %v1992_v25  ;;  %v1993_v53 = vsub.f32 %v9152_v59, %v1911_v5 }
 0x559   :  { %v1914_v14 = vpop.xlane.xlu1 %1913 }
 0x55a   :  { %v9341_v17 = vpop.eup %8042  ;;  %8052 = vpow2.f32 %v2029_v28  ;;  %v2031_v24 = vmul.f32 1.442695, %v1993_v53  ;;  %v1994_v26 = vsub.f32 %v9161_v19, %v1914_v14 }
 0x55b   :  { %v1917_v56 = vpop.xlane.xlu0 %1916  ;;  %v2083_v32 = vsel %vm49_vm0, %v9341_v17, 0.0 }
 0x55c   :  { %v9346_v4 = vpop.eup %8044  ;;  %8054 = vpow2.f32 %v2031_v24  ;;  %v2033_v35 = vmul.f32 1.442695, %v1994_v26  ;;  %v1995_v3 = vsub.f32 %v9168_v41, %v1917_v56  ;;  %2084 = vadd.xlane.f32.xlu0 %v2083_v32 }
 0x55d   :  { %v1920_v37 = vpop.xlane.xlu1 %1919  ;;  %v2086_v59 = vsel %vm49_vm0, %v9346_v4, 0.0 }
 0x55e   :  { %v9351_v48 = vpop.eup %8046  ;;  %8056 = vpow2.f32 %v2033_v35  ;;  %v2035_v7 = vmul.f32 1.442695, %v1995_v3  ;;  %v1996_v19 = vsub.f32 %v9175_v46, %v1920_v37  ;;  %2087 = vadd.xlane.f32.xlu1 %v2086_v59 }
 0x55f   :  { %v1923_v62 = vpop.xlane.xlu0 %1922  ;;  %v2089_v49 = vsel %vm49_vm0, %v9351_v48, 0.0 }
 0x560   :  { %v9356_v1 = vpop.eup %8048  ;;  %8058 = vpow2.f32 %v2035_v7  ;;  %v2037_v41 = vmul.f32 1.442695, %v1996_v19  ;;  %v1997_v21 = vsub.f32 %v9182_v61, %v1923_v62  ;;  %2090 = vadd.xlane.f32.xlu0 %v2089_v49 }
 0x561   :  { %v1926_v25 = vpop.xlane.xlu1 %1925  ;;  %v2092_v5 = vsel %vm49_vm0, %v9356_v1, 0.0 }
 0x562   :  { %v9361_v28 = vpop.eup %8050  ;;  %8060 = vpow2.f32 %v2037_v41  ;;  %v2039_v46 = vmul.f32 1.442695, %v1997_v21  ;;  %v1998_v53 = vsub.f32 %v9189_v38, %v1926_v25  ;;  %2093 = vadd.xlane.f32.xlu1 %v2092_v5 }
 0x563   :  { %v1929_v14 = vpop.xlane.xlu0 %1928  ;;  %v2095_v24 = vsel %vm49_vm0, %v9361_v28, 0.0 }
 0x564   :  { %v9366_v26 = vpop.eup %8052  ;;  %8062 = vpow2.f32 %v2039_v46  ;;  %v2041_v61 = vmul.f32 1.442695, %v1998_v53  ;;  %v1999_v56 = vsub.f32 %v9196_v55, %v1929_v14  ;;  %2096 = vadd.xlane.f32.xlu0 %v2095_v24 }
 0x565   :  { %v1932_v32 = vpop.xlane.xlu1 %1931  ;;  %v2098_v35 = vsel %vm49_vm0, %v9366_v26, 0.0 }
 0x566   :  { %v9371_v3 = vpop.eup %8054  ;;  %8064 = vpow2.f32 %v2041_v61  ;;  %v2043_v38 = vmul.f32 1.442695, %v1999_v56  ;;  %v2000_v37 = vsub.f32 %v9203_v12, %v1932_v32  ;;  %2099 = vadd.xlane.f32.xlu1 %v2098_v35 }
 0x567   :  { %v1935_v59 = vpop.xlane.xlu0 %1934  ;;  %v2101_v7 = vsel %vm49_vm0, %v9371_v3, 0.0 }
 0x568   :  { %v9376_v19 = vpop.eup %8056  ;;  %8066 = vpow2.f32 %v2043_v38  ;;  %v2045_v55 = vmul.f32 1.442695, %v2000_v37  ;;  %v2001_v62 = vsub.f32 %v9210_v50, %v1935_v59  ;;  %2102 = vadd.xlane.f32.xlu0 %v2101_v7 }
 0x569   :  { %v1938_v49 = vpop.xlane.xlu1 %1937  ;;  %v2104_v41 = vsel %vm49_vm0, %v9376_v19, 0.0 }
 0x56a   :  { %v9381_v21 = vpop.eup %8058  ;;  %8068 = vpow2.f32 %v2045_v55  ;;  %v2047_v12 = vmul.f32 1.442695, %v2001_v62  ;;  %v2002_v25 = vsub.f32 %v9214_v51, %v1938_v49  ;;  %2105 = vadd.xlane.f32.xlu1 %v2104_v41 }
 0x56b   :  { %v2107_v5 = vsel %vm49_vm0, %v9381_v21, 0.0 }
 0x56c   :  { %v9386_v46 = vpop.eup %8060  ;;  %8070 = vpow2.f32 %v2047_v12  ;;  %v2049_v53 = vmul.f32 1.442695, %v2002_v25  ;;  %v1941_v50 = vpop.xlane.xlu0 %1940  ;;  %2108 = vadd.xlane.f32.xlu0 %v2107_v5 }
 0x56d   :  { %v2003_v14 = vsub.f32 %v9231_v16, %v1941_v50  ;;  %v2110_v24 = vsel %vm49_vm0, %v9386_v46, 0.0 }
 0x56e   :  { %v9391_v61 = vpop.eup %8062  ;;  %8072 = vpow2.f32 %v2049_v53  ;;  %v1944_v56 = vpop.xlane.xlu1 %1943  ;;  %2111 = vadd.xlane.f32.xlu1 %v2110_v24 }
 0x56f   :  { %v2051_v51 = vmul.f32 1.442695, %v2003_v14  ;;  %v2004_v32 = vsub.f32 %v9238_v0, %v1944_v56  ;;  %v2113_v35 = vsel %vm49_vm0, %v9391_v61, 0.0 }
 0x570   :  { %v9396_v38 = vpop.eup %8064  ;;  %v1947_v37 = vpop.xlane.xlu0 %1946  ;;  %2114 = vadd.xlane.f32.xlu0 %v2113_v35 }
 0x571   :  { %8074 = vpow2.f32 %v2051_v51  ;;  %v2053_v16 = vmul.f32 1.442695, %v2004_v32  ;;  %v2005_v59 = vsub.f32 %v9236_v60, %v1947_v37  ;;  %v2116_v7 = vsel %vm49_vm0, %v9396_v38, 0.0 }
 0x572   :  { %v9401_v55 = vpop.eup %8066  ;;  %v1950_v62 = vpop.xlane.xlu1 %1949  ;;  %2117 = vadd.xlane.f32.xlu1 %v2116_v7 }
 0x573   :  { %8076 = vpow2.f32 %v2053_v16  ;;  %v2055_v0 = vmul.f32 1.442695, %v2005_v59  ;;  %v2006_v49 = vsub.f32 %v9242_v47, %v1950_v62  ;;  %v2119_v41 = vsel %vm49_vm0, %v9401_v55, 0.0 }
 0x574   :  { %v9406_v12 = vpop.eup %8068  ;;  %v1953_v25 = vpop.xlane.xlu0 %1952  ;;  %2120 = vadd.xlane.f32.xlu0 %v2119_v41 }
 0x575   :  { %8078 = vpow2.f32 %v2055_v0  ;;  %v2057_v60 = vmul.f32 1.442695, %v2006_v49  ;;  %v2007_v5 = vsub.f32 %v9257_v33, %v1953_v25  ;;  %v2122_v53 = vsel %vm49_vm0, %v9406_v12, 0.0 }
 0x576   :  { %v9411_v50 = vpop.eup %8070  ;;  %v1956_v14 = vpop.xlane.xlu1 %1955  ;;  %2123 = vadd.xlane.f32.xlu1 %v2122_v53 }
 0x577   :  { %8080 = vpow2.f32 %v2057_v60  ;;  %v2059_v47 = vmul.f32 1.442695, %v2007_v5  ;;  %v2008_v24 = vsub.f32 %v9266_v11, %v1956_v14  ;;  %v2125_v56 = vsel %vm49_vm0, %v9411_v50, 0.0 }
 0x578   :  { %v9416_v51 = vpop.eup %8072  ;;  %v1959_v32 = vpop.xlane.xlu0 %1958  ;;  %2126 = vadd.xlane.f32.xlu0 %v2125_v56 }
 0x579   :  { %8082 = vpow2.f32 %v2059_v47  ;;  %v2061_v33 = vmul.f32 1.442695, %v2008_v24  ;;  %v2009_v35 = vsub.f32 %v9264_v44, %v1959_v32  ;;  %v2128_v37 = vsel %vm49_vm0, %v9416_v51, 0.0 }
 0x57a   :  { %v1962_v16 = vpop.xlane.xlu1 %1961  ;;  %2129 = vadd.xlane.f32.xlu1 %v2128_v37 }
 0x57b   :  { %v9421_v59 = vpop.eup %8074  ;;  %8084 = vpow2.f32 %v2061_v33  ;;  %v2063_v11 = vmul.f32 1.442695, %v2009_v35  ;;  %v2010_v7 = vsub.f32 %v9273_v6, %v1962_v16 }
 0x57c   :  { %v1965_v62 = vpop.xlane.xlu0 %1964  ;;  %v2131_v0 = vsel %vm49_vm0, %v9421_v59, 0.0 }
 0x57d   :  { %v9426_v49 = vpop.eup %8076  ;;  %8086 = vpow2.f32 %v2063_v11  ;;  %v2065_v41 = vmul.f32 1.442695, %v2010_v7  ;;  %v2011_v44 = vsub.f32 %v9280_v42, %v1965_v62  ;;  %2132 = vadd.xlane.f32.xlu0 %v2131_v0 }
 0x57e   :  { %v1968_v25 = vpop.xlane.xlu1 %1967  ;;  %v2134_v60 = vsel %vm49_vm0, %v9426_v49, 0.0 }
 0x57f   :  { %v9431_v5 = vpop.eup %8078  ;;  %8088 = vpow2.f32 %v2065_v41  ;;  %v2067_v53 = vmul.f32 1.442695, %v2011_v44  ;;  %v2012_v6 = vsub.f32 %v9287_v18, %v1968_v25  ;;  %2135 = vadd.xlane.f32.xlu1 %v2134_v60 }
 0x580   :  { %v1971_v14 = vpop.xlane.xlu0 %1970  ;;  %v2137_v47 = vsel %vm49_vm0, %v9431_v5, 0.0 }
 0x581   :  { %v9436_v24 = vpop.eup %8080  ;;  %8090 = vpow2.f32 %v2067_v53  ;;  %v2069_v42 = vmul.f32 1.442695, %v2012_v6  ;;  %v2013_v56 = vsub.f32 %v9294_v34, %v1971_v14  ;;  %2138 = vadd.xlane.f32.xlu0 %v2137_v47 }
 0x582   :  { %v1974_v32 = vpop.xlane.xlu1 %1973  ;;  %v2140_v33 = vsel %vm49_vm0, %v9436_v24, 0.0 }
 0x583   :  { %v9441_v35 = vpop.eup %8082  ;;  %8092 = vpow2.f32 %v2069_v42  ;;  %v2071_v18 = vmul.f32 1.442695, %v2013_v56  ;;  %v2014_v37 = vsub.f32 %v9301_v58, %v1974_v32  ;;  %2141 = vadd.xlane.f32.xlu1 %v2140_v33 }
 0x584   :  { %v1977_v16 = vpop.xlane.xlu0 %1976  ;;  %v2143_v11 = vsel %vm49_vm0, %v9441_v35, 0.0 }
 0x585   :  { %v9446_v7 = vpop.eup %8084  ;;  %8094 = vpow2.f32 %v2071_v18  ;;  %v2073_v34 = vmul.f32 1.442695, %v2014_v37  ;;  %v2015_v62 = vsub.f32 %v9308_v8, %v1977_v16  ;;  %2144 = vadd.xlane.f32.xlu0 %v2143_v11 }
 0x586   :  { %v1980_v0 = vpop.xlane.xlu1 %1979  ;;  %v2146_v41 = vsel %vm49_vm0, %v9446_v7, 0.0 }
 0x587   :  { %v9451_v44 = vpop.eup %8086  ;;  %8096 = vpow2.f32 %v2073_v34  ;;  %v2075_v58 = vmul.f32 1.442695, %v2015_v62  ;;  %v2016_v25 = vsub.f32 %v9315_v27, %v1980_v0  ;;  %2147 = vadd.xlane.f32.xlu1 %v2146_v41 }
 0x588   :  { %v1983_v60 = vpop.xlane.xlu0 %1982  ;;  %v2149_v53 = vsel %vm49_vm0, %v9451_v44, 0.0 }
 0x589   :  { %v9456_v6 = vpop.eup %8088  ;;  %8098 = vpow2.f32 %v2075_v58  ;;  %v2077_v8 = vmul.f32 1.442695, %v2016_v25  ;;  %v2017_v14 = vsub.f32 %v9322_v63, %v1983_v60  ;;  %2150 = vadd.xlane.f32.xlu0 %v2149_v53 }
 0x58a   :  { %v1986_v47 = vpop.xlane.xlu1 %1985  ;;  %v2152_v42 = vsel %vm49_vm0, %v9456_v6, 0.0 }
 0x58b   :  { %v9461_v56 = vpop.eup %8090  ;;  %8100 = vpow2.f32 %v2077_v8  ;;  %v2079_v27 = vmul.f32 1.442695, %v2017_v14  ;;  %v2018_v32 = vsub.f32 %v9326_v9, %v1986_v47  ;;  %2153 = vadd.xlane.f32.xlu1 %v2152_v42 }
 0x58c   :  { %v2155_v33 = vsel %vm49_vm0, %v9461_v56, 0.0 }
 0x58d   :  { %v9466_v18 = vpop.eup %8092  ;;  %8102 = vpow2.f32 %v2079_v27  ;;  %v2081_v37 = vmul.f32 1.442695, %v2018_v32  ;;  %2156 = vadd.xlane.f32.xlu0 %v2155_v33 }
 0x58e   :  { %v2158_v63 = vsel %vm49_vm0, %v9466_v18, 0.0 }
 0x58f   :  { %v9470_v16 = vpop.eup %8094  ;;  %8104 = vpow2.f32 %v2081_v37  ;;  %2159 = vadd.xlane.f32.xlu1 %v2158_v63 }
 0x590   :  { %v2161_v11 = vsel %vm49_vm0, %v9470_v16, 0.0 }
 0x591   :  { %v9474_v9 = vpop.eup %8096  ;;  %2162 = vadd.xlane.f32.xlu0 %v2161_v11 }
 0x592   :  { %v2164_v34 = vsel %vm49_vm0, %v9474_v9, 0.0 }
 0x593   :  { %v9478_v62 = vpop.eup %8098  ;;  %2165 = vadd.xlane.f32.xlu1 %v2164_v34 }
 0x594   :  { %v2167_v0 = vsel %vm49_vm0, %v9478_v62, 0.0 }
 0x595   :  { %v9482_v41 = vpop.eup %8100  ;;  %2168 = vadd.xlane.f32.xlu0 %v2167_v0 }
 0x596   :  { %v2170_v58 = vsel %vm49_vm0, %v9482_v41, 0.0 }
 0x597   :  { %v9486_v25 = vpop.eup %8102  ;;  %2171 = vadd.xlane.f32.xlu1 %v2170_v58 }
 0x598   :  { %v2173_v60 = vsel %vm49_vm0, %v9486_v25, 0.0 }
 0x599   :  { %v9490_v53 = vpop.eup %8104  ;;  %2174 = vadd.xlane.f32.xlu0 %v2173_v60 }
 0x59a   :  { %v2176_v8 = vsel %vm49_vm0, %v9490_v53, 0.0 }
 0x59b   :  { %2177 = vadd.xlane.f32.xlu1 %v2176_v8 }
 0x5e9   :  { %v2085_v14 = vpop.xlane.xlu0 %2084 }
 0x5ea   :  { %8106 = vrcp.f32 %v2085_v14 }
 0x5eb   :  { %v2088_v47 = vpop.xlane.xlu1 %2087 }
 0x5ec   :  { %8108 = vrcp.f32 %v2088_v47 }
 0x5ed   :  { %v2091_v42 = vpop.xlane.xlu0 %2090 }
 0x5ee   :  { %8110 = vrcp.f32 %v2091_v42 }
 0x5ef   :  { %v2094_v27 = vpop.xlane.xlu1 %2093 }
 0x5f0   :  { %8112 = vrcp.f32 %v2094_v27 }
 0x5f1   :  { %v2097_v32 = vpop.xlane.xlu0 %2096 }
 0x5f2   :  { %8114 = vrcp.f32 %v2097_v32 }
 0x5f3   :  { %v2100_v33 = vpop.xlane.xlu1 %2099 }
 0x5f4   :  { %v8107_v37 = vpop.eup %8106  ;;  %8116 = vrcp.f32 %v2100_v33 }
 0x5f5   :  { %v2103_v63 = vpop.xlane.xlu0 %2102  ;;  %v2211_v0 = vmul.f32 %v8107_v37, %v9341_v17 }
 0x5f6   :  { %v8109_v11 = vpop.eup %8108  ;;  %8118 = vrcp.f32 %v2103_v63 }
 0x5f7   :  { %v2106_v34 = vpop.xlane.xlu1 %2105  ;;  %v2212_v58 = vmul.f32 %v8109_v11, %v9346_v4 }
 0x5f8   :  { %v8111_v60 = vpop.eup %8110  ;;  %8120 = vrcp.f32 %v2106_v34 }
 0x5f9   :  { %v2109_v8 = vpop.xlane.xlu0 %2108  ;;  %v2243_v14 = vpack.c.bf16 %v2212_v58, %v2211_v0  ;;  %v2213_v42 = vmul.f32 %v8111_v60, %v9351_v48 }
 0x5fa   :  { %v8113_v47 = vpop.eup %8112  ;;  %8122 = vrcp.f32 %v2109_v8 }
 0x5fb   :  { %v2214_v27 = vmul.f32 %v8113_v47, %v9356_v1  ;;  %v2112_v32 = vpop.xlane.xlu1 %2111  ;;  %7367 = vmatprep.mubr.msk.bf16.mxu1 %vm49_vm0, %v2243_v14 }
 0x5fc   :  { %v8115_v33 = vpop.eup %8114  ;;  %8124 = vrcp.f32 %v2112_v32  ;;  %v458_v32 = vld [vmem:[%s10980_s7] sm:$0xf] }
 0x5fd   :  { %v2244_v63 = vpack.c.bf16 %v2214_v27, %v2213_v42  ;;  %v2115_v22 = vpop.xlane.xlu0 %2114  ;;  %v2215_v37 = vmul.f32 %v8115_v33, %v9361_v28 }
 0x5fe   :  { %v8117_v17 = vpop.eup %8116  ;;  %8126 = vrcp.f32 %v2115_v22 }
 0x5ff   :  { %v2118_v4 = vpop.xlane.xlu1 %2117  ;;  %7368 = vmatmul.mubr.msk.bf16.vlgmr.msra.gmra.mrb[64].mxu1 %vm49_vm0, %v2244_v63  ;;  %v2216_v11 = vmul.f32 %v8117_v17, %v9366_v26 }
 0x600   :  { %v8119_v34 = vpop.eup %8118  ;;  %8128 = vrcp.f32 %v2118_v4  ;;  %7392 = vmatpush3.bf16.msra.mxu1 %v9048_v2 }
 0x601   :  { %7393 = vmatprep.subr.bf16.mxu1 %v9044_v36  ;;  %v2121_v48 = vpop.xlane.xlu0 %2120  ;;  %v2245_v1 = vpack.c.bf16 %v2216_v11, %v2215_v37  ;;  %v2217_v22 = vmul.f32 %v8119_v34, %v9371_v3 }
 0x602   :  { %v8121_v0 = vpop.eup %8120  ;;  %8130 = vrcp.f32 %v2121_v48 }
 0x603   :  { %v2124_v58 = vpop.xlane.xlu1 %2123  ;;  %7371 = vmatprep.mubr.msk.bf16.mxu1 %vm49_vm0, %v2245_v1  ;;  %v2218_v60 = vmul.f32 %v8121_v0, %v9376_v19 }
 0x604   :  { %v8123_v28 = vpop.eup %8122  ;;  %8132 = vrcp.f32 %v2124_v58  ;;  %7394 = vmatpush3.bf16.msra.mxu1 %v9044_v36 }
 0x605   :  { %7395 = vmatprep.subr.bf16.mxu1 %v9064_v10  ;;  %v2127_v2 = vpop.xlane.xlu0 %2126  ;;  %v2246_v26 = vpack.c.bf16 %v2218_v60, %v2217_v22  ;;  %v2219_v47 = vmul.f32 %v8123_v28, %v9381_v21 }
 0x606   :  { %v8125_v8 = vpop.eup %8124  ;;  %8134 = vrcp.f32 %v2127_v2 }
 0x607   :  { %v2130_v14 = vpop.xlane.xlu1 %2129  ;;  %7372 = vmatmul.mubr.msk.bf16.gmra.mrb[68].mxu1 %vm49_vm0, %v2246_v26  ;;  %v2220_v42 = vmul.f32 %v8125_v8, %v9386_v46 }
 0x608   :  { %v8127_v3 = vpop.eup %8126  ;;  %8136 = vrcp.f32 %v2130_v14  ;;  %7396 = vmatpush3.bf16.msra.mxu1 %v9064_v10 }
 0x609   :  { %7397 = vmatprep.subr.bf16.mxu1 %v9060_v30  ;;  %v2247_v36 = vpack.c.bf16 %v2220_v42, %v2219_v47  ;;  %v2221_v33 = vmul.f32 %v8127_v3, %v9391_v61  ;;  %v2597_v42 = vsel %vm2595_vm5, %v458_v32, 0 }
 0x60a   :  { %v8129_v19 = vpop.eup %8128  ;;  %v2133_v27 = vpop.xlane.xlu0 %2132 }
 0x60b   :  { %v2222_v21 = vmul.f32 %v8129_v19, %v9396_v38  ;;  %8138 = vrcp.f32 %v2133_v27  ;;  %7383 = vmatprep.mubr.msk.bf16.mxu0 %vm49_vm0, %v2247_v36 }
 0x60c   :  { %v8131_v46 = vpop.eup %8130  ;;  %v2136_v63 = vpop.xlane.xlu1 %2135  ;;  %7398 = vmatpush3.bf16.msra.mxu1 %v9060_v30 }
 0x60d   :  { %v2248_v10 = vpack.c.bf16 %v2222_v21, %v2221_v33  ;;  %8140 = vrcp.f32 %v2136_v63  ;;  %7923 = vmatprep.subr.msk.bf16.mxu1 %vm2595_vm5, %v458_v32  ;;  %v2223_v61 = vmul.f32 %v8131_v46, %v9401_v55 }
 0x60e   :  { %v8133_v17 = vpop.eup %8132  ;;  %v2139_v4 = vpop.xlane.xlu0 %2138 }
 0x60f   :  { %8142 = vrcp.f32 %v2139_v4  ;;  %7384 = vmatmul.mubr.msk.bf16.vlgmr.msra.gmra.mrb[72].mxu0 %vm49_vm0, %v2248_v10  ;;  %v2224_v38 = vmul.f32 %v8133_v17, %v9406_v12 }
 0x610   :  { %v8135_v37 = vpop.eup %8134  ;;  %v2142_v11 = vpop.xlane.xlu1 %2141  ;;  %7408 = vmatpush3.bf16.msra.mxu0 %v9050_v31 }
 0x611   :  { %8144 = vrcp.f32 %v2142_v11  ;;  %7409 = vmatprep.subr.bf16.mxu0 %v9046_v43  ;;  %v2249_v30 = vpack.c.bf16 %v2224_v38, %v2223_v61  ;;  %v2225_v1 = vmul.f32 %v8135_v37, %v9411_v50 }
 0x612   :  { %v8137_v34 = vpop.eup %8136  ;;  %v2145_v48 = vpop.xlane.xlu0 %2144 }
 0x613   :  { %8146 = vrcp.f32 %v2145_v48  ;;  %7387 = vmatprep.mubr.msk.bf16.mxu0 %vm49_vm0, %v2249_v30  ;;  %v2226_v0 = vmul.f32 %v8137_v34, %v9416_v51 }
 0x614   :  { %v2148_v55 = vpop.xlane.xlu1 %2147  ;;  %7410 = vmatpush3.bf16.msra.mxu0 %v9046_v43 }
 0x615   :  { %v8139_v12 = vpop.eup %8138  ;;  %8148 = vrcp.f32 %v2148_v55  ;;  %7411 = vmatprep.subr.bf16.mxu0 %v9066_v54  ;;  %v2250_v31 = vpack.c.bf16 %v2226_v0, %v2225_v1 }
 0x616   :  { %v2151_v58 = vpop.xlane.xlu0 %2150  ;;  %v2227_v50 = vmul.f32 %v8139_v12, %v9421_v59 }
 0x617   :  { %v8141_v22 = vpop.eup %8140  ;;  %8150 = vrcp.f32 %v2151_v58  ;;  %7388 = vmatmul.mubr.msk.bf16.gmra.mrb[76].mxu0 %vm49_vm0, %v2250_v31  ;;  %v459_v31 = vld [vmem:[%s10980_s7 + $0x4] sm:$0xf] }
 0x618   :  { %v2154_v60 = vpop.xlane.xlu1 %2153  ;;  %7412 = vmatpush3.bf16.msra.mxu0 %v9066_v54  ;;  %v2228_v51 = vmul.f32 %v8141_v22, %v9426_v49 }
 0x619   :  { %v8143_v28 = vpop.eup %8142  ;;  %8152 = vrcp.f32 %v2154_v60  ;;  %7413 = vmatprep.subr.bf16.mxu0 %v9062_v39 }
 0x61a   :  { %v2157_v43 = vpop.xlane.xlu0 %2156  ;;  %v2251_v2 = vpack.c.bf16 %v2228_v51, %v2227_v50  ;;  %v2229_v8 = vmul.f32 %v8143_v28, %v9431_v5  ;;  %v2677_v51 = vsel %vm2595_vm5, %v459_v31, 0 }
 0x61b   :  { %v8145_v26 = vpop.eup %8144  ;;  %8154 = vrcp.f32 %v2157_v43 }
 0x61c   :  { %v2230_v14 = vmul.f32 %v8145_v26, %v9436_v24  ;;  %v2160_v47 = vpop.xlane.xlu1 %2159  ;;  %7399 = vmatprep.mubr.msk.bf16.mxu1 %vm49_vm0, %v2251_v2  ;;  %7414 = vmatpush3.bf16.msra.mxu0 %v9062_v39 }
 0x61d   :  { %v8147_v54 = vpop.eup %8146  ;;  %8156 = vrcp.f32 %v2160_v47 }
 0x61e   :  { %v2252_v59 = vpack.c.bf16 %v2230_v14, %v2229_v8  ;;  %v2163_v49 = vpop.xlane.xlu0 %2162  ;;  %v2231_v5 = vmul.f32 %v8147_v54, %v9441_v35 }
 0x61f   :  { %v8149_v3 = vpop.eup %8148  ;;  %8158 = vrcp.f32 %v2163_v49 }
 0x620   :  { %v2166_v36 = vpop.xlane.xlu1 %2165  ;;  %7400 = vmatmul.mubr.msk.bf16.vlgmr.msra.gmra.mrb[72].mxu1 %vm49_vm0, %v2252_v59  ;;  %v2232_v24 = vmul.f32 %v8149_v3, %v9446_v7 }
 0x621   :  { %v8151_v19 = vpop.eup %8150  ;;  %8160 = vrcp.f32 %v2166_v36  ;;  %7424 = vmatpush3.bf16.msra.mxu1 %v2597_v42  ;;  %v461_v36 = vld [vmem:[%s10980_s7 + $0xc] sm:$0xf] }
 0x622   :  { %v2169_v27 = vpop.xlane.xlu0 %2168  ;;  %v2253_v39 = vpack.c.bf16 %v2232_v24, %v2231_v5  ;;  %v2233_v32 = vmul.f32 %v8151_v19, %v9451_v44  ;;  %7924 = vmatprep.subr.msk.bf16.mxu1 %vm2595_vm5, %v459_v31 }
 0x623   :  { %v8153_v33 = vpop.eup %8152  ;;  %8162 = vrcp.f32 %v2169_v27 }
 0x624   :  { %v2172_v21 = vpop.xlane.xlu1 %2171  ;;  %7403 = vmatprep.mubr.msk.bf16.mxu1 %vm49_vm0, %v2253_v39  ;;  %v2234_v46 = vmul.f32 %v8153_v33, %v9456_v6 }
 0x625   :  { %v8155_v63 = vpop.eup %8154  ;;  %8164 = vrcp.f32 %v2172_v21 }
 0x626   :  { %v2175_v10 = vpop.xlane.xlu0 %2174  ;;  %v2254_v35 = vpack.c.bf16 %v2234_v46, %v2233_v32  ;;  %v2235_v4 = vmul.f32 %v8155_v63, %v9461_v56 }
 0x627   :  { %v8157_v17 = vpop.eup %8156  ;;  %8166 = vrcp.f32 %v2175_v10 }
 0x628   :  { %v2178_v7 = vpop.xlane.xlu1 %2177  ;;  %7404 = vmatmul.mubr.msk.bf16.gmra.mrb[76].mxu1 %vm49_vm0, %v2254_v35  ;;  %v2236_v61 = vmul.f32 %v8157_v17, %v9466_v18  ;;  %v2837_v17 = vsel %vm2595_vm5, %v461_v36, 0 }
 0x629   :  { %v8159_v38 = vpop.eup %8158  ;;  %8168 = vrcp.f32 %v2178_v7 }
 0x62a   :  { %v2255_v37 = vpack.c.bf16 %v2236_v61, %v2235_v4  ;;  %v2237_v44 = vmul.f32 %v8159_v38, %v9470_v16 }
 0x62b   :  { %v8161_v11 = vpop.eup %8160 }
 0x62c   :  { %v2238_v6 = vmul.f32 %v8161_v11, %v9474_v9  ;;  %7415 = vmatprep.mubr.msk.bf16.mxu0 %vm49_vm0, %v2255_v37 }
 0x62d   :  { %v8163_v30 = vpop.eup %8162 }
 0x62e   :  { %v2256_v34 = vpack.c.bf16 %v2238_v6, %v2237_v44  ;;  %v2239_v1 = vmul.f32 %v8163_v30, %v9478_v62 }
 0x62f   :  { %v8165_v48 = vpop.eup %8164 }
 0x630   :  { %7416 = vmatmul.mubr.msk.bf16.vlgmr.msra.gmra.mrb[80].mxu0 %vm49_vm0, %v2256_v34  ;;  %v2240_v56 = vmul.f32 %v8165_v48, %v9482_v41 }
 0x631   :  { %v8167_v18 = vpop.eup %8166 }
 0x632   :  { %v2257_v0 = vpack.c.bf16 %v2240_v56, %v2239_v1  ;;  %v2241_v16 = vmul.f32 %v8167_v18, %v9486_v25  ;;  %v460_v25 = vld [vmem:[%s10980_s7 + $0x8] sm:$0xf] }
 0x633   :  { %v8169_v55 = vpop.eup %8168  ;;  %v2757_v3 = vsel %vm2595_vm5, %v460_v25, 0 }
 0x634   :  { %7419 = vmatprep.mubr.msk.bf16.mxu0 %vm49_vm0, %v2257_v0  ;;  %v2242_v9 = vmul.f32 %v8169_v55, %v9490_v53 }
 0x636   :  { %v2258_v12 = vpack.c.bf16 %v2242_v9, %v2241_v16 }
 0x638   :  { %7420 = vmatmul.mubr.msk.bf16.gmra.mrb[84].mxu0 %vm49_vm0, %v2258_v12 }
 0x6d2   :  { %v7369_v62 = vpop.f32.mrb[64].mxu1 }
 0x6d3   :  { %v2305_v41 = vpop.f32.mrb[65].mxu1 }
 0x6d4   :  { %v7370_v58 = vpop.f32.mrb[66].mxu1 }
 0x6d5   :  { %v2568_v22 = vpack.c.bf16 %v7370_v58, %v7369_v62  ;;  %v2308_v60 = vpop.f32.mrb[67].mxu1 }
 0x6d6   :  { %v2567_v50 = vpack.c.bf16 %v2308_v60, %v2305_v41 }
 0x6d8   :  { %7425 = vmatprep.mubr.msk.bf16.mxu1 %vm200_vm3, %v2567_v50 }
 0x6d9   :  { %7426 = vmatmul.mubr.msk.bf16.vlgmr.msra.gmra.mrb[80].mxu1 %vm200_vm3, %v2568_v22 }
 0x6da   :  { %7434 = vmatpush3.bf16.msra.mxu1 %v2677_v51  ;;  %v7373_v53 = vpop.f32.mrb[68].mxu1 }
 0x6db   :  { %v2321_v28 = vpop.f32.mrb[69].mxu1  ;;  %7925 = vmatprep.subr.msk.bf16.mxu1 %vm2595_vm5, %v460_v25 }
 0x6dc   :  { %v7374_v43 = vpop.f32.mrb[70].mxu1 }
 0x6dd   :  { %v2570_v2 = vpack.c.bf16 %v7374_v43, %v7373_v53  ;;  %v2324_v26 = vpop.f32.mrb[71].mxu1 }
 0x6de   :  { %v2569_v8 = vpack.c.bf16 %v2324_v26, %v2321_v28 }
 0x6e0   :  { %7429 = vmatprep.mubr.msk.bf16.mxu1 %vm200_vm3, %v2569_v8 }
 0x6e1   :  { %7430 = vmatmul.mubr.msk.bf16.gmra.mrb[84].mxu1 %vm200_vm3, %v2570_v2 }
 0x6e2   :  { %v7385_v14 = vpop.f32.mrb[72].mxu0 }
 0x6e3   :  { %v2382_v47 = vpop.f32.mrb[73].mxu0 }
 0x6e4   :  { %v7386_v54 = vpop.f32.mrb[74].mxu0 }
 0x6e5   :  { %v2572_v59 = vpack.c.bf16 %v7386_v54, %v7385_v14  ;;  %v2385_v49 = vpop.f32.mrb[75].mxu0 }
 0x6e6   :  { %v2571_v42 = vpack.c.bf16 %v2385_v49, %v2382_v47 }
 0x6e8   :  { %7435 = vmatprep.mubr.msk.bf16.mxu1 %vm200_vm3, %v2571_v42 }
 0x6e9   :  { %7436 = vmatmul.mubr.msk.bf16.vlgmr.msra.gmra.mrb[80].mxu1 %vm200_vm3, %v2572_v59 }
 0x6ea   :  { %7444 = vmatpush3.bf16.msra.mxu1 %v2757_v3  ;;  %v7389_v5 = vpop.f32.mrb[76].mxu0 }
 0x6eb   :  { %v2398_v24 = vpop.f32.mrb[77].mxu0  ;;  %7926 = vmatprep.subr.msk.bf16.mxu1 %vm2595_vm5, %v461_v36 }
 0x6ec   :  { %v7390_v19 = vpop.f32.mrb[78].mxu0 }
 0x6ed   :  { %v2574_v27 = vpack.c.bf16 %v7390_v19, %v7389_v5  ;;  %v2401_v39 = vpop.f32.mrb[79].mxu0  ;;  %v7972_v5 = vld [vmem:[%s10981_s9] sm:$0xff]  }
 0x6ee   :  { %v2573_v33 = vpack.c.bf16 %v2401_v39, %v2398_v24  ;;  %v7973_v24 = vld [vmem:[%s10981_s9 + $0x8] sm:$0xff]   ;;  %7463 = vmatprep.subr.bf16.mxu0 %v7972_v5 }
 0x6ef   :  { %7464 = vmatpush3.bf16.msra.mxu0 %v7972_v5  ;;  %v7974_v5 = vld [vmem:[%s10983_s10] sm:$0xff]  }
 0x6f0   :  { %7439 = vmatprep.mubr.msk.bf16.mxu1 %vm200_vm3, %v2573_v33  ;;  %7465 = vmatprep.subr.bf16.mxu0 %v7973_v24 }
 0x6f1   :  { %7440 = vmatmul.mubr.msk.bf16.gmra.mrb[84].mxu1 %vm200_vm3, %v2574_v27 }
 0x6f3   :  { %v7401_v21 = vpop.f32.mrb[72].mxu1  ;;  %7466 = vmatpush3.bf16.msra.mxu0 %v7973_v24  ;;  %v7975_v24 = vld [vmem:[%s10983_s10 + $0x8] sm:$0xff]  }
 0x6f4   :  { %v2459_v32 = vpop.f32.mrb[73].mxu1  ;;  %7475 = vmatprep.subr.bf16.mxu0 %v7974_v5 }
 0x6f5   :  { %v7402_v46 = vpop.f32.mrb[74].mxu1 }
 0x6f6   :  { %v2576_v63 = vpack.c.bf16 %v7402_v46, %v7401_v21  ;;  %v2462_v10 = vpop.f32.mrb[75].mxu1 }
 0x6f7   :  { %v2575_v35 = vpack.c.bf16 %v2462_v10, %v2459_v32 }
 0x6f9   :  { %7445 = vmatprep.mubr.msk.bf16.mxu1 %vm200_vm3, %v2575_v35 }
 0x6fa   :  { %7446 = vmatmul.mubr.msk.bf16.vlgmr.msra.gmra.mrb[80].mxu1 %vm200_vm3, %v2576_v63 }
 0x6fb   :  { %7454 = vmatpush3.bf16.msra.mxu1 %v2837_v17  ;;  %v7405_v7 = vpop.f32.mrb[76].mxu1 }
 0x6fc   :  { %v2475_v4 = vpop.f32.mrb[77].mxu1 }
 0x6fd   :  { %v7406_v61 = vpop.f32.mrb[78].mxu1 }
 0x6fe   :  { %v2578_v38 = vpack.c.bf16 %v7406_v61, %v7405_v7  ;;  %v2478_v37 = vpop.f32.mrb[79].mxu1 }
 0x6ff   :  { %v2577_v11 = vpack.c.bf16 %v2478_v37, %v2475_v4 }
 0x701   :  { %7449 = vmatprep.mubr.msk.bf16.mxu1 %vm200_vm3, %v2577_v11 }
 0x702   :  { %7450 = vmatmul.mubr.msk.bf16.gmra.mrb[84].mxu1 %vm200_vm3, %v2578_v38 }
 0x703   :  { %v7417_v44 = vpop.f32.mrb[80].mxu0 }
 0x704   :  { %v2536_v6 = vpop.f32.mrb[81].mxu0 }
 0x705   :  { %v7418_v30 = vpop.f32.mrb[82].mxu0 }
 0x706   :  { %v2580_v34 = vpack.c.bf16 %v7418_v30, %v7417_v44  ;;  %v2539_v48 = vpop.f32.mrb[83].mxu0 }
 0x707   :  { %v2579_v1 = vpack.c.bf16 %v2539_v48, %v2536_v6 }
 0x709   :  { %7455 = vmatprep.mubr.msk.bf16.mxu1 %vm200_vm3, %v2579_v1 }
 0x70a   :  { %7456 = vmatmul.mubr.msk.bf16.vlgmr.msra.gmra.mrb[80].mxu1 %vm200_vm3, %v2580_v34 }
 0x70b   :  { %v7421_v56 = vpop.f32.mrb[84].mxu0 }
 0x70c   :  { %v2552_v18 = vpop.f32.mrb[85].mxu0 }
 0x70d   :  { %v7422_v0 = vpop.f32.mrb[86].mxu0 }
 0x70e   :  { %v2582_v55 = vpack.c.bf16 %v7422_v0, %v7421_v56  ;;  %v2555_v16 = vpop.f32.mrb[87].mxu0 }
 0x70f   :  { %v2581_v9 = vpack.c.bf16 %v2555_v16, %v2552_v18 }
 0x711   :  { %7459 = vmatprep.mubr.msk.bf16.mxu1 %vm200_vm3, %v2581_v9 }
 0x712   :  { %7460 = vmatmul.mubr.msk.bf16.gmra.mrb[84].mxu1 %vm200_vm3, %v2582_v55  ;;  %v6601_v55 = vld [vmem:[%s10982_s8] ss:$0 sm:$0xff] }
 0x7dd   :  { %v7457_v12 = vpop.f32.mrb[80].mxu1 }
 0x7de   :  { %v2873_v31 = vpop.f32.mrb[81].mxu1  ;;  %v9593_v62 = vadd.f32 %v7457_v12, %v8634_v29 }
 0x7df   :  { %v9596_v41 = vadd.f32 %v2873_v31, %v8619_v15  ;;  %v7458_v58 = vpop.f32.mrb[82].mxu1 }
 0x7e0   :  { %v2876_v22 = vpop.f32.mrb[83].mxu1  ;;  %v9599_v60 = vadd.f32 %v7458_v58, %v8629_v20  ;;  %v2939_v15 = vmul.f32 %v9593_v62, %v9593_v62 }
 0x7e1   :  { %v9602_v50 = vadd.f32 %v2876_v22, %v8617_v13  ;;  %v2937_v51 = vmul.f32 %v9596_v41, %v9596_v41 }
 0x7e2   :  { %v2940_v20 = vmul.f32 %v9599_v60, %v9599_v60  ;;  %v2951_v8 = vsel %vm475_vm4, %v2939_v15, 0.0 }
 0x7e3   :  { %v2945_v25 = vsel %vm475_vm4, %v2937_v51, 0.0  ;;  %v2938_v29 = vmul.f32 %v9602_v50, %v9602_v50 }
 0x7e4   :  { %2946 = vadd.xlane.f32.xlu0 %v2945_v25  ;;  %v2954_v59 = vsel %vm475_vm4, %v2940_v20, 0.0 }
 0x7e5   :  { %v7461_v53 = vpop.f32.mrb[84].mxu1  ;;  %v2948_v28 = vsel %vm475_vm4, %v2938_v29, 0.0 }
 0x7e6   :  { %2949 = vadd.xlane.f32.xlu1 %v2948_v28  ;;  %v2889_v13 = vpop.f32.mrb[85].mxu1  ;;  %v9615_v43 = vadd.f32 %v7461_v53, %v8665_v57 }
 0x7e7   :  { %v9618_v2 = vadd.f32 %v2889_v13, %v8649_v45  ;;  %v7462_v26 = vpop.f32.mrb[86].mxu1 }
 0x7e8   :  { %2952 = vadd.xlane.f32.xlu0 %v2951_v8  ;;  %v2892_v14 = vpop.f32.mrb[87].mxu1  ;;  %v9622_v47 = vadd.f32 %v7462_v26, %v8660_v52  ;;  %v2943_v42 = vmul.f32 %v9615_v43, %v9615_v43 }
 0x7e9   :  { %v9625_v54 = vadd.f32 %v2892_v14, %v8644_v40  ;;  %v2941_v57 = vmul.f32 %v9618_v2, %v9618_v2 }
 0x7ea   :  { %2955 = vadd.xlane.f32.xlu1 %v2954_v59  ;;  %v2944_v40 = vmul.f32 %v9622_v47, %v9622_v47  ;;  %v2963_v3 = vsel %vm475_vm4, %v2943_v42, 0.0 }
 0x7eb   :  { %v2957_v45 = vsel %vm475_vm4, %v2941_v57, 0.0  ;;  %v2942_v49 = vmul.f32 %v9625_v54, %v9625_v54 }
 0x7ec   :  { %2958 = vadd.xlane.f32.xlu0 %v2957_v45  ;;  %v2966_v36 = vsel %vm475_vm4, %v2944_v40, 0.0 }
 0x7ed   :  { %v2960_v52 = vsel %vm475_vm4, %v2942_v49, 0.0 }
 0x7ee   :  { %2961 = vadd.xlane.f32.xlu1 %v2960_v52 }
 0x7f0   :  { %2964 = vadd.xlane.f32.xlu0 %v2963_v3 }
 0x7f2   :  { %2967 = vadd.xlane.f32.xlu1 %v2966_v36 }
 0x871   :  { %v2947_v19 = vpop.xlane.xlu0 %2946 }
 0x872   :  { %v2969_v27 = vmul.f32 0.03125, %v2947_v19  ;;  %v7976_v19 = vld [vmem:[%s10983_s10 + $0x10] sm:$0xff]  }
 0x873   :  { %v2950_v39 = vpop.xlane.xlu1 %2949 }
 0x874   :  { %v2977_v33 = vadd.f32 1e-06, %v2969_v27  ;;  %v2970_v21 = vmul.f32 0.03125, %v2950_v39  ;;  %v7977_v27 = vld [vmem:[%s10983_s10 + $0x18] sm:$0xff]  }
 0x875   :  { %v2953_v32 = vpop.xlane.xlu0 %2952 }
 0x876   :  { %8170 = vrsqrt.f32 %v2977_v33  ;;  %v2978_v46 = vadd.f32 1e-06, %v2970_v21  ;;  %v2971_v63 = vmul.f32 0.03125, %v2953_v32 }
 0x877   :  { %v2956_v10 = vpop.xlane.xlu1 %2955 }
 0x878   :  { %8172 = vrsqrt.f32 %v2978_v46  ;;  %v2979_v35 = vadd.f32 1e-06, %v2971_v63  ;;  %v2972_v17 = vmul.f32 0.03125, %v2956_v10 }
 0x879   :  { %v2959_v7 = vpop.xlane.xlu0 %2958 }
 0x87a   :  { %8174 = vrsqrt.f32 %v2979_v35  ;;  %v2980_v4 = vadd.f32 1e-06, %v2972_v17  ;;  %v2973_v61 = vmul.f32 0.03125, %v2959_v7 }
 0x87b   :  { %v2962_v38 = vpop.xlane.xlu1 %2961 }
 0x87c   :  { %8176 = vrsqrt.f32 %v2980_v4  ;;  %v2981_v37 = vadd.f32 1e-06, %v2973_v61  ;;  %v2974_v11 = vmul.f32 0.03125, %v2962_v38 }
 0x87d   :  { %v2965_v44 = vpop.xlane.xlu0 %2964 }
 0x87e   :  { %8178 = vrsqrt.f32 %v2981_v37  ;;  %v2982_v6 = vadd.f32 1e-06, %v2974_v11  ;;  %v2975_v30 = vmul.f32 0.03125, %v2965_v44 }
 0x87f   :  { %v2968_v34 = vpop.xlane.xlu1 %2967 }
 0x880   :  { %v8171_v48 = vpop.eup %8170  ;;  %8180 = vrsqrt.f32 %v2982_v6  ;;  %v2983_v1 = vadd.f32 1e-06, %v2975_v30  ;;  %v2976_v56 = vmul.f32 0.03125, %v2968_v34 }
 0x881   :  { %v2993_v18 = vmul.f32 %v8171_v48, %v9596_v41 }
 0x882   :  { %v8173_v0 = vpop.eup %8172  ;;  %8182 = vrsqrt.f32 %v2983_v1  ;;  %v2984_v16 = vadd.f32 1e-06, %v2976_v56 }
 0x883   :  { %v2994_v9 = vmul.f32 %v8173_v0, %v9602_v50  ;;  %v3007_v58 = vmul.f32 %v6601_v55, %v2993_v18 }
 0x884   :  { %v8175_v12 = vpop.eup %8174  ;;  %8184 = vrsqrt.f32 %v2984_v16 }
 0x885   :  { %v2995_v31 = vmul.f32 %v8175_v12, %v9593_v62  ;;  %v3008_v22 = vmul.f32 %v6601_v55, %v2994_v9 }
 0x886   :  { %v8177_v51 = vpop.eup %8176 }
 0x887   :  { %v2996_v25 = vmul.f32 %v8177_v51, %v9599_v60  ;;  %v3015_v29 = vpack.c.bf16 %v3008_v22, %v3007_v58  ;;  %v3009_v53 = vmul.f32 %v6601_v55, %v2995_v31 }
 0x888   :  { %v8179_v15 = vpop.eup %8178 }
 0x889   :  { %v3010_v28 = vmul.f32 %v6601_v55, %v2996_v25  ;;  %7467 = vmatprep.mubr.msk.bf16.mxu0 %vm475_vm4, %v3015_v29  ;;  %v2997_v20 = vmul.f32 %v8179_v15, %v9618_v2 }
 0x88a   :  { %v8181_v13 = vpop.eup %8180 }
 0x88b   :  { %v3016_v26 = vpack.c.bf16 %v3010_v28, %v3009_v53  ;;  %v2998_v8 = vmul.f32 %v8181_v13, %v9625_v54  ;;  %v3011_v59 = vmul.f32 %v6601_v55, %v2997_v20 }
 0x88c   :  { %v8183_v14 = vpop.eup %8182 }
 0x88d   :  { %7468 = vmatmul.mubr.msk.bf16.vlgmr.msra.gmra.mrb[88].mxu0 %vm475_vm4, %v3016_v26  ;;  %v3012_v57 = vmul.f32 %v6601_v55, %v2998_v8  ;;  %v2999_v45 = vmul.f32 %v8183_v14, %v9615_v43 }
 0x88e   :  { %v8185_v49 = vpop.eup %8184  ;;  %7476 = vmatpush3.bf16.msra.mxu0 %v7974_v5 }
 0x88f   :  { %v3017_v42 = vpack.c.bf16 %v3012_v57, %v3011_v59  ;;  %v3000_v52 = vmul.f32 %v8185_v49, %v9622_v47  ;;  %v3013_v40 = vmul.f32 %v6601_v55, %v2999_v45  ;;  %7477 = vmatprep.subr.bf16.mxu0 %v7975_v24 }
 0x891   :  { %7471 = vmatprep.mubr.msk.bf16.mxu0 %vm475_vm4, %v3017_v42  ;;  %v3014_v3 = vmul.f32 %v6601_v55, %v3000_v52 }
 0x892   :  { %7478 = vmatpush3.bf16.msra.mxu0 %v7975_v24 }
 0x893   :  { %v3018_v36 = vpack.c.bf16 %v3014_v3, %v3013_v40  ;;  %7479 = vmatprep.subr.bf16.mxu0 %v7976_v19 }
 0x895   :  { %7472 = vmatmul.mubr.msk.bf16.gmra.mrb[92].mxu0 %vm475_vm4, %v3018_v36 }
 0x896   :  { %7480 = vmatpush3.bf16.msra.mxu0 %v7976_v19 }
 0x897   :  { %7481 = vmatprep.subr.bf16.mxu0 %v7977_v27 }
 0x89a   :  { %7482 = vmatpush3.bf16.msra.mxu0 %v7977_v27 }
 0x960   :  { %v9673_v39 = vpop.f32.mrb[88].mxu0 }
 0x961   :  { %v9675_v33 = vpop.f32.mrb[89].mxu0  ;;  %3196 = vrot.lane.b32.xlu1 %v9673_v39, %s8426_s24  ;;  %v3122_v4 = vmul.f32 0.044715, %v9673_v39 }
 0x962   :  { %v9679_v21 = vpop.f32.mrb[90].mxu0  ;;  %3192 = vrot.lane.b32.xlu0 %v9675_v33, %s8426_s24  ;;  %v3120_v17 = vmul.f32 0.044715, %v9675_v33 }
 0x963   :  { %v9683_v32 = vpop.f32.mrb[91].mxu0  ;;  %v3123_v38 = vmul.f32 0.044715, %v9679_v21  ;;  %v3130_v11 = vmul.f32 %v9673_v39, %v3122_v4 }
 0x964   :  { %v3121_v7 = vmul.f32 0.044715, %v9683_v32  ;;  %v3128_v61 = vmul.f32 %v3120_v17, %v9675_v33  ;;  %v3112_v17 = vmul.f32 0.5, %v9675_v33 }
 0x965   :  { %3194 = vrot.lane.b32.xlu1 %v9683_v32, %s8426_s24  ;;  %v3131_v30 = vmul.f32 %v9679_v21, %v3123_v38  ;;  %v3138_v18 = vmul.f32 %v9673_v39, %v3130_v11 }
 0x966   :  { %v3129_v37 = vmul.f32 %v3121_v7, %v9683_v32  ;;  %v3136_v6 = vmul.f32 %v3128_v61, %v9675_v33  ;;  %v3113_v7 = vmul.f32 0.5, %v9683_v32 }
 0x967   :  { %v3139_v12 = vmul.f32 %v9679_v21, %v3131_v30  ;;  %v3146_v58 = vadd.f32 %v9673_v39, %v3138_v18  ;;  %v3114_v30 = vmul.f32 0.5, %v9673_v39 }
 0x968   :  { %v9687_v46 = vpop.f32.mrb[92].mxu0  ;;  %v3137_v48 = vmul.f32 %v3129_v37, %v9683_v32  ;;  %v3144_v0 = vadd.f32 %v3136_v6, %v9675_v33 }
 0x969   :  { %3198 = vrot.lane.b32.xlu1 %v9679_v21, %s8426_s24  ;;  %v9691_v63 = vpop.f32.mrb[93].mxu0  ;;  %v3126_v1 = vmul.f32 0.044715, %v9687_v46  ;;  %v3147_v15 = vadd.f32 %v9679_v21, %v3139_v12  ;;  %v3154_v28 = vmul.f32 0.7978846, %v3146_v58 }
 0x96a   :  { %3200 = vrot.lane.b32.xlu0 %v9691_v63, %s8426_s24  ;;  %v9695_v10 = vpop.f32.mrb[94].mxu0  ;;  %v3124_v44 = vmul.f32 0.044715, %v9691_v63  ;;  %v3145_v9 = vadd.f32 %v3137_v48, %v9683_v32  ;;  %v3152_v22 = vmul.f32 0.7978846, %v3144_v0 }
 0x96b   :  { %v9697_v35 = vpop.f32.mrb[95].mxu0  ;;  %v3127_v55 = vmul.f32 0.044715, %v9695_v10  ;;  %v3134_v31 = vmul.f32 %v9687_v46, %v3126_v1  ;;  %v3155_v26 = vmul.f32 0.7978846, %v3147_v15 }
 0x96c   :  { %v3125_v34 = vmul.f32 0.044715, %v9697_v35  ;;  %v3132_v56 = vmul.f32 %v3124_v44, %v9691_v63  ;;  %v3153_v29 = vmul.f32 0.7978846, %v3145_v9  ;;  %8186 = vtanh.f32 %v3152_v22 }
 0x96d   :  { %3202 = vrot.lane.b32.xlu1 %v9697_v35, %s8426_s24  ;;  %v3135_v25 = vmul.f32 %v9695_v10, %v3127_v55  ;;  %v3142_v13 = vmul.f32 %v9687_v46, %v3134_v31  ;;  %v3117_v39 = vmul.f32 0.5, %v9697_v35 }
 0x96e   :  { %3204 = vrot.lane.b32.xlu0 %v9687_v46, %s8426_s24  ;;  %v3133_v16 = vmul.f32 %v3125_v34, %v9697_v35  ;;  %v3140_v51 = vmul.f32 %v3132_v56, %v9691_v63  ;;  %8188 = vtanh.f32 %v3153_v29  ;;  %v3115_v56 = vmul.f32 0.5, %v9679_v21 }
 0x96f   :  { %v3143_v14 = vmul.f32 %v9695_v10, %v3135_v25  ;;  %8190 = vtanh.f32 %v3154_v28  ;;  %v3150_v57 = vadd.f32 %v9687_v46, %v3142_v13 }
 0x970   :  { %v3141_v53 = vmul.f32 %v3133_v16, %v9697_v35  ;;  %v3148_v20 = vadd.f32 %v3140_v51, %v9691_v63  ;;  %8192 = vtanh.f32 %v3155_v26  ;;  %v3116_v51 = vmul.f32 0.5, %v9691_v63 }
 0x971   :  { %3206 = vrot.lane.b32.xlu1 %v9695_v10, %s8426_s24  ;;  %v3151_v49 = vadd.f32 %v9695_v10, %v3143_v14  ;;  %v3158_v42 = vmul.f32 0.7978846, %v3150_v57  ;;  %v3118_v26 = vmul.f32 0.5, %v9687_v46 }
 0x972   :  { %v3149_v8 = vadd.f32 %v3141_v53, %v9697_v35  ;;  %v3156_v59 = vmul.f32 0.7978846, %v3148_v20 }
 0x973   :  { %v3159_v52 = vmul.f32 0.7978846, %v3151_v49 }
 0x974   :  { %v3157_v45 = vmul.f32 0.7978846, %v3149_v8  ;;  %8194 = vtanh.f32 %v3156_v59  ;;  %v3119_v8 = vmul.f32 0.5, %v9695_v10 }
 0x976   :  { %8196 = vtanh.f32 %v3157_v45  ;;  %v8187_v40 = vpop.eup %8186 }
 0x977   :  { %8198 = vtanh.f32 %v3158_v42  ;;  %v3168_v5 = vadd.f32 1.0, %v8187_v40 }
 0x978   :  { %v8189_v3 = vpop.eup %8188  ;;  %8200 = vtanh.f32 %v3159_v52 }
 0x979   :  { %v8191_v36 = vpop.eup %8190  ;;  %v3169_v24 = vadd.f32 1.0, %v8189_v3  ;;  %v3176_v37 = vmul.f32 %v3168_v5, %v3112_v17 }
 0x97a   :  { %v8193_v19 = vpop.eup %8192  ;;  %v3170_v4 = vadd.f32 1.0, %v8191_v36 }
 0x97b   :  { %v3177_v11 = vmul.f32 %v3169_v24, %v3113_v7  ;;  %v3171_v44 = vadd.f32 1.0, %v8193_v19 }
 0x97c   :  { %v3178_v18 = vmul.f32 %v3170_v4, %v3114_v30 }
 0x97d   :  { %v3179_v33 = vmul.f32 %v3171_v44, %v3115_v56 }
 0x97e   :  { %v8195_v38 = vpop.eup %8194 }
 0x97f   :  { %v3172_v16 = vadd.f32 1.0, %v8195_v38 }
 0x980   :  { %v8197_v6 = vpop.eup %8196 }
 0x981   :  { %v8199_v0 = vpop.eup %8198  ;;  %v3173_v32 = vadd.f32 1.0, %v8197_v6  ;;  %v3180_v21 = vmul.f32 %v3172_v16, %v3116_v51  ;;  %v9812_v16 = vld [vmem:[%s10977_s6 + $0xd0] sm:$0xff]  }
 0x982   :  { %v8201_v9 = vpop.eup %8200  ;;  %v3174_v25 = vadd.f32 1.0, %v8199_v0  ;;  %v7980_v0 = vld [vmem:[%s10977_s6 + $0xe0] sm:$0xff]  }
 0x983   :  { %v3181_v15 = vmul.f32 %v3173_v32, %v3117_v39  ;;  %v3175_v53 = vadd.f32 1.0, %v8201_v9  ;;  %7515 = vmatprep.subr.bf16.mxu1 %v7980_v0  ;;  %v9818_v32 = vld [vmem:[%s10977_s6 + $0x100] sm:$0xff]  }
 0x984   :  { %v3182_v59 = vmul.f32 %v3174_v25, %v3118_v26  ;;  %7516 = vmatpush3.bf16.msra.mxu1 %v7980_v0 }
 0x985   :  { %v3183_v57 = vmul.f32 %v3175_v53, %v3119_v8 }
 0x9d3   :  { %v3197_v27 = vpop.permute.xlu1 %3196 }
 0x9d4   :  { %v3193_v61 = vpop.permute.xlu0 %3192  ;;  %v3218_v31 = vmul.f32 %v3197_v27, %v3178_v18  ;;  %v7978_v18 = vld [vmem:[%s10977_s6 + $0xc0] sm:$0xff]  }
 0x9d5   :  { %v3216_v48 = vmul.f32 %v3193_v61, %v3176_v37  ;;  %7491 = vmatprep.subr.bf16.mxu0 %v7978_v18 }
 0x9d7   :  { %v3195_v34 = vpop.permute.xlu1 %3194 }
 0x9d8   :  { %v3217_v1 = vmul.f32 %v3195_v34, %v3177_v11 }
 0x9da   :  { %v3224_v55 = vpack.c.bf16 %v3217_v1, %v3216_v48 }
 0x9db   :  { %v3199_v12 = vpop.permute.xlu1 %3198 }
 0x9dc   :  { %v3219_v58 = vmul.f32 %v3199_v12, %v3179_v33  ;;  %v3201_v22 = vpop.permute.xlu0 %3200  ;;  %7483 = vmatprep.mubr.msk.bf16.mxu0 %vm49_vm0, %v3224_v55  ;;  %v7979_v55 = vld [vmem:[%s10977_s6 + $0xc8] sm:$0xff]  }
 0x9dd   :  { %v3220_v20 = vmul.f32 %v3201_v22, %v3180_v21  ;;  %v7981_v33 = vld [vmem:[%s10977_s6 + $0xe8] sm:$0xff]  }
 0x9de   :  { %v3225_v29 = vpack.c.bf16 %v3219_v58, %v3218_v31  ;;  %7517 = vmatprep.subr.bf16.mxu1 %v7981_v33 }
 0x9df   :  { %v3203_v28 = vpop.permute.xlu1 %3202  ;;  %7518 = vmatpush3.bf16.msra.mxu1 %v7981_v33  ;;  %v7986_v33 = vld [vmem:[%s10977_s6 + $0xf0] sm:$0xff]  }
 0x9e0   :  { %v3221_v13 = vmul.f32 %v3203_v28, %v3181_v15  ;;  %7484 = vmatmul.mubr.msk.bf16.vlgmr.msra.gmra.mrb[96].mxu0 %vm49_vm0, %v3225_v29  ;;  %v3205_v14 = vpop.permute.xlu0 %3204  ;;  %7539 = vmatprep.subr.bf16.mxu1 %v9818_v32 }
 0x9e1   :  { %v3222_v35 = vmul.f32 %v3205_v14, %v3182_v59  ;;  %7492 = vmatpush3.bf16.msra.mxu0 %v7978_v18 }
 0x9e2   :  { %v3226_v63 = vpack.c.bf16 %v3221_v13, %v3220_v20  ;;  %7493 = vmatprep.subr.bf16.mxu0 %v7979_v55 }
 0x9e3   :  { %v3207_v45 = vpop.permute.xlu1 %3206 }
 0x9e4   :  { %v3223_v49 = vmul.f32 %v3207_v45, %v3183_v57  ;;  %7487 = vmatprep.mubr.msk.bf16.mxu0 %vm49_vm0, %v3226_v63 }
 0x9e5   :  { %7494 = vmatpush3.bf16.msra.mxu0 %v7979_v55 }
 0x9e6   :  { %v3227_v42 = vpack.c.bf16 %v3223_v49, %v3222_v35  ;;  %7503 = vmatprep.subr.bf16.mxu0 %v9812_v16 }
 0x9e8   :  { %7488 = vmatmul.mubr.msk.bf16.gmra.mrb[100].mxu0 %vm49_vm0, %v3227_v42  ;;  %v6617_v42 = vld [vmem:[%s10978_s5 + $0x1] ss:$0 sm:$0xff] }
 0xab3   :  { %v7485_v52 = vpop.f32.mrb[96].mxu0 }
 0xab4   :  { %v3306_v40 = vpop.f32.mrb[97].mxu0  ;;  %v9750_v46 = vadd.f32 %v7485_v52, %v9593_v62 }
 0xab5   :  { %v9753_v3 = vadd.f32 %v3306_v40, %v9596_v41  ;;  %v7486_v10 = vpop.f32.mrb[98].mxu0 }
 0xab6   :  { %v3309_v36 = vpop.f32.mrb[99].mxu0  ;;  %v9761_v19 = vadd.f32 %v7486_v10, %v9599_v60  ;;  %v3349_v41 = vmul.f32 %v9750_v46, %v9750_v46 }
 0xab7   :  { %v9756_v5 = vadd.f32 %v3309_v36, %v9602_v50  ;;  %v3347_v24 = vmul.f32 %v9753_v3, %v9753_v3 }
 0xab8   :  { %v3361_v60 = vsel %vm475_vm4, %v3349_v41, 0.0  ;;  %v3350_v38 = vmul.f32 %v9761_v19, %v9761_v19 }
 0xab9   :  { %v3355_v27 = vsel %vm475_vm4, %v3347_v24, 0.0  ;;  %v3348_v62 = vmul.f32 %v9756_v5, %v9756_v5 }
 0xaba   :  { %3356 = vadd.xlane.f32.xlu0 %v3355_v27 }
 0xabb   :  { %v7489_v17 = vpop.f32.mrb[100].mxu0  ;;  %v3358_v7 = vsel %vm475_vm4, %v3348_v62, 0.0 }
 0xabc   :  { %3359 = vadd.xlane.f32.xlu1 %v3358_v7  ;;  %v3322_v50 = vpop.f32.mrb[101].mxu0  ;;  %v9782_v6 = vadd.f32 %v7489_v17, %v9615_v43 }
 0xabd   :  { %v9770_v4 = vadd.f32 %v3322_v50, %v9618_v2  ;;  %v7490_v61 = vpop.f32.mrb[102].mxu0  ;;  %v3364_v2 = vsel %vm475_vm4, %v3350_v38, 0.0 }
 0xabe   :  { %3362 = vadd.xlane.f32.xlu0 %v3361_v60  ;;  %v3325_v37 = vpop.f32.mrb[103].mxu0  ;;  %v9776_v11 = vadd.f32 %v7490_v61, %v9622_v47  ;;  %v3353_v43 = vmul.f32 %v9782_v6, %v9782_v6 }
 0xabf   :  { %v9779_v44 = vadd.f32 %v3325_v37, %v9625_v54  ;;  %v3351_v34 = vmul.f32 %v9770_v4, %v9770_v4 }
 0xac0   :  { %v3354_v47 = vmul.f32 %v9776_v11, %v9776_v11  ;;  %v3373_v56 = vsel %vm475_vm4, %v3353_v43, 0.0 }
 0xac1   :  { %v3352_v30 = vmul.f32 %v9779_v44, %v9779_v44  ;;  %v3367_v54 = vsel %vm475_vm4, %v3351_v34, 0.0 }
 0xac2   :  { %3365 = vadd.xlane.f32.xlu0 %v3364_v2  ;;  %v3376_v1 = vsel %vm475_vm4, %v3354_v47, 0.0  ;;  %v7985_v47 = vld [vmem:[%s10977_s6 + $0x108] sm:$0xff]  }
 0xac3   :  { %v3370_v48 = vsel %vm475_vm4, %v3352_v30, 0.0 }
 0xac4   :  { %3371 = vadd.xlane.f32.xlu1 %v3370_v48  ;;  %v7983_v48 = vld [vmem:[%s10977_s6 + $0xd8] sm:$0xff]  }
 0xac6   :  { %3368 = vadd.xlane.f32.xlu0 %v3367_v54 }
 0xac8   :  { %3377 = vadd.xlane.f32.xlu1 %v3376_v1 }
 0xaca   :  { %3374 = vadd.xlane.f32.xlu0 %v3373_v56 }
 0xb47   :  { %v3357_v9 = vpop.xlane.xlu0 %3356 }
 0xb48   :  { %v3379_v12 = vmul.f32 0.03125, %v3357_v9  ;;  %v7988_v9 = vld [vmem:[%s10977_s6 + $0x120] sm:$0xff]  }
 0xb49   :  { %v3360_v31 = vpop.xlane.xlu1 %3359 }
 0xb4a   :  { %v3387_v58 = vadd.f32 1e-06, %v3379_v12  ;;  %v3380_v22 = vmul.f32 0.03125, %v3360_v31 }
 0xb4b   :  { %v3363_v51 = vpop.xlane.xlu0 %3362 }
 0xb4c   :  { %8202 = vrsqrt.f32 %v3387_v58  ;;  %v3388_v39 = vadd.f32 1e-06, %v3380_v22  ;;  %v3381_v25 = vmul.f32 0.03125, %v3363_v51  ;;  %v7989_v58 = vld [vmem:[%s10977_s6 + $0x128] sm:$0xff]   ;;  %v7990_v22 = vld [vmem:[%s10977_s6 + $0x110] sm:$0xff]   ;;  %v7992_v51 = vld [vmem:[%s10977_s6 + $0x140] sm:$0xff]  }
 0xb4e   :  { %8204 = vrsqrt.f32 %v3388_v39  ;;  %v3389_v29 = vadd.f32 1e-06, %v3381_v25  ;;  %v7991_v39 = vld [vmem:[%s10977_s6 + $0x118] sm:$0xff]   ;;  %v7993_v25 = vld [vmem:[%s10977_s6 + $0x148] sm:$0xff]  }
 0xb4f   :  { %v3366_v21 = vpop.xlane.xlu0 %3365 }
 0xb50   :  { %8206 = vrsqrt.f32 %v3389_v29  ;;  %v3382_v15 = vmul.f32 0.03125, %v3366_v21  ;;  %v7994_v29 = vld [vmem:[%s10977_s6 + $0x130] sm:$0xff]   ;;  %v7995_v21 = vld [vmem:[%s10977_s6 + $0x160] sm:$0xff]  }
 0xb51   :  { %v3372_v53 = vpop.xlane.xlu1 %3371 }
 0xb52   :  { %v3390_v28 = vadd.f32 1e-06, %v3382_v15  ;;  %v3384_v20 = vmul.f32 0.03125, %v3372_v53  ;;  %v7996_v15 = vld [vmem:[%s10977_s6 + $0x138] sm:$0xff]   ;;  %v7997_v53 = vld [vmem:[%s10977_s6 + $0x168] sm:$0xff]  }
 0xb53   :  { %v3369_v13 = vpop.xlane.xlu0 %3368 }
 0xb54   :  { %8208 = vrsqrt.f32 %v3390_v28  ;;  %v3392_v26 = vadd.f32 1e-06, %v3384_v20  ;;  %v3383_v8 = vmul.f32 0.03125, %v3369_v13  ;;  %v7998_v28 = vld [vmem:[%s10977_s6 + $0x150] sm:$0xff]   ;;  %v7999_v20 = vld [vmem:[%s10977_s6 + $0x158] sm:$0xff]  }
 0xb55   :  { %v3378_v14 = vpop.xlane.xlu1 %3377  ;;  %v8000_v13 = vld [vmem:[%s10977_s6 + $0x170] sm:$0xff]  }
 0xb56   :  { %v8203_v63 = vpop.eup %8202  ;;  %8210 = vrsqrt.f32 %v3392_v26  ;;  %v3391_v59 = vadd.f32 1e-06, %v3383_v8  ;;  %v3386_v57 = vmul.f32 0.03125, %v3378_v14  ;;  %v8001_v26 = vld [vmem:[%s10977_s6 + $0x178] sm:$0xff]  }
 0xb57   :  { %v3403_v45 = vmul.f32 %v8203_v63, %v9753_v3  ;;  %v3375_v35 = vpop.xlane.xlu0 %3374 }
 0xb58   :  { %v8205_v49 = vpop.eup %8204  ;;  %8212 = vrsqrt.f32 %v3391_v59  ;;  %v3394_v52 = vadd.f32 1e-06, %v3386_v57  ;;  %v3385_v40 = vmul.f32 0.03125, %v3375_v35 }
 0xb59   :  { %v3404_v10 = vmul.f32 %v8205_v49, %v9756_v5  ;;  %v3417_v27 = vmul.f32 %v6617_v42, %v3403_v45 }
 0xb5a   :  { %v8207_v36 = vpop.eup %8206  ;;  %8214 = vrsqrt.f32 %v3394_v52  ;;  %v3393_v24 = vadd.f32 1e-06, %v3385_v40 }
 0xb5b   :  { %v3418_v62 = vmul.f32 %v6617_v42, %v3404_v10  ;;  %v3405_v17 = vmul.f32 %v8207_v36, %v9750_v46 }
 0xb5c   :  { %8216 = vrsqrt.f32 %v3393_v24 }
 0xb5d   :  { %v9826_v41 = vpack.c.bf16 %v3418_v62, %v3417_v27  ;;  %v3419_v60 = vmul.f32 %v6617_v42, %v3405_v17 }
 0xb5e   :  { %v8209_v7 = vpop.eup %8208 }
 0xb5f   :  { %v3406_v50 = vmul.f32 %v8209_v7, %v9761_v19  ;;  %7495 = vmatprep.mubr.msk.bf16.mxu0 %vm475_vm4, %v9826_v41  ;;  %7519 = vmatprep.mubr.msk.bf16.mxu1 %vm475_vm4, %v9826_v41 }
 0xb60   :  { %v8211_v61 = vpop.eup %8210 }
 0xb61   :  { %v3420_v38 = vmul.f32 %v6617_v42, %v3406_v50  ;;  %v3408_v37 = vmul.f32 %v8211_v61, %v9779_v44 }
 0xb62   :  { %v8213_v2 = vpop.eup %8212 }
 0xb63   :  { %v9835_v30 = vpack.c.bf16 %v3420_v38, %v3419_v60  ;;  %v3407_v34 = vmul.f32 %v8213_v2, %v9770_v4  ;;  %v3422_v43 = vmul.f32 %v6617_v42, %v3408_v37 }
 0xb64   :  { %v8215_v54 = vpop.eup %8214 }
 0xb65   :  { %v3421_v1 = vmul.f32 %v6617_v42, %v3407_v34  ;;  %v3410_v56 = vmul.f32 %v8215_v54, %v9776_v11  ;;  %7496 = vmatmul.mubr.msk.bf16.vlgmr.msra.gmra.mrb[104].mxu0 %vm475_vm4, %v9835_v30  ;;  %7520 = vmatmul.mubr.msk.bf16.vlgmr.msra.gmra.mrb[88].mxu1 %vm475_vm4, %v9835_v30 }
 0xb66   :  { %v8217_v18 = vpop.eup %8216  ;;  %7504 = vmatpush3.bf16.msra.mxu0 %v9812_v16  ;;  %7540 = vmatpush3.bf16.msra.mxu1 %v9818_v32  ;;  %v7987_v32 = vld [vmem:[%s10977_s6 + $0xf8] sm:$0xff]  }
 0xb67   :  { %v9851_v0 = vpack.c.bf16 %v3422_v43, %v3421_v1  ;;  %v3409_v55 = vmul.f32 %v8217_v18, %v9782_v6  ;;  %7505 = vmatprep.subr.bf16.mxu0 %v7983_v48  ;;  %7541 = vmatprep.subr.bf16.mxu1 %v7985_v47  ;;  %v3424_v12 = vmul.f32 %v6617_v42, %v3410_v56 }
 0xb69   :  { %v3423_v31 = vmul.f32 %v6617_v42, %v3409_v55  ;;  %7499 = vmatprep.mubr.msk.bf16.mxu0 %vm475_vm4, %v9851_v0  ;;  %7523 = vmatprep.mubr.msk.bf16.mxu1 %vm475_vm4, %v9851_v0 }
 0xb6a   :  { %7506 = vmatpush3.bf16.msra.mxu0 %v7983_v48  ;;  %7542 = vmatpush3.bf16.msra.mxu1 %v7985_v47 }
 0xb6b   :  { %v9864_v16 = vpack.c.bf16 %v3424_v12, %v3423_v31  ;;  %7527 = vmatprep.subr.bf16.mxu0 %v7986_v33  ;;  %7563 = vmatprep.subr.bf16.mxu1 %v7988_v9 }
 0xb6d   :  { %7500 = vmatmul.mubr.msk.bf16.gmra.mrb[108].mxu0 %vm475_vm4, %v9864_v16  ;;  %7524 = vmatmul.mubr.msk.bf16.gmra.mrb[92].mxu1 %vm475_vm4, %v9864_v16 }
 0xb6e   :  { %7507 = vmatprep.mubr.msk.bf16.mxu0 %vm475_vm4, %v9826_v41  ;;  %7543 = vmatprep.mubr.msk.bf16.mxu1 %vm475_vm4, %v9826_v41 }
 0xb75   :  { %7508 = vmatmul.mubr.msk.bf16.vlgmr.msra.gmra.mrb[112].mxu0 %vm475_vm4, %v9835_v30  ;;  %7544 = vmatmul.mubr.msk.bf16.vlgmr.msra.gmra.mrb[96].mxu1 %vm475_vm4, %v9835_v30 }
 0xb76   :  { %7528 = vmatpush3.bf16.msra.mxu0 %v7986_v33  ;;  %7511 = vmatprep.mubr.msk.bf16.mxu0 %vm475_vm4, %v9851_v0 }
 0xb77   :  { %7547 = vmatprep.mubr.msk.bf16.mxu1 %vm475_vm4, %v9851_v0  ;;  %7529 = vmatprep.subr.bf16.mxu0 %v7987_v32 }
 0xb78   :  { %7564 = vmatpush3.bf16.msra.mxu1 %v7988_v9 }
 0xb79   :  { %7565 = vmatprep.subr.bf16.mxu1 %v7989_v58 }
 0xb7a   :  { %7530 = vmatpush3.bf16.msra.mxu0 %v7987_v32 }
 0xb7b   :  { %7551 = vmatprep.subr.bf16.mxu0 %v7990_v22 }
 0xb7c   :  { %7566 = vmatpush3.bf16.msra.mxu1 %v7989_v58 }
 0xb7d   :  { %7512 = vmatmul.mubr.msk.bf16.gmra.mrb[116].mxu0 %vm475_vm4, %v9864_v16  ;;  %7548 = vmatmul.mubr.msk.bf16.gmra.mrb[100].mxu1 %vm475_vm4, %v9864_v16 }
 0xb7e   :  { %7531 = vmatprep.mubr.msk.bf16.mxu0 %vm475_vm4, %v9826_v41  ;;  %7567 = vmatprep.mubr.msk.bf16.mxu1 %vm475_vm4, %v9826_v41 }
 0xb7f   :  { %7587 = vmatprep.subr.bf16.mxu1 %v7992_v51 }
 0xb85   :  { %7532 = vmatmul.mubr.msk.bf16.vlgmr.msra.gmra.mrb[120].mxu0 %vm475_vm4, %v9835_v30  ;;  %7568 = vmatmul.mubr.msk.bf16.vlgmr.msra.gmra.mrb[104].mxu1 %vm475_vm4, %v9835_v30 }
 0xb86   :  { %7552 = vmatpush3.bf16.msra.mxu0 %v7990_v22  ;;  %7535 = vmatprep.mubr.msk.bf16.mxu0 %vm475_vm4, %v9851_v0 }
 0xb87   :  { %7571 = vmatprep.mubr.msk.bf16.mxu1 %vm475_vm4, %v9851_v0  ;;  %7553 = vmatprep.subr.bf16.mxu0 %v7991_v39 }
 0xb88   :  { %7588 = vmatpush3.bf16.msra.mxu1 %v7992_v51 }
 0xb89   :  { %7589 = vmatprep.subr.bf16.mxu1 %v7993_v25 }
 0xb8a   :  { %7554 = vmatpush3.bf16.msra.mxu0 %v7991_v39 }
 0xb8b   :  { %7575 = vmatprep.subr.bf16.mxu0 %v7994_v29 }
 0xb8c   :  { %7590 = vmatpush3.bf16.msra.mxu1 %v7993_v25 }
 0xb8d   :  { %7536 = vmatmul.mubr.msk.bf16.gmra.mrb[124].mxu0 %vm475_vm4, %v9864_v16  ;;  %7572 = vmatmul.mubr.msk.bf16.gmra.mrb[108].mxu1 %vm475_vm4, %v9864_v16 }
 0xb8e   :  { %7555 = vmatprep.mubr.msk.bf16.mxu0 %vm475_vm4, %v9826_v41  ;;  %7591 = vmatprep.mubr.msk.bf16.mxu1 %vm475_vm4, %v9826_v41 }
 0xb8f   :  { %7611 = vmatprep.subr.bf16.mxu1 %v7995_v21 }
 0xb95   :  { %7556 = vmatmul.mubr.msk.bf16.vlgmr.msra.gmra.mrb[128].mxu0 %vm475_vm4, %v9835_v30  ;;  %7592 = vmatmul.mubr.msk.bf16.vlgmr.msra.gmra.mrb[112].mxu1 %vm475_vm4, %v9835_v30 }
 0xb96   :  { %7559 = vmatprep.mubr.msk.bf16.mxu0 %vm475_vm4, %v9851_v0  ;;  %7595 = vmatprep.mubr.msk.bf16.mxu1 %vm475_vm4, %v9851_v0 }
 0xb97   :  { %7576 = vmatpush3.bf16.msra.mxu0 %v7994_v29  ;;  %7612 = vmatpush3.bf16.msra.mxu1 %v7995_v21 }
 0xb98   :  { %7577 = vmatprep.subr.bf16.mxu0 %v7996_v15  ;;  %7613 = vmatprep.subr.bf16.mxu1 %v7997_v53 }
 0xb9b   :  { %7578 = vmatpush3.bf16.msra.mxu0 %v7996_v15  ;;  %7614 = vmatpush3.bf16.msra.mxu1 %v7997_v53 }
 0xb9c   :  { %7599 = vmatprep.subr.bf16.mxu0 %v7998_v28 }
 0xb9d   :  { %7560 = vmatmul.mubr.msk.bf16.gmra.mrb[132].mxu0 %vm475_vm4, %v9864_v16  ;;  %7596 = vmatmul.mubr.msk.bf16.gmra.mrb[116].mxu1 %vm475_vm4, %v9864_v16 }
 0xb9e   :  { %7579 = vmatprep.mubr.msk.bf16.mxu0 %vm475_vm4, %v9826_v41  ;;  %7615 = vmatprep.mubr.msk.bf16.mxu1 %vm475_vm4, %v9826_v41 }
 0xba5   :  { %7580 = vmatmul.mubr.msk.bf16.vlgmr.msra.gmra.mrb[136].mxu0 %vm475_vm4, %v9835_v30  ;;  %7616 = vmatmul.mubr.msk.bf16.vlgmr.msra.gmra.mrb[120].mxu1 %vm475_vm4, %v9835_v30 }
 0xba6   :  { %7583 = vmatprep.mubr.msk.bf16.mxu0 %vm475_vm4, %v9851_v0  ;;  %7619 = vmatprep.mubr.msk.bf16.mxu1 %vm475_vm4, %v9851_v0 }
 0xba7   :  { %7600 = vmatpush3.bf16.msra.mxu0 %v7998_v28 }
 0xba8   :  { %7601 = vmatprep.subr.bf16.mxu0 %v7999_v20 }
 0xbab   :  { %7602 = vmatpush3.bf16.msra.mxu0 %v7999_v20 }
 0xbac   :  { %7623 = vmatprep.subr.bf16.mxu0 %v8000_v13 }
 0xbad   :  { %7584 = vmatmul.mubr.msk.bf16.gmra.mrb[140].mxu0 %vm475_vm4, %v9864_v16  ;;  %7620 = vmatmul.mubr.msk.bf16.gmra.mrb[124].mxu1 %vm475_vm4, %v9864_v16 }
 0xbae   :  { %7603 = vmatprep.mubr.msk.bf16.mxu0 %vm475_vm4, %v9826_v41 }
 0xbb5   :  { %7604 = vmatmul.mubr.msk.bf16.vlgmr.msra.gmra.mrb[144].mxu0 %vm475_vm4, %v9835_v30 }
 0xbb6   :  { %7607 = vmatprep.mubr.msk.bf16.mxu0 %vm475_vm4, %v9851_v0  ;;  %7624 = vmatpush3.bf16.msra.mxu0 %v8000_v13 }
 0xbb7   :  { %7625 = vmatprep.subr.bf16.mxu0 %v8001_v26 }
 0xbba   :  { %7626 = vmatpush3.bf16.msra.mxu0 %v8001_v26 }
 0xbbd   :  { %7608 = vmatmul.mubr.msk.bf16.gmra.mrb[148].mxu0 %vm475_vm4, %v9864_v16 }
 0xbbe   :  { %7627 = vmatprep.mubr.msk.bf16.mxu0 %vm475_vm4, %v9826_v41 }
 0xbc5   :  { %7628 = vmatmul.mubr.msk.bf16.vlgmr.msra.gmra.mrb[152].mxu0 %vm475_vm4, %v9835_v30 }
 0xbc6   :  { %7631 = vmatprep.mubr.msk.bf16.mxu0 %vm475_vm4, %v9851_v0 }
 0xbcd   :  { %7632 = vmatmul.mubr.msk.bf16.gmra.mrb[156].mxu0 %vm475_vm4, %v9864_v16 }
 0xc38   :  { %v9992_v8 = vpop.f32.mrb[104].mxu0  ;;  %v9994_v14 = vpop.f32.mrb[88].mxu1 }
 0xc39   :  { %v3487_v63 = vpop.f32.mrb[105].mxu0  ;;  %v9996_v59 = vpop.f32.mrb[89].mxu1 }
 0xc3a   :  { %v9998_v57 = vpop.f32.mrb[106].mxu0  ;;  %v10000_v45 = vpop.f32.mrb[90].mxu1 }
 0xc3b   :  { %v4366_v35 = vpack.c.bf16 %v9998_v57, %v9992_v8  ;;  %v4374_v49 = vpack.c.bf16 %v10000_v45, %v9994_v14  ;;  %v3490_v42 = vpop.f32.mrb[107].mxu0  ;;  %v10006_v52 = vpop.f32.mrb[91].mxu1 }
 0xc3c   :  { %v4365_v40 = vpack.c.bf16 %v3490_v42, %v3487_v63  ;;  %v4373_v10 = vpack.c.bf16 %v10006_v52, %v9996_v59 }
 0xc3e   :  { %7643 = vmatprep.mubr.msk.bf16.mxu1 %vm200_vm3, %v4365_v40 }
 0xc40   :  { %v10011_v36 = vpop.f32.mrb[108].mxu0  ;;  %v10013_v24 = vpop.f32.mrb[92].mxu1 }
 0xc41   :  { %v10015_v27 = vpop.f32.mrb[109].mxu0  ;;  %v10017_v62 = vpop.f32.mrb[93].mxu1 }
 0xc42   :  { %v10019_v41 = vpop.f32.mrb[110].mxu0  ;;  %v10021_v17 = vpop.f32.mrb[94].mxu1 }
 0xc43   :  { %v4368_v7 = vpack.c.bf16 %v10019_v41, %v10011_v36  ;;  %v10027_v61 = vpop.f32.mrb[111].mxu0  ;;  %v10029_v60 = vpop.f32.mrb[95].mxu1 }
 0xc44   :  { %v4367_v38 = vpack.c.bf16 %v10027_v61, %v10015_v27 }
 0xc48   :  { %v10035_v2 = vpop.f32.mrb[112].mxu0  ;;  %v7545_v30 = vpop.f32.mrb[96].mxu1 }
 0xc49   :  { %v3564_v34 = vpop.f32.mrb[113].mxu0  ;;  %v3795_v48 = vpop.f32.mrb[97].mxu1 }
 0xc4a   :  { %v10037_v47 = vpop.f32.mrb[114].mxu0  ;;  %v7546_v54 = vpop.f32.mrb[98].mxu1 }
 0xc4b   :  { %v4370_v43 = vpack.c.bf16 %v10037_v47, %v10035_v2  ;;  %v4382_v1 = vpack.c.bf16 %v7546_v54, %v7545_v30  ;;  %v3567_v56 = vpop.f32.mrb[115].mxu0  ;;  %v3798_v18 = vpop.f32.mrb[99].mxu1 }
 0xc4c   :  { %v4369_v0 = vpack.c.bf16 %v3567_v56, %v3564_v34  ;;  %v4381_v55 = vpack.c.bf16 %v3798_v18, %v3795_v48 }
 0xc4d   :  { %v4429_v15 = vsel %vm200_vm3, %v4382_v1, 0 }
 0xc4e   :  { %v4426_v33 = vsel %vm200_vm3, %v4381_v55, 0  ;;  %7927 = vmatprep.subr.msk.bf16.mxu1 %vm200_vm3, %v4381_v55  ;;  %7659 = vmatprep.mubr.msk.bf16.mxu0 %vm200_vm3, %v4369_v0 }
 0xc4f   :  { %7636 = vmatpush3.bf16.xpose.msra.mxu1 %v4426_v33 }
 0xc50   :  { %v10044_v9 = vpop.f32.mrb[116].mxu0  ;;  %v7549_v12 = vpop.f32.mrb[100].mxu1  ;;  %7928 = vmatprep.subr.msk.bf16.mxu1 %vm200_vm3, %v4382_v1 }
 0xc51   :  { %v10047_v31 = vpop.f32.mrb[117].mxu0  ;;  %v3811_v16 = vpop.f32.mrb[101].mxu1 }
 0xc52   :  { %v10049_v32 = vpop.f32.mrb[118].mxu0  ;;  %v7550_v58 = vpop.f32.mrb[102].mxu1 }
 0xc53   :  { %v4384_v51 = vpack.c.bf16 %v7550_v58, %v7549_v12  ;;  %v10053_v39 = vpop.f32.mrb[119].mxu0  ;;  %v3814_v25 = vpop.f32.mrb[103].mxu1 }
 0xc54   :  { %v4383_v21 = vpack.c.bf16 %v3814_v25, %v3811_v16 }
 0xc56   :  { %v4432_v1 = vsel %vm200_vm3, %v4383_v21, 0 }
 0xc57   :  { %7638 = vmatpush3.bf16.xpose.msra.mxu1 %v4429_v15 }
 0xc58   :  { %v10058_v53 = vpop.f32.mrb[120].mxu0  ;;  %v7569_v28 = vpop.f32.mrb[104].mxu1  ;;  %7929 = vmatprep.subr.msk.bf16.mxu1 %vm200_vm3, %v4383_v21 }
 0xc59   :  { %v10061_v20 = vpop.f32.mrb[121].mxu0  ;;  %v3949_v13 = vpop.f32.mrb[105].mxu1 }
 0xc5a   :  { %v10063_v26 = vpop.f32.mrb[122].mxu0  ;;  %v7570_v63 = vpop.f32.mrb[106].mxu1 }
 0xc5b   :  { %v4390_v40 = vpack.c.bf16 %v7570_v63, %v7569_v28  ;;  %v10067_v30 = vpop.f32.mrb[123].mxu0  ;;  %v3952_v34 = vpop.f32.mrb[107].mxu1 }
 0xc5c   :  { %v4389_v54 = vpack.c.bf16 %v3952_v34, %v3949_v13  ;;  %v4435_v13 = vsel %vm200_vm3, %v4384_v51, 0 }
 0xc5f   :  { %7640 = vmatpush3.bf16.xpose.msra.mxu1 %v4432_v1 }
 0xc60   :  { %v10072_v56 = vpop.f32.mrb[124].mxu0  ;;  %v7573_v18 = vpop.f32.mrb[108].mxu1  ;;  %7930 = vmatprep.subr.msk.bf16.mxu1 %vm200_vm3, %v4384_v51  ;;  %v4604_v51 = vsel %vm200_vm3, %v4389_v54, 0 }
 0xc61   :  { %v10075_v0 = vpop.f32.mrb[125].mxu0  ;;  %v3965_v55 = vpop.f32.mrb[109].mxu1 }
 0xc62   :  { %v10077_v33 = vpop.f32.mrb[126].mxu0  ;;  %v7574_v12 = vpop.f32.mrb[110].mxu1 }
 0xc63   :  { %v10081_v58 = vpack.c.bf16 %v7574_v12, %v7573_v18  ;;  %v10083_v25 = vpop.f32.mrb[127].mxu0  ;;  %v3968_v21 = vpop.f32.mrb[111].mxu1 }
 0xc64   :  { %v4379_v15 = vpack.c.bf16 %v10083_v25, %v10075_v0  ;;  %v4391_v28 = vpack.c.bf16 %v3968_v21, %v3965_v55  ;;  %v4607_v21 = vsel %vm200_vm3, %v4390_v40, 0  ;;  %v8394_v0 = vld [vmem:[%s10979_s4] sm:$0xff] }
 0xc67   :  { %7642 = vmatpush3.bf16.xpose.msra.mxu1 %v4435_v13 }
 0xc68   :  { %v7557_v63 = vpop.f32.mrb[128].mxu0  ;;  %v7593_v34 = vpop.f32.mrb[112].mxu1  ;;  %7935 = vmatprep.subr.msk.bf16.mxu1 %vm200_vm3, %v4389_v54 }
 0xc69   :  { %v3872_v1 = vpop.f32.mrb[129].mxu0  ;;  %v4103_v42 = vpop.f32.mrb[113].mxu1 }
 0xc6a   :  { %v7558_v48 = vpop.f32.mrb[130].mxu0  ;;  %v7594_v16 = vpop.f32.mrb[114].mxu1 }
 0xc6b   :  { %v4386_v18 = vpack.c.bf16 %v7558_v48, %v7557_v63  ;;  %v10089_v12 = vpack.c.bf16 %v7594_v16, %v7593_v34  ;;  %v3875_v50 = vpop.f32.mrb[131].mxu0  ;;  %v4106_v22 = vpop.f32.mrb[115].mxu1 }
 0xc6c   :  { %v4385_v37 = vpack.c.bf16 %v3875_v50, %v3872_v1  ;;  %v10091_v29 = vpack.c.bf16 %v4106_v22, %v4103_v42 }
 0xc6e   :  { %v4515_v55 = vsel %vm200_vm3, %v4385_v37, 0  ;;  %7644 = vmatmul.mubr.msk.bf16.vlgmr.msra.gmra.mrb[128].mxu1 %vm200_vm3, %v4366_v35  ;;  %7931 = vmatprep.subr.msk.bf16.mxu0 %vm200_vm3, %v4385_v37 }
 0xc6f   :  { %7647 = vmatprep.mubr.msk.bf16.mxu1 %vm200_vm3, %v4367_v38  ;;  %7652 = vmatpush3.bf16.xpose.msra.mxu0 %v4515_v55  ;;  %v4518_v38 = vsel %vm200_vm3, %v4386_v18, 0 }
 0xc70   :  { %7668 = vmatpush3.bf16.xpose.msra.mxu1 %v4604_v51  ;;  %v7561_v50 = vpop.f32.mrb[132].mxu0  ;;  %v7597_v22 = vpop.f32.mrb[116].mxu1  ;;  %7932 = vmatprep.subr.msk.bf16.mxu0 %vm200_vm3, %v4386_v18 }
 0xc71   :  { %7936 = vmatprep.subr.msk.bf16.mxu1 %vm200_vm3, %v4390_v40  ;;  %v3888_v8 = vpop.f32.mrb[133].mxu0  ;;  %v4119_v57 = vpop.f32.mrb[117].mxu1 }
 0xc72   :  { %v7562_v35 = vpop.f32.mrb[134].mxu0  ;;  %v7598_v42 = vpop.f32.mrb[118].mxu1 }
 0xc73   :  { %v4388_v37 = vpack.c.bf16 %v7562_v35, %v7561_v50  ;;  %v10106_v48 = vpack.c.bf16 %v7598_v42, %v7597_v22  ;;  %v3891_v54 = vpop.f32.mrb[135].mxu0  ;;  %v4122_v16 = vpop.f32.mrb[119].mxu1 }
 0xc74   :  { %v4387_v27 = vpack.c.bf16 %v3891_v54, %v3888_v8  ;;  %v10108_v61 = vpack.c.bf16 %v4122_v16, %v4119_v57 }
 0xc76   :  { %7648 = vmatmul.mubr.msk.bf16.gmra.mrb[132].mxu1 %vm200_vm3, %v4368_v7  ;;  %v4521_v52 = vsel %vm200_vm3, %v4387_v27, 0 }
 0xc77   :  { %7654 = vmatpush3.bf16.xpose.msra.mxu0 %v4518_v38  ;;  %7675 = vmatprep.mubr.msk.bf16.mxu1 %vm200_vm3, %v4373_v10  ;;  %v4610_v10 = vsel %vm200_vm3, %v4391_v28, 0 }
 0xc78   :  { %7670 = vmatpush3.bf16.xpose.msra.mxu1 %v4607_v21  ;;  %v7581_v13 = vpop.f32.mrb[136].mxu0  ;;  %v7617_v63 = vpop.f32.mrb[120].mxu1  ;;  %7933 = vmatprep.subr.msk.bf16.mxu0 %vm200_vm3, %v4387_v27 }
 0xc79   :  { %7937 = vmatprep.subr.msk.bf16.mxu1 %vm200_vm3, %v4391_v28  ;;  %v4026_v34 = vpop.f32.mrb[137].mxu0  ;;  %v4257_v1 = vpop.f32.mrb[121].mxu1 }
 0xc7a   :  { %v7582_v36 = vpop.f32.mrb[138].mxu0  ;;  %v7618_v41 = vpop.f32.mrb[122].mxu1 }
 0xc7b   :  { %v4394_v7 = vpack.c.bf16 %v7582_v36, %v7581_v13  ;;  %v10122_v18 = vpack.c.bf16 %v7618_v41, %v7617_v63  ;;  %v4029_v40 = vpop.f32.mrb[139].mxu0  ;;  %v4260_v55 = vpop.f32.mrb[123].mxu1  ;;  %v4524_v13 = vsel %vm200_vm3, %v4388_v37, 0  ;;  %v4613_v63 = vsel %vm200_vm3, %v10081_v58, 0 }
 0xc7c   :  { %v4393_v51 = vpack.c.bf16 %v4029_v40, %v4026_v34  ;;  %v10124_v59 = vpack.c.bf16 %v4260_v55, %v4257_v1 }
 0xc7f   :  { %7656 = vmatpush3.bf16.xpose.msra.mxu0 %v4521_v52  ;;  %v11033_v52 = vpack.c.bf16 %v10029_v60, %v10017_v62  ;;  %v11034_v62 = vpack.c.bf16 %v10049_v32, %v10044_v9  ;;  %v4696_v60 = vsel %vm200_vm3, %v4394_v7, 0 }
 0xc80   :  { %7672 = vmatpush3.bf16.xpose.msra.mxu1 %v4610_v10  ;;  %v7585_v50 = vpop.f32.mrb[140].mxu0  ;;  %v7621_v22 = vpop.f32.mrb[124].mxu1  ;;  %7934 = vmatprep.subr.msk.bf16.mxu0 %vm200_vm3, %v4388_v37  ;;  %v4693_v37 = vsel %vm200_vm3, %v4393_v51, 0 }
 0xc81   :  { %7938 = vmatprep.subr.msk.bf16.mxu1 %vm200_vm3, %v10081_v58  ;;  %v4042_v8 = vpop.f32.mrb[141].mxu0  ;;  %v4273_v57 = vpop.f32.mrb[125].mxu1  ;;  %v11032_v58 = vpack.c.bf16 %v10053_v39, %v10047_v31  ;;  %v11035_v31 = vpack.c.bf16 %v10021_v17, %v10013_v24  ;;  %v11036_v39 = vpack.c.bf16 %v10067_v30, %v10061_v20 }
 0xc82   :  { %v7586_v35 = vpop.f32.mrb[142].mxu0  ;;  %v7622_v42 = vpop.f32.mrb[126].mxu1 }
 0xc83   :  { %v4396_v54 = vpack.c.bf16 %v7586_v35, %v7585_v50  ;;  %v10131_v16 = vpack.c.bf16 %v7622_v42, %v7621_v22  ;;  %v4045_v38 = vpop.f32.mrb[143].mxu0  ;;  %v4276_v27 = vpop.f32.mrb[127].mxu1  ;;  %v8396_v35 = vld [vmem:[%s10979_s4 + $0x8] sm:$0xff] }
 0xc84   :  { %v4395_v21 = vpack.c.bf16 %v4045_v38, %v4042_v8  ;;  %v10133_v28 = vpack.c.bf16 %v4276_v27, %v4273_v57  ;;  %v11038_v8 = vpack.c.bf16 %v10077_v33, %v10072_v56  ;;  %v8395_v56 = vld [vmem:[%s10979_s4 + $0x10] sm:$0xff]  ;;  %v8397_v38 = vld [vmem:[%s10979_s4 + $0x18] sm:$0xff] }
 0xc85   :  { %v4702_v22 = vsel %vm200_vm3, %v4396_v54, 0 }
 0xc86   :  { %v4699_v20 = vsel %vm200_vm3, %v4395_v21, 0 }
 0xc87   :  { %7658 = vmatpush3.bf16.xpose.msra.mxu0 %v4524_v13 }
 0xc88   :  { %7674 = vmatpush3.bf16.xpose.msra.mxu1 %v4613_v63  ;;  %v7605_v34 = vpop.f32.mrb[144].mxu0  ;;  %7939 = vmatprep.subr.msk.bf16.mxu0 %vm200_vm3, %v4393_v51 }
 0xc89   :  { %7699 = vmatprep.subr.bf16.mxu1 %v10091_v29  ;;  %v4180_v1 = vpop.f32.mrb[145].mxu0 }
 0xc8a   :  { %v7606_v36 = vpop.f32.mrb[146].mxu0 }
 0xc8b   :  { %v4402_v41 = vpack.c.bf16 %v7606_v36, %v7605_v34  ;;  %v4183_v40 = vpop.f32.mrb[147].mxu0 }
 0xc8c   :  { %v4401_v55 = vpack.c.bf16 %v4183_v40, %v4180_v1  ;;  %v8398_v1 = vld [vmem:[%s10979_s4 + $0x20] sm:$0xff] }
 0xc8e   :  { %7660 = vmatmul.mubr.msk.bf16.vlgmr.msra.gmra.mrb[160].mxu0 %vm200_vm3, %v4370_v43 }
 0xc8f   :  { %7676 = vmatmul.mubr.msk.bf16.vlgmr.msra.gmra.mrb[136].mxu1 %vm200_vm3, %v4374_v49  ;;  %7663 = vmatprep.mubr.msk.bf16.mxu0 %vm200_vm3, %v11032_v58 }
 0xc90   :  { %7679 = vmatprep.mubr.msk.bf16.mxu1 %vm200_vm3, %v11033_v52  ;;  %7684 = vmatpush3.bf16.xpose.msra.mxu0 %v4693_v37  ;;  %v7609_v2 = vpop.f32.mrb[148].mxu0  ;;  %v8399_v37 = vld [vmem:[%s10979_s4 + $0x30] sm:$0xff]  ;;  %v8400_v52 = vld [vmem:[%s10979_s4 + $0x28] sm:$0xff] }
 0xc91   :  { %7700 = vmatpush3.bf16.msra.mxu1 %v10091_v29  ;;  %7940 = vmatprep.subr.msk.bf16.mxu0 %vm200_vm3, %v4394_v7  ;;  %v4196_v47 = vpop.f32.mrb[149].mxu0 }
 0xc92   :  { %7701 = vmatprep.subr.bf16.mxu1 %v10089_v12  ;;  %v7610_v14 = vpop.f32.mrb[150].mxu0 }
 0xc93   :  { %v4404_v45 = vpack.c.bf16 %v7610_v14, %v7609_v2  ;;  %v4199_v49 = vpop.f32.mrb[151].mxu0  ;;  %v8401_v14 = vld [vmem:[%s10979_s4 + $0x38] sm:$0xff] }
 0xc94   :  { %v4403_v43 = vpack.c.bf16 %v4199_v49, %v4196_v47 }
 0xc95   :  { %7702 = vmatpush3.bf16.msra.mxu1 %v10089_v12 }
 0xc96   :  { %7703 = vmatprep.subr.bf16.mxu1 %v10108_v61  ;;  %7664 = vmatmul.mubr.msk.bf16.gmra.mrb[164].mxu0 %vm200_vm3, %v11034_v62 }
 0xc97   :  { %7680 = vmatmul.mubr.msk.bf16.gmra.mrb[140].mxu1 %vm200_vm3, %v11035_v31  ;;  %7691 = vmatprep.mubr.msk.bf16.mxu0 %vm200_vm3, %v11036_v39 }
 0xc98   :  { %7686 = vmatpush3.bf16.xpose.msra.mxu0 %v4696_v60  ;;  %v7629_v29 = vpop.f32.mrb[152].mxu0 }
 0xc99   :  { %7704 = vmatpush3.bf16.msra.mxu1 %v10108_v61  ;;  %7941 = vmatprep.subr.msk.bf16.mxu0 %vm200_vm3, %v4395_v21  ;;  %v4334_v9 = vpop.f32.mrb[153].mxu0 }
 0xc9a   :  { %7705 = vmatprep.subr.bf16.mxu1 %v10106_v48  ;;  %v7630_v32 = vpop.f32.mrb[154].mxu0 }
 0xc9b   :  { %v10178_v12 = vpack.c.bf16 %v7630_v32, %v7629_v29  ;;  %v4337_v24 = vpop.f32.mrb[155].mxu0  ;;  %v8402_v29 = vld [vmem:[%s10979_s4 + $0x40] sm:$0xff] }
 0xc9c   :  { %v10180_v17 = vpack.c.bf16 %v4337_v24, %v4334_v9 }
 0xc9d   :  { %7706 = vmatpush3.bf16.msra.mxu1 %v10106_v48  ;;  %v11037_v48 = vpack.c.bf16 %v10063_v26, %v10058_v53 }
 0xc9e   :  { %7731 = vmatprep.subr.bf16.mxu1 %v10124_v59 }
 0xca0   :  { %7688 = vmatpush3.bf16.xpose.msra.mxu0 %v4699_v20  ;;  %v7633_v30 = vpop.f32.mrb[156].mxu0 }
 0xca1   :  { %7942 = vmatprep.subr.msk.bf16.mxu0 %vm200_vm3, %v4396_v54  ;;  %v4350_v61 = vpop.f32.mrb[157].mxu0 }
 0xca2   :  { %v7634_v7 = vpop.f32.mrb[158].mxu0 }
 0xca3   :  { %v10186_v51 = vpack.c.bf16 %v7634_v7, %v7633_v30  ;;  %v4353_v10 = vpop.f32.mrb[159].mxu0 }
 0xca4   :  { %v10188_v50 = vpack.c.bf16 %v4353_v10, %v4350_v61  ;;  %v8403_v61 = vld [vmem:[%s10979_s4 + $0x50] sm:$0xff]  ;;  %v8404_v10 = vld [vmem:[%s10979_s4 + $0x48] sm:$0xff] }
 0xca8   :  { %7690 = vmatpush3.bf16.xpose.msra.mxu0 %v4702_v22 }
 0xca9   :  { %7715 = vmatprep.subr.bf16.mxu0 %v4401_v55 }
 0xcaf   :  { %7692 = vmatmul.mubr.msk.bf16.vlgmr.msra.gmra.mrb[168].mxu0 %vm200_vm3, %v11037_v48 }
 0xcb0   :  { %7695 = vmatprep.mubr.msk.bf16.mxu0 %vm200_vm3, %v4379_v15  ;;  %7716 = vmatpush3.bf16.msra.mxu0 %v4401_v55 }
 0xcb1   :  { %7717 = vmatprep.subr.bf16.mxu0 %v4402_v41 }
 0xcb4   :  { %7718 = vmatpush3.bf16.msra.mxu0 %v4402_v41 }
 0xcb5   :  { %7719 = vmatprep.subr.bf16.mxu0 %v4403_v43 }
 0xcb7   :  { %7696 = vmatmul.mubr.msk.bf16.gmra.mrb[172].mxu0 %vm200_vm3, %v11038_v8 }
 0xcb8   :  { %7720 = vmatpush3.bf16.msra.mxu0 %v4403_v43 }
 0xcb9   :  { %7721 = vmatprep.subr.bf16.mxu0 %v4404_v45 }
 0xcbc   :  { %7722 = vmatpush3.bf16.msra.mxu0 %v4404_v45 }
 0xcbd   :  { %7747 = vmatprep.subr.bf16.mxu0 %v10180_v17 }
 0xd41   :  { %v7645_v53 = vpop.f32.mrb[128].mxu1 }
 0xd42   :  { %v4471_v26 = vpop.f32.mrb[129].mxu1  ;;  %v10212_v33 = vadd.f32 %v8395_v56, %v7645_v53  ;;  %v8405_v53 = vld [vmem:[%s10979_s4 + $0x58] sm:$0xff] }
 0xd43   :  { %v10207_v25 = vadd.f32 %v8394_v0, %v4471_v26  ;;  %v7646_v15 = vpop.f32.mrb[130].mxu1 }
 0xd44   :  { %v4474_v57 = vpop.f32.mrb[131].mxu1  ;;  %v10224_v27 = vadd.f32 %v8397_v38, %v7646_v15  ;;  %v4775_v63 = vsel %vm49_vm0, %v10212_v33, -inf }
 0xd45   :  { %v10217_v42 = vadd.f32 %v8396_v35, %v4474_v57  ;;  %v4769_v54 = vsel %vm49_vm0, %v10207_v25, -inf }
 0xd46   :  { %4770 = vmax.xlane.f32.xlu0 %v4769_v54  ;;  %v4778_v40 = vsel %vm49_vm0, %v10224_v27, -inf  ;;  %v8406_v54 = vld [vmem:[%s10979_s4 + $0x60] sm:$0xff] }
 0xd47   :  { %v4772_v21 = vsel %vm49_vm0, %v10217_v42, -inf }
 0xd48   :  { %4773 = vmax.xlane.f32.xlu1 %v4772_v21 }
 0xd49   :  { %v7649_v13 = vpop.f32.mrb[132].mxu1 }
 0xd4a   :  { %4776 = vmax.xlane.f32.xlu0 %v4775_v63  ;;  %v4487_v34 = vpop.f32.mrb[133].mxu1  ;;  %v10240_v58 = vadd.f32 %v8399_v37, %v7649_v13 }
 0xd4b   :  { %v10233_v36 = vadd.f32 %v8398_v1, %v4487_v34  ;;  %v7650_v41 = vpop.f32.mrb[134].mxu1 }
 0xd4c   :  { %4779 = vmax.xlane.f32.xlu1 %v4778_v40  ;;  %v4490_v55 = vpop.f32.mrb[135].mxu1  ;;  %v10252_v45 = vadd.f32 %v8401_v14, %v7650_v41  ;;  %v4787_v43 = vsel %vm49_vm0, %v10240_v58, -inf  ;;  %v8407_v41 = vld [vmem:[%s10979_s4 + $0x70] sm:$0xff]  ;;  %v8409_v14 = vld [vmem:[%s10979_s4 + $0x78] sm:$0xff] }
 0xd4d   :  { %v10245_v2 = vadd.f32 %v8400_v52, %v4490_v55  ;;  %v4781_v47 = vsel %vm49_vm0, %v10233_v36, -inf  ;;  %v8408_v55 = vld [vmem:[%s10979_s4 + $0x68] sm:$0xff] }
 0xd4e   :  { %4782 = vmax.xlane.f32.xlu0 %v4781_v47  ;;  %v4790_v62 = vsel %vm49_vm0, %v10252_v45, -inf }
 0xd4f   :  { %v4784_v49 = vsel %vm49_vm0, %v10245_v2, -inf }
 0xd50   :  { %4785 = vmax.xlane.f32.xlu1 %v4784_v49 }
 0xd52   :  { %4788 = vmax.xlane.f32.xlu0 %v4787_v43 }
 0xd54   :  { %4791 = vmax.xlane.f32.xlu1 %v4790_v62  ;;  %v8410_v62 = vld [vmem:[%s10979_s4 + $0x80] sm:$0xff] }
 0xd61   :  { %v7661_v60 = vpop.f32.mrb[160].mxu0 }
 0xd62   :  { %v7677_v31 = vpop.f32.mrb[136].mxu1  ;;  %v4560_v39 = vpop.f32.mrb[161].mxu0  ;;  %v10268_v7 = vadd.f32 %v8403_v61, %v7661_v60  ;;  %v8412_v61 = vld [vmem:[%s10979_s4 + $0x90] sm:$0xff] }
 0xd63   :  { %v10263_v9 = vadd.f32 %v8402_v29, %v4560_v39  ;;  %v4649_v32 = vpop.f32.mrb[137].mxu1  ;;  %v7662_v24 = vpop.f32.mrb[162].mxu0  ;;  %v8411_v29 = vld [vmem:[%s10979_s4 + $0x88] sm:$0xff] }
 0xd64   :  { %v7678_v20 = vpop.f32.mrb[138].mxu1  ;;  %v4563_v30 = vpop.f32.mrb[163].mxu0  ;;  %v10280_v26 = vadd.f32 %v8405_v53, %v7662_v24  ;;  %v4799_v57 = vsel %vm49_vm0, %v10268_v7, -inf  ;;  %v10315_v60 = vadd.f32 %v8410_v62, %v4649_v32  ;;  %v10329_v32 = vadd.f32 %v8412_v61, %v7677_v31 }
 0xd65   :  { %v10273_v22 = vadd.f32 %v8404_v10, %v4563_v30  ;;  %v4652_v48 = vpop.f32.mrb[139].mxu1  ;;  %v4793_v8 = vsel %vm49_vm0, %v10263_v9, -inf }
 0xd66   :  { %4794 = vmax.xlane.f32.xlu0 %v4793_v8  ;;  %v4802_v63 = vsel %vm49_vm0, %v10280_v26, -inf  ;;  %v10322_v24 = vadd.f32 %v8411_v29, %v4652_v48  ;;  %v4817_v10 = vsel %vm49_vm0, %v10315_v60, -inf  ;;  %v8413_v8 = vld [vmem:[%s10979_s4 + $0x98] sm:$0xff] }
 0xd67   :  { %v4796_v0 = vsel %vm49_vm0, %v10273_v22, -inf  ;;  %v10336_v48 = vadd.f32 %v8413_v8, %v7678_v20  ;;  %v8421_v8 = vld [vmem:[%s10979_s4 + $0xd8] sm:$0xff] }
 0xd68   :  { %4797 = vmax.xlane.f32.xlu1 %v4796_v0  ;;  %v4820_v53 = vsel %vm49_vm0, %v10322_v24, -inf  ;;  %v8414_v0 = vld [vmem:[%s10979_s4 + $0xa0] sm:$0xff] }
 0xd69   :  { %v7665_v15 = vpop.f32.mrb[164].mxu0 }
 0xd6a   :  { %v7681_v56 = vpop.f32.mrb[140].mxu1  ;;  %v4576_v35 = vpop.f32.mrb[165].mxu0  ;;  %4800 = vmax.xlane.f32.xlu0 %v4799_v57  ;;  %v10296_v40 = vadd.f32 %v8407_v41, %v7665_v15  ;;  %v4823_v15 = vsel %vm49_vm0, %v10329_v32, -inf  ;;  %v8415_v57 = vld [vmem:[%s10979_s4 + $0xa8] sm:$0xff] }
 0xd6b   :  { %v10289_v38 = vadd.f32 %v8406_v54, %v4576_v35  ;;  %v4665_v21 = vpop.f32.mrb[141].mxu1  ;;  %v7666_v13 = vpop.f32.mrb[166].mxu0  ;;  %v4826_v35 = vsel %vm49_vm0, %v10336_v48, -inf  ;;  %v8416_v54 = vld [vmem:[%s10979_s4 + $0xb0] sm:$0xff] }
 0xd6c   :  { %v7682_v34 = vpop.f32.mrb[142].mxu1  ;;  %v4579_v1 = vpop.f32.mrb[167].mxu0  ;;  %4803 = vmax.xlane.f32.xlu1 %v4802_v63  ;;  %v10308_v49 = vadd.f32 %v8409_v14, %v7666_v13  ;;  %v4811_v39 = vsel %vm49_vm0, %v10296_v40, -inf  ;;  %v10343_v31 = vadd.f32 %v8414_v0, %v4665_v21  ;;  %v10357_v21 = vadd.f32 %v8416_v54, %v7681_v56  ;;  %v8417_v63 = vld [vmem:[%s10979_s4 + $0xb8] sm:$0xff]  ;;  %v8418_v14 = vld [vmem:[%s10979_s4 + $0xc0] sm:$0xff] }
 0xd6d   :  { %v10301_v37 = vadd.f32 %v8408_v55, %v4579_v1  ;;  %v4668_v52 = vpop.f32.mrb[143].mxu1  ;;  %v4805_v47 = vsel %vm49_vm0, %v10289_v38, -inf  ;;  %v10364_v1 = vadd.f32 %v8417_v63, %v7682_v34  ;;  %v8422_v54 = vld [vmem:[%s10979_s4 + $0xe0] sm:$0xff] }
 0xd6e   :  { %4806 = vmax.xlane.f32.xlu0 %v4805_v47  ;;  %v4814_v30 = vsel %vm49_vm0, %v10308_v49, -inf  ;;  %v10350_v20 = vadd.f32 %v8415_v57, %v4668_v52  ;;  %v4829_v13 = vsel %vm49_vm0, %v10343_v31, -inf  ;;  %v4835_v55 = vsel %vm49_vm0, %v10357_v21, -inf }
 0xd6f   :  { %v4808_v43 = vsel %vm49_vm0, %v10301_v37, -inf  ;;  %v4838_v47 = vsel %vm49_vm0, %v10364_v1, -inf }
 0xd70   :  { %4809 = vmax.xlane.f32.xlu1 %v4808_v43  ;;  %v4832_v41 = vsel %vm49_vm0, %v10350_v20, -inf }
 0xd72   :  { %4812 = vmax.xlane.f32.xlu0 %v4811_v39  ;;  %v8419_v39 = vld [vmem:[%s10979_s4 + $0xd0] sm:$0xff] }
 0xd74   :  { %4815 = vmax.xlane.f32.xlu1 %v4814_v30  ;;  %v8420_v30 = vld [vmem:[%s10979_s4 + $0xc8] sm:$0xff] }
 0xd76   :  { %4818 = vmax.xlane.f32.xlu0 %v4817_v10 }
 0xd78   :  { %4821 = vmax.xlane.f32.xlu1 %v4820_v53 }
 0xd7a   :  { %4824 = vmax.xlane.f32.xlu0 %v4823_v15 }
 0xd7c   :  { %4827 = vmax.xlane.f32.xlu1 %v4826_v35 }
 0xd7e   :  { %4830 = vmax.xlane.f32.xlu0 %v4829_v13 }
 0xd80   :  { %4833 = vmax.xlane.f32.xlu1 %v4832_v41 }
 0xd82   :  { %v7693_v52 = vpop.f32.mrb[168].mxu0  ;;  %4836 = vmax.xlane.f32.xlu0 %v4835_v55 }
 0xd83   :  { %v4738_v56 = vpop.f32.mrb[169].mxu0  ;;  %v10380_v29 = vadd.f32 %v8419_v39, %v7693_v52  ;;  %v8423_v52 = vld [vmem:[%s10979_s4 + $0xf0] sm:$0xff] }
 0xd84   :  { %v10375_v43 = vadd.f32 %v8418_v14, %v4738_v56  ;;  %v7694_v34 = vpop.f32.mrb[170].mxu0  ;;  %4839 = vmax.xlane.f32.xlu1 %v4838_v47  ;;  %v8424_v47 = vld [vmem:[%s10979_s4 + $0xe8] sm:$0xff] }
 0xd85   :  { %v4741_v62 = vpop.f32.mrb[171].mxu0  ;;  %v10392_v53 = vadd.f32 %v8421_v8, %v7694_v34  ;;  %v4847_v57 = vsel %vm49_vm0, %v10380_v29, -inf }
 0xd86   :  { %v10385_v61 = vadd.f32 %v8420_v30, %v4741_v62  ;;  %v4841_v10 = vsel %vm49_vm0, %v10375_v43, -inf  ;;  %v8425_v62 = vld [vmem:[%s10979_s4 + $0xf8] sm:$0xff] }
 0xd87   :  { %4842 = vmax.xlane.f32.xlu0 %v4841_v10  ;;  %v4850_v41 = vsel %vm49_vm0, %v10392_v53, -inf }
 0xd88   :  { %v4844_v0 = vsel %vm49_vm0, %v10385_v61, -inf }
 0xd89   :  { %4845 = vmax.xlane.f32.xlu1 %v4844_v0 }
 0xd8a   :  { %v7697_v15 = vpop.f32.mrb[172].mxu0 }
 0xd8b   :  { %v4754_v35 = vpop.f32.mrb[173].mxu0  ;;  %4848 = vmax.xlane.f32.xlu0 %v4847_v57  ;;  %v10408_v56 = vadd.f32 %v8423_v52, %v7697_v15 }
 0xd8c   :  { %v10401_v13 = vadd.f32 %v8422_v54, %v4754_v35  ;;  %v7698_v63 = vpop.f32.mrb[174].mxu0 }
 0xd8d   :  { %v4757_v55 = vpop.f32.mrb[175].mxu0  ;;  %4851 = vmax.xlane.f32.xlu1 %v4850_v41  ;;  %v10420_v39 = vadd.f32 %v8425_v62, %v7698_v63  ;;  %v4859_v10 = vsel %vm49_vm0, %v10408_v56, -inf }
 0xd8e   :  { %v10413_v14 = vadd.f32 %v8424_v47, %v4757_v55  ;;  %v4853_v34 = vsel %vm49_vm0, %v10401_v13, -inf }
 0xd8f   :  { %4854 = vmax.xlane.f32.xlu0 %v4853_v34  ;;  %v4862_v8 = vsel %vm49_vm0, %v10420_v39, -inf }
 0xd90   :  { %v4856_v30 = vsel %vm49_vm0, %v10413_v14, -inf }
 0xd91   :  { %4857 = vmax.xlane.f32.xlu1 %v4856_v30 }
 0xd93   :  { %4860 = vmax.xlane.f32.xlu0 %v4859_v10 }
 0xd95   :  { %4863 = vmax.xlane.f32.xlu1 %v4862_v8 }
 0xdd3   :  { %v4771_v0 = vpop.xlane.xlu0 %4770 }
 0xdd4   :  { %v4865_v15 = vsub.f32 %v10207_v25, %v4771_v0 }
 0xdd5   :  { %v4774_v57 = vpop.xlane.xlu1 %4773 }
 0xdd6   :  { %v4897_v35 = vmul.f32 1.442695, %v4865_v15  ;;  %v4866_v54 = vsub.f32 %v10217_v42, %v4774_v57 }
 0xdd7   :  { %v4777_v63 = vpop.xlane.xlu0 %4776 }
 0xdd8   :  { %8218 = vpow2.f32 %v4897_v35  ;;  %v4899_v41 = vmul.f32 1.442695, %v4866_v54  ;;  %v4867_v55 = vsub.f32 %v10212_v33, %v4777_v63 }
 0xdd9   :  { %v4780_v52 = vpop.xlane.xlu1 %4779 }
 0xdda   :  { %8220 = vpow2.f32 %v4899_v41  ;;  %v4901_v47 = vmul.f32 1.442695, %v4867_v55  ;;  %v4868_v34 = vsub.f32 %v10224_v27, %v4780_v52 }
 0xddb   :  { %v4783_v62 = vpop.xlane.xlu0 %4782 }
 0xddc   :  { %8222 = vpow2.f32 %v4901_v47  ;;  %v4903_v30 = vmul.f32 1.442695, %v4868_v34  ;;  %v4869_v10 = vsub.f32 %v10233_v36, %v4783_v62 }
 0xddd   :  { %v4786_v25 = vpop.xlane.xlu1 %4785 }
 0xdde   :  { %8224 = vpow2.f32 %v4903_v30  ;;  %v4905_v8 = vmul.f32 1.442695, %v4869_v10  ;;  %v4870_v42 = vsub.f32 %v10245_v2, %v4786_v25 }
 0xddf   :  { %v4789_v0 = vpop.xlane.xlu0 %4788 }
 0xde0   :  { %8226 = vpow2.f32 %v4905_v8  ;;  %v4907_v15 = vmul.f32 1.442695, %v4870_v42  ;;  %v4871_v33 = vsub.f32 %v10240_v58, %v4789_v0 }
 0xde1   :  { %v4792_v57 = vpop.xlane.xlu1 %4791 }
 0xde2   :  { %v10435_v35 = vpop.eup %8218  ;;  %8228 = vpow2.f32 %v4907_v15  ;;  %v4909_v27 = vmul.f32 1.442695, %v4871_v33  ;;  %v4872_v54 = vsub.f32 %v10252_v45, %v4792_v57 }
 0xde3   :  { %v4961_v36 = vsel %vm49_vm0, %v10435_v35, 0.0 }
 0xde4   :  { %v10440_v63 = vpop.eup %8220  ;;  %8230 = vpow2.f32 %v4909_v27  ;;  %v4911_v41 = vmul.f32 1.442695, %v4872_v54  ;;  %4962 = vadd.xlane.f32.xlu0 %v4961_v36 }
 0xde5   :  { %v4964_v2 = vsel %vm49_vm0, %v10440_v63, 0.0 }
 0xde6   :  { %v10444_v55 = vpop.eup %8222  ;;  %8232 = vpow2.f32 %v4911_v41  ;;  %4965 = vadd.xlane.f32.xlu1 %v4964_v2 }
 0xde7   :  { %v4967_v58 = vsel %vm49_vm0, %v10444_v55, 0.0 }
 0xde8   :  { %v10448_v52 = vpop.eup %8224  ;;  %4968 = vadd.xlane.f32.xlu0 %v4967_v58 }
 0xde9   :  { %v4970_v45 = vsel %vm49_vm0, %v10448_v52, 0.0 }
 0xdea   :  { %v10452_v47 = vpop.eup %8226  ;;  %4971 = vadd.xlane.f32.xlu1 %v4970_v45 }
 0xdeb   :  { %v4973_v34 = vsel %vm49_vm0, %v10452_v47, 0.0 }
 0xdec   :  { %v10456_v62 = vpop.eup %8228  ;;  %4974 = vadd.xlane.f32.xlu0 %v4973_v34 }
 0xded   :  { %v4976_v30 = vsel %vm49_vm0, %v10456_v62, 0.0 }
 0xdee   :  { %v10460_v10 = vpop.eup %8230  ;;  %4977 = vadd.xlane.f32.xlu1 %v4976_v30 }
 0xdef   :  { %v4979_v25 = vsel %vm49_vm0, %v10460_v10, 0.0 }
 0xdf0   :  { %v10464_v8 = vpop.eup %8232  ;;  %4980 = vadd.xlane.f32.xlu0 %v4979_v25 }
 0xdf1   :  { %v4982_v42 = vsel %vm49_vm0, %v10464_v8, 0.0 }
 0xdf2   :  { %4983 = vadd.xlane.f32.xlu1 %v4982_v42 }
 0xdf3   :  { %v4795_v0 = vpop.xlane.xlu0 %4794 }
 0xdf4   :  { %v4873_v15 = vsub.f32 %v10263_v9, %v4795_v0 }
 0xdf5   :  { %v4798_v33 = vpop.xlane.xlu1 %4797 }
 0xdf6   :  { %v4913_v57 = vmul.f32 1.442695, %v4873_v15  ;;  %v4874_v27 = vsub.f32 %v10273_v22, %v4798_v33 }
 0xdf7   :  { %v4801_v54 = vpop.xlane.xlu0 %4800 }
 0xdf8   :  { %8234 = vpow2.f32 %v4913_v57  ;;  %v4915_v36 = vmul.f32 1.442695, %v4874_v27  ;;  %v4875_v41 = vsub.f32 %v10268_v7, %v4801_v54 }
 0xdf9   :  { %v4804_v2 = vpop.xlane.xlu1 %4803 }
 0xdfa   :  { %8236 = vpow2.f32 %v4915_v36  ;;  %v4917_v58 = vmul.f32 1.442695, %v4875_v41  ;;  %v4876_v45 = vsub.f32 %v10280_v26, %v4804_v2 }
 0xdfb   :  { %v4807_v34 = vpop.xlane.xlu0 %4806 }
 0xdfc   :  { %8238 = vpow2.f32 %v4917_v58  ;;  %v4919_v30 = vmul.f32 1.442695, %v4876_v45  ;;  %v4877_v25 = vsub.f32 %v10289_v38, %v4807_v34 }
 0xdfd   :  { %v4810_v9 = vpop.xlane.xlu1 %4809 }
 0xdfe   :  { %8240 = vpow2.f32 %v4919_v30  ;;  %v4921_v42 = vmul.f32 1.442695, %v4877_v25  ;;  %v4878_v22 = vsub.f32 %v10301_v37, %v4810_v9 }
 0xdff   :  { %v4813_v0 = vpop.xlane.xlu0 %4812 }
 0xe00   :  { %8242 = vpow2.f32 %v4921_v42  ;;  %v4923_v15 = vmul.f32 1.442695, %v4878_v22  ;;  %v4879_v7 = vsub.f32 %v10296_v40, %v4813_v0 }
 0xe01   :  { %v4816_v33 = vpop.xlane.xlu1 %4815 }
 0xe02   :  { %v10475_v57 = vpop.eup %8234  ;;  %8244 = vpow2.f32 %v4923_v15  ;;  %v4925_v26 = vmul.f32 1.442695, %v4879_v7  ;;  %v4880_v27 = vsub.f32 %v10308_v49, %v4816_v33 }
 0xe03   :  { %v4819_v54 = vpop.xlane.xlu0 %4818  ;;  %v4985_v38 = vsel %vm49_vm0, %v10475_v57, 0.0 }
 0xe04   :  { %v10480_v36 = vpop.eup %8236  ;;  %8246 = vpow2.f32 %v4925_v26  ;;  %v4927_v37 = vmul.f32 1.442695, %v4880_v27  ;;  %v4881_v41 = vsub.f32 %v10315_v60, %v4819_v54  ;;  %4986 = vadd.xlane.f32.xlu0 %v4985_v38 }
 0xe05   :  { %v4822_v2 = vpop.xlane.xlu1 %4821  ;;  %v4988_v40 = vsel %vm49_vm0, %v10480_v36, 0.0 }
 0xe06   :  { %v10485_v58 = vpop.eup %8238  ;;  %8248 = vpow2.f32 %v4927_v37  ;;  %v4929_v45 = vmul.f32 1.442695, %v4881_v41  ;;  %v4882_v49 = vsub.f32 %v10322_v24, %v4822_v2  ;;  %4989 = vadd.xlane.f32.xlu1 %v4988_v40 }
 0xe07   :  { %v4825_v34 = vpop.xlane.xlu0 %4824  ;;  %v4991_v30 = vsel %vm49_vm0, %v10485_v58, 0.0 }
 0xe08   :  { %v10490_v25 = vpop.eup %8240  ;;  %8250 = vpow2.f32 %v4929_v45  ;;  %v4931_v60 = vmul.f32 1.442695, %v4882_v49  ;;  %v4883_v9 = vsub.f32 %v10329_v32, %v4825_v34  ;;  %4992 = vadd.xlane.f32.xlu0 %v4991_v30 }
 0xe09   :  { %v4828_v42 = vpop.xlane.xlu1 %4827  ;;  %v4994_v22 = vsel %vm49_vm0, %v10490_v25, 0.0 }
 0xe0a   :  { %v10495_v0 = vpop.eup %8242  ;;  %8252 = vpow2.f32 %v4931_v60  ;;  %v4933_v24 = vmul.f32 1.442695, %v4883_v9  ;;  %v4884_v15 = vsub.f32 %v10336_v48, %v4828_v42  ;;  %4995 = vadd.xlane.f32.xlu1 %v4994_v22 }
 0xe0b   :  { %v4831_v7 = vpop.xlane.xlu0 %4830  ;;  %v4997_v33 = vsel %vm49_vm0, %v10495_v0, 0.0 }
 0xe0c   :  { %v10500_v26 = vpop.eup %8244  ;;  %8254 = vpow2.f32 %v4933_v24  ;;  %v4935_v32 = vmul.f32 1.442695, %v4884_v15  ;;  %v4885_v27 = vsub.f32 %v10343_v31, %v4831_v7  ;;  %4998 = vadd.xlane.f32.xlu0 %v4997_v33 }
 0xe0d   :  { %v4834_v54 = vpop.xlane.xlu1 %4833  ;;  %v5000_v38 = vsel %vm49_vm0, %v10500_v26, 0.0 }
 0xe0e   :  { %v10505_v37 = vpop.eup %8246  ;;  %8256 = vpow2.f32 %v4935_v32  ;;  %v4937_v48 = vmul.f32 1.442695, %v4885_v27  ;;  %v4886_v41 = vsub.f32 %v10350_v20, %v4834_v54  ;;  %5001 = vadd.xlane.f32.xlu1 %v5000_v38 }
 0xe0f   :  { %v4837_v2 = vpop.xlane.xlu0 %4836  ;;  %v5003_v40 = vsel %vm49_vm0, %v10505_v37, 0.0 }
 0xe10   :  { %v10510_v45 = vpop.eup %8248  ;;  %8258 = vpow2.f32 %v4937_v48  ;;  %v4939_v31 = vmul.f32 1.442695, %v4886_v41  ;;  %v4887_v49 = vsub.f32 %v10357_v21, %v4837_v2  ;;  %5004 = vadd.xlane.f32.xlu0 %v5003_v40 }
 0xe11   :  { %v4840_v34 = vpop.xlane.xlu1 %4839  ;;  %v5006_v30 = vsel %vm49_vm0, %v10510_v45, 0.0 }
 0xe12   :  { %v10515_v60 = vpop.eup %8250  ;;  %8260 = vpow2.f32 %v4939_v31  ;;  %v4941_v20 = vmul.f32 1.442695, %v4887_v49  ;;  %v4888_v9 = vsub.f32 %v10364_v1, %v4840_v34  ;;  %5007 = vadd.xlane.f32.xlu1 %v5006_v30 }
 0xe13   :  { %v5009_v42 = vsel %vm49_vm0, %v10515_v60, 0.0 }
 0xe14   :  { %v10520_v22 = vpop.eup %8252  ;;  %8262 = vpow2.f32 %v4941_v20  ;;  %v4943_v24 = vmul.f32 1.442695, %v4888_v9  ;;  %v4843_v21 = vpop.xlane.xlu0 %4842  ;;  %5010 = vadd.xlane.f32.xlu0 %v5009_v42 }
 0xe15   :  { %v4889_v15 = vsub.f32 %v10375_v43, %v4843_v21  ;;  %v5012_v7 = vsel %vm49_vm0, %v10520_v22, 0.0 }
 0xe16   :  { %v10525_v33 = vpop.eup %8254  ;;  %8264 = vpow2.f32 %v4943_v24  ;;  %v4846_v32 = vpop.xlane.xlu1 %4845  ;;  %5013 = vadd.xlane.f32.xlu1 %v5012_v7 }
 0xe17   :  { %v4945_v1 = vmul.f32 1.442695, %v4889_v15  ;;  %v4890_v27 = vsub.f32 %v10385_v61, %v4846_v32  ;;  %v5015_v54 = vsel %vm49_vm0, %v10525_v33, 0.0 }
 0xe18   :  { %v10530_v38 = vpop.eup %8256  ;;  %v4849_v48 = vpop.xlane.xlu0 %4848  ;;  %5016 = vadd.xlane.f32.xlu0 %v5015_v54 }
 0xe19   :  { %8266 = vpow2.f32 %v4945_v1  ;;  %v4947_v43 = vmul.f32 1.442695, %v4890_v27  ;;  %v4891_v41 = vsub.f32 %v10380_v29, %v4849_v48  ;;  %v5018_v2 = vsel %vm49_vm0, %v10530_v38, 0.0 }
 0xe1a   :  { %v10535_v40 = vpop.eup %8258  ;;  %v4852_v31 = vpop.xlane.xlu1 %4851  ;;  %5019 = vadd.xlane.f32.xlu1 %v5018_v2 }
 0xe1b   :  { %8268 = vpow2.f32 %v4947_v43  ;;  %v4949_v61 = vmul.f32 1.442695, %v4891_v41  ;;  %v4892_v49 = vsub.f32 %v10392_v53, %v4852_v31  ;;  %v5021_v34 = vsel %vm49_vm0, %v10535_v40, 0.0 }
 0xe1c   :  { %v10540_v30 = vpop.eup %8260  ;;  %v4855_v20 = vpop.xlane.xlu0 %4854  ;;  %5022 = vadd.xlane.f32.xlu0 %v5021_v34 }
 0xe1d   :  { %8270 = vpow2.f32 %v4949_v61  ;;  %v4951_v29 = vmul.f32 1.442695, %v4892_v49  ;;  %v4893_v9 = vsub.f32 %v10401_v13, %v4855_v20  ;;  %v5024_v42 = vsel %vm49_vm0, %v10540_v30, 0.0 }
 0xe1e   :  { %v10545_v24 = vpop.eup %8262  ;;  %v4858_v21 = vpop.xlane.xlu1 %4857  ;;  %5025 = vadd.xlane.f32.xlu1 %v5024_v42 }
 0xe1f   :  { %8272 = vpow2.f32 %v4951_v29  ;;  %v4953_v53 = vmul.f32 1.442695, %v4893_v9  ;;  %v4894_v15 = vsub.f32 %v10413_v14, %v4858_v21  ;;  %v5027_v7 = vsel %vm49_vm0, %v10545_v24, 0.0 }
 0xe20   :  { %v10550_v32 = vpop.eup %8264  ;;  %v4861_v1 = vpop.xlane.xlu0 %4860  ;;  %5028 = vadd.xlane.f32.xlu0 %v5027_v7 }
 0xe21   :  { %8274 = vpow2.f32 %v4953_v53  ;;  %v4955_v13 = vmul.f32 1.442695, %v4894_v15  ;;  %v4895_v27 = vsub.f32 %v10408_v56, %v4861_v1  ;;  %v5030_v54 = vsel %vm49_vm0, %v10550_v32, 0.0 }
 0xe22   :  { %v4864_v48 = vpop.xlane.xlu1 %4863  ;;  %5031 = vadd.xlane.f32.xlu1 %v5030_v54 }
 0xe23   :  { %v10555_v43 = vpop.eup %8266  ;;  %8276 = vpow2.f32 %v4955_v13  ;;  %v4957_v14 = vmul.f32 1.442695, %v4895_v27  ;;  %v4896_v41 = vsub.f32 %v10420_v39, %v4864_v48 }
 0xe24   :  { %v5033_v2 = vsel %vm49_vm0, %v10555_v43, 0.0 }
 0xe25   :  { %v10560_v31 = vpop.eup %8268  ;;  %8278 = vpow2.f32 %v4957_v14  ;;  %v4959_v61 = vmul.f32 1.442695, %v4896_v41  ;;  %5034 = vadd.xlane.f32.xlu0 %v5033_v2 }
 0xe26   :  { %v5036_v56 = vsel %vm49_vm0, %v10560_v31, 0.0 }
 0xe27   :  { %v10564_v49 = vpop.eup %8270  ;;  %8280 = vpow2.f32 %v4959_v61  ;;  %5037 = vadd.xlane.f32.xlu1 %v5036_v56 }
 0xe28   :  { %v5039_v34 = vsel %vm49_vm0, %v10564_v49, 0.0 }
 0xe29   :  { %v10568_v20 = vpop.eup %8272  ;;  %5040 = vadd.xlane.f32.xlu0 %v5039_v34 }
 0xe2a   :  { %v5042_v39 = vsel %vm49_vm0, %v10568_v20, 0.0 }
 0xe2b   :  { %v10572_v29 = vpop.eup %8274  ;;  %5043 = vadd.xlane.f32.xlu1 %v5042_v39 }
 0xe2c   :  { %v5045_v9 = vsel %vm49_vm0, %v10572_v29, 0.0 }
 0xe2d   :  { %v10576_v42 = vpop.eup %8276  ;;  %5046 = vadd.xlane.f32.xlu0 %v5045_v9 }
 0xe2e   :  { %v5048_v21 = vsel %vm49_vm0, %v10576_v42, 0.0 }
 0xe2f   :  { %v10580_v53 = vpop.eup %8278  ;;  %5049 = vadd.xlane.f32.xlu1 %v5048_v21 }
 0xe30   :  { %v5051_v15 = vsel %vm49_vm0, %v10580_v53, 0.0 }
 0xe31   :  { %v10584_v7 = vpop.eup %8280  ;;  %5052 = vadd.xlane.f32.xlu0 %v5051_v15 }
 0xe32   :  { %v5054_v1 = vsel %vm49_vm0, %v10584_v7, 0.0 }
 0xe33   :  { %5055 = vadd.xlane.f32.xlu1 %v5054_v1 }
 0xe71   :  { %v4963_v13 = vpop.xlane.xlu0 %4962 }
 0xe72   :  { %8282 = vrcp.f32 %v4963_v13 }
 0xe73   :  { %v4966_v27 = vpop.xlane.xlu1 %4965 }
 0xe74   :  { %8284 = vrcp.f32 %v4966_v27 }
 0xe75   :  { %v4969_v54 = vpop.xlane.xlu0 %4968 }
 0xe76   :  { %8286 = vrcp.f32 %v4969_v54 }
 0xe77   :  { %v4972_v48 = vpop.xlane.xlu1 %4971 }
 0xe78   :  { %8288 = vrcp.f32 %v4972_v48 }
 0xe79   :  { %v4975_v14 = vpop.xlane.xlu0 %4974 }
 0xe7a   :  { %8290 = vrcp.f32 %v4975_v14 }
 0xe7b   :  { %v4978_v41 = vpop.xlane.xlu1 %4977 }
 0xe7c   :  { %v8283_v2 = vpop.eup %8282  ;;  %8292 = vrcp.f32 %v4978_v41 }
 0xe7d   :  { %v4981_v61 = vpop.xlane.xlu0 %4980  ;;  %v5089_v39 = vmul.f32 %v8283_v2, %v10435_v35 }
 0xe7e   :  { %v8285_v56 = vpop.eup %8284  ;;  %8294 = vrcp.f32 %v4981_v61 }
 0xe7f   :  { %v4984_v34 = vpop.xlane.xlu1 %4983  ;;  %v5090_v9 = vmul.f32 %v8285_v56, %v10440_v63 }
 0xe80   :  { %v8287_v21 = vpop.eup %8286  ;;  %8296 = vrcp.f32 %v4984_v34 }
 0xe81   :  { %v5121_v15 = vpack.c.bf16 %v5090_v9, %v5089_v39  ;;  %v5091_v13 = vmul.f32 %v8287_v21, %v10444_v55 }
 0xe82   :  { %v8289_v1 = vpop.eup %8288 }
 0xe83   :  { %v5092_v27 = vmul.f32 %v8289_v1, %v10448_v52  ;;  %7707 = vmatprep.mubr.msk.bf16.mxu1 %vm49_vm0, %v5121_v15 }
 0xe84   :  { %v8291_v54 = vpop.eup %8290 }
 0xe85   :  { %v5122_v48 = vpack.c.bf16 %v5092_v27, %v5091_v13  ;;  %v5093_v41 = vmul.f32 %v8291_v54, %v10452_v47 }
 0xe86   :  { %v8293_v14 = vpop.eup %8292 }
 0xe87   :  { %7708 = vmatmul.mubr.msk.bf16.vlgmr.msra.gmra.mrb[144].mxu1 %vm49_vm0, %v5122_v48  ;;  %v5094_v35 = vmul.f32 %v8293_v14, %v10456_v62 }
 0xe88   :  { %v8295_v63 = vpop.eup %8294  ;;  %7732 = vmatpush3.bf16.msra.mxu1 %v10124_v59 }
 0xe89   :  { %7733 = vmatprep.subr.bf16.mxu1 %v10122_v18  ;;  %v5123_v2 = vpack.c.bf16 %v5094_v35, %v5093_v41  ;;  %v5095_v52 = vmul.f32 %v8295_v63, %v10460_v10 }
 0xe8a   :  { %v8297_v55 = vpop.eup %8296 }
 0xe8b   :  { %7711 = vmatprep.mubr.msk.bf16.mxu1 %vm49_vm0, %v5123_v2  ;;  %v5096_v61 = vmul.f32 %v8297_v55, %v10464_v8 }
 0xe8c   :  { %7734 = vmatpush3.bf16.msra.mxu1 %v10122_v18 }
 0xe8d   :  { %7735 = vmatprep.subr.bf16.mxu1 %v10133_v28  ;;  %v5124_v47 = vpack.c.bf16 %v5096_v61, %v5095_v52 }
 0xe8f   :  { %7712 = vmatmul.mubr.msk.bf16.gmra.mrb[148].mxu1 %vm49_vm0, %v5124_v47 }
 0xe90   :  { %7736 = vmatpush3.bf16.msra.mxu1 %v10133_v28 }
 0xe91   :  { %7737 = vmatprep.subr.bf16.mxu1 %v10131_v16  ;;  %v4987_v59 = vpop.xlane.xlu0 %4986 }
 0xe92   :  { %8298 = vrcp.f32 %v4987_v59 }
 0xe93   :  { %v4990_v62 = vpop.xlane.xlu1 %4989 }
 0xe94   :  { %8300 = vrcp.f32 %v4990_v62  ;;  %7738 = vmatpush3.bf16.msra.mxu1 %v10131_v16 }
 0xe95   :  { %v4993_v10 = vpop.xlane.xlu0 %4992 }
 0xe96   :  { %8302 = vrcp.f32 %v4993_v10 }
 0xe97   :  { %v4996_v8 = vpop.xlane.xlu1 %4995 }
 0xe98   :  { %8304 = vrcp.f32 %v4996_v8 }
 0xe99   :  { %v4999_v18 = vpop.xlane.xlu0 %4998 }
 0xe9a   :  { %8306 = vrcp.f32 %v4999_v18 }
 0xe9b   :  { %v5002_v56 = vpop.xlane.xlu1 %5001 }
 0xe9c   :  { %v8299_v34 = vpop.eup %8298  ;;  %8308 = vrcp.f32 %v5002_v56 }
 0xe9d   :  { %v5005_v39 = vpop.xlane.xlu0 %5004  ;;  %v5097_v21 = vmul.f32 %v8299_v34, %v10475_v57 }
 0xe9e   :  { %v8301_v9 = vpop.eup %8300  ;;  %8310 = vrcp.f32 %v5005_v39 }
 0xe9f   :  { %v5008_v28 = vpop.xlane.xlu1 %5007  ;;  %v5098_v15 = vmul.f32 %v8301_v9, %v10480_v36 }
 0xea0   :  { %v8303_v1 = vpop.eup %8302  ;;  %8312 = vrcp.f32 %v5008_v28 }
 0xea1   :  { %v5011_v16 = vpop.xlane.xlu0 %5010  ;;  %v5125_v13 = vpack.c.bf16 %v5098_v15, %v5097_v21  ;;  %v5099_v54 = vmul.f32 %v8303_v1, %v10485_v58 }
 0xea2   :  { %v8305_v27 = vpop.eup %8304  ;;  %8314 = vrcp.f32 %v5011_v16 }
 0xea3   :  { %v5100_v48 = vmul.f32 %v8305_v27, %v10490_v25  ;;  %v5014_v14 = vpop.xlane.xlu1 %5013  ;;  %7723 = vmatprep.mubr.msk.bf16.mxu0 %vm49_vm0, %v5125_v13 }
 0xea4   :  { %v8307_v41 = vpop.eup %8306  ;;  %8316 = vrcp.f32 %v5014_v14 }
 0xea5   :  { %v5126_v35 = vpack.c.bf16 %v5100_v48, %v5099_v54  ;;  %v5017_v63 = vpop.xlane.xlu0 %5016  ;;  %v5101_v2 = vmul.f32 %v8307_v41, %v10495_v0 }
 0xea6   :  { %v8309_v57 = vpop.eup %8308  ;;  %8318 = vrcp.f32 %v5017_v63 }
 0xea7   :  { %v5020_v36 = vpop.xlane.xlu1 %5019  ;;  %7724 = vmatmul.mubr.msk.bf16.vlgmr.msra.gmra.mrb[176].mxu0 %vm49_vm0, %v5126_v35  ;;  %v5102_v55 = vmul.f32 %v8309_v57, %v10500_v26 }
 0xea8   :  { %v8311_v52 = vpop.eup %8310  ;;  %8320 = vrcp.f32 %v5020_v36  ;;  %7748 = vmatpush3.bf16.msra.mxu0 %v10180_v17 }
 0xea9   :  { %7749 = vmatprep.subr.bf16.mxu0 %v10178_v12  ;;  %v5023_v58 = vpop.xlane.xlu0 %5022  ;;  %v5127_v25 = vpack.c.bf16 %v5102_v55, %v5101_v2  ;;  %v5103_v59 = vmul.f32 %v8311_v52, %v10505_v37 }
 0xeaa   :  { %v8313_v61 = vpop.eup %8312  ;;  %8322 = vrcp.f32 %v5023_v58 }
 0xeab   :  { %v5026_v47 = vpop.xlane.xlu1 %5025  ;;  %7727 = vmatprep.mubr.msk.bf16.mxu0 %vm49_vm0, %v5127_v25  ;;  %v5104_v62 = vmul.f32 %v8313_v61, %v10510_v45 }
 0xeac   :  { %v8315_v0 = vpop.eup %8314  ;;  %8324 = vrcp.f32 %v5026_v47  ;;  %7750 = vmatpush3.bf16.msra.mxu0 %v10178_v12 }
 0xead   :  { %7751 = vmatprep.subr.bf16.mxu0 %v10188_v50  ;;  %v5029_v17 = vpop.xlane.xlu0 %5028  ;;  %v5128_v26 = vpack.c.bf16 %v5104_v62, %v5103_v59  ;;  %v5105_v18 = vmul.f32 %v8315_v0, %v10515_v60  ;;  %v462_v0 = vld [vmem:[%s10980_s7 + $0x10] sm:$0xf] }
 0xeae   :  { %v8317_v10 = vpop.eup %8316  ;;  %8326 = vrcp.f32 %v5029_v17  ;;  %7943 = vmatprep.subr.msk.bf16.mxu1 %vm2595_vm5, %v462_v0 }
 0xeaf   :  { %v5032_v8 = vpop.xlane.xlu1 %5031  ;;  %7728 = vmatmul.mubr.msk.bf16.gmra.mrb[180].mxu0 %vm49_vm0, %v5128_v26  ;;  %v5106_v56 = vmul.f32 %v8317_v10, %v10520_v22 }
 0xeb0   :  { %v8319_v37 = vpop.eup %8318  ;;  %8328 = vrcp.f32 %v5032_v8  ;;  %7752 = vmatpush3.bf16.msra.mxu0 %v10188_v50 }
 0xeb1   :  { %7753 = vmatprep.subr.bf16.mxu0 %v10186_v51  ;;  %v5129_v12 = vpack.c.bf16 %v5106_v56, %v5105_v18  ;;  %v5107_v39 = vmul.f32 %v8319_v37, %v10525_v33  ;;  %v464_v56 = vld [vmem:[%s10980_s7 + $0x18] sm:$0xf] }
 0xeb2   :  { %v8321_v45 = vpop.eup %8320  ;;  %v5035_v34 = vpop.xlane.xlu0 %5034 }
 0xeb3   :  { %v5108_v9 = vmul.f32 %v8321_v45, %v10530_v38  ;;  %8330 = vrcp.f32 %v5035_v34  ;;  %7739 = vmatprep.mubr.msk.bf16.mxu1 %vm49_vm0, %v5129_v12 }
 0xeb4   :  { %v8323_v28 = vpop.eup %8322  ;;  %v5038_v60 = vpop.xlane.xlu1 %5037  ;;  %7754 = vmatpush3.bf16.msra.mxu0 %v10186_v51 }
 0xeb5   :  { %v5130_v22 = vpack.c.bf16 %v5108_v9, %v5107_v39  ;;  %8332 = vrcp.f32 %v5038_v60  ;;  %v5109_v15 = vmul.f32 %v8323_v28, %v10535_v40 }
 0xeb6   :  { %v8325_v21 = vpop.eup %8324  ;;  %v5041_v50 = vpop.xlane.xlu0 %5040 }
 0xeb7   :  { %8334 = vrcp.f32 %v5041_v50  ;;  %7740 = vmatmul.mubr.msk.bf16.vlgmr.msra.gmra.mrb[152].mxu1 %vm49_vm0, %v5130_v22  ;;  %v5110_v33 = vmul.f32 %v8325_v21, %v10540_v30 }
 0xeb8   :  { %v8327_v1 = vpop.eup %8326  ;;  %v5044_v38 = vpop.xlane.xlu1 %5043 }
 0xeb9   :  { %8336 = vrcp.f32 %v5044_v38  ;;  %v5131_v16 = vpack.c.bf16 %v5110_v33, %v5109_v15  ;;  %v5111_v51 = vmul.f32 %v8327_v1, %v10545_v24  ;;  %v5634_v33 = vsel %vm2595_vm5, %v464_v56, 0  ;;  %v465_v1 = vld [vmem:[%s10980_s7 + $0x1c] sm:$0xf] }
 0xeba   :  { %v8329_v13 = vpop.eup %8328  ;;  %v5047_v27 = vpop.xlane.xlu0 %5046 }
 0xebb   :  { %8338 = vrcp.f32 %v5047_v27  ;;  %7743 = vmatprep.mubr.msk.bf16.mxu1 %vm49_vm0, %v5131_v16  ;;  %v5112_v54 = vmul.f32 %v8329_v13, %v10550_v32 }
 0xebc   :  { %v5050_v48 = vpop.xlane.xlu1 %5049 }
 0xebd   :  { %v8331_v14 = vpop.eup %8330  ;;  %8340 = vrcp.f32 %v5050_v48  ;;  %v5132_v41 = vpack.c.bf16 %v5112_v54, %v5111_v51 }
 0xebe   :  { %v5053_v40 = vpop.xlane.xlu0 %5052  ;;  %v5113_v63 = vmul.f32 %v8331_v14, %v10555_v43 }
 0xebf   :  { %v8333_v35 = vpop.eup %8332  ;;  %8342 = vrcp.f32 %v5053_v40  ;;  %7744 = vmatmul.mubr.msk.bf16.gmra.mrb[156].mxu1 %vm49_vm0, %v5132_v41 }
 0xec0   :  { %v5056_v30 = vpop.xlane.xlu1 %5055  ;;  %v5114_v57 = vmul.f32 %v8333_v35, %v10560_v31 }
 0xec1   :  { %v8335_v36 = vpop.eup %8334  ;;  %8344 = vrcp.f32 %v5056_v30 }
 0xec2   :  { %v5133_v2 = vpack.c.bf16 %v5114_v57, %v5113_v63  ;;  %v5115_v32 = vmul.f32 %v8335_v36, %v10564_v49  ;;  %v5714_v63 = vsel %vm2595_vm5, %v465_v1, 0 }
 0xec3   :  { %v8337_v24 = vpop.eup %8336 }
 0xec4   :  { %v5116_v55 = vmul.f32 %v8337_v24, %v10568_v20  ;;  %7755 = vmatprep.mubr.msk.bf16.mxu0 %vm49_vm0, %v5133_v2 }
 0xec5   :  { %v8339_v52 = vpop.eup %8338 }
 0xec6   :  { %v5134_v58 = vpack.c.bf16 %v5116_v55, %v5115_v32  ;;  %v5117_v61 = vmul.f32 %v8339_v52, %v10572_v29  ;;  %v5474_v29 = vsel %vm2595_vm5, %v462_v0, 0 }
 0xec7   :  { %v8341_v25 = vpop.eup %8340  ;;  %7764 = vmatpush3.bf16.msra.mxu1 %v5474_v29 }
 0xec8   :  { %7756 = vmatmul.mubr.msk.bf16.vlgmr.msra.gmra.mrb[184].mxu0 %vm49_vm0, %v5134_v58  ;;  %v5118_v43 = vmul.f32 %v8341_v25, %v10576_v42  ;;  %v463_v42 = vld [vmem:[%s10980_s7 + $0x14] sm:$0xf] }
 0xec9   :  { %v8343_v31 = vpop.eup %8342  ;;  %7944 = vmatprep.subr.msk.bf16.mxu1 %vm2595_vm5, %v463_v42  ;;  %v5554_v18 = vsel %vm2595_vm5, %v463_v42, 0 }
 0xeca   :  { %v5135_v47 = vpack.c.bf16 %v5118_v43, %v5117_v61  ;;  %v5119_v49 = vmul.f32 %v8343_v31, %v10580_v53 }
 0xecb   :  { %v8345_v59 = vpop.eup %8344 }
 0xecc   :  { %7759 = vmatprep.mubr.msk.bf16.mxu0 %vm49_vm0, %v5135_v47  ;;  %v5120_v20 = vmul.f32 %v8345_v59, %v10584_v7 }
 0xece   :  { %v5136_v62 = vpack.c.bf16 %v5120_v20, %v5119_v49 }
 0xed0   :  { %7760 = vmatmul.mubr.msk.bf16.gmra.mrb[188].mxu0 %vm49_vm0, %v5136_v62 }
 0xf5a   :  { %v7709_v53 = vpop.f32.mrb[144].mxu1 }
 0xf5b   :  { %v5183_v7 = vpop.f32.mrb[145].mxu1 }
 0xf5c   :  { %v7710_v17 = vpop.f32.mrb[146].mxu1 }
 0xf5d   :  { %v5446_v26 = vpack.c.bf16 %v7710_v17, %v7709_v53  ;;  %v5186_v10 = vpop.f32.mrb[147].mxu1 }
 0xf5e   :  { %v5445_v8 = vpack.c.bf16 %v5186_v10, %v5183_v7 }
 0xf60   :  { %7765 = vmatprep.mubr.msk.bf16.mxu1 %vm200_vm3, %v5445_v8 }
 0xf61   :  { %7766 = vmatmul.mubr.msk.bf16.vlgmr.msra.gmra.mrb[160].mxu1 %vm200_vm3, %v5446_v26 }
 0xf62   :  { %v7713_v37 = vpop.f32.mrb[148].mxu1  ;;  %7774 = vmatpush3.bf16.msra.mxu1 %v5554_v18 }
 0xf63   :  { %v5199_v12 = vpop.f32.mrb[149].mxu1  ;;  %7945 = vmatprep.subr.msk.bf16.mxu1 %vm2595_vm5, %v464_v56 }
 0xf64   :  { %v7714_v45 = vpop.f32.mrb[150].mxu1 }
 0xf65   :  { %v5448_v34 = vpack.c.bf16 %v7714_v45, %v7713_v37  ;;  %v5202_v39 = vpop.f32.mrb[151].mxu1 }
 0xf66   :  { %v5447_v9 = vpack.c.bf16 %v5202_v39, %v5199_v12 }
 0xf68   :  { %7769 = vmatprep.mubr.msk.bf16.mxu1 %vm200_vm3, %v5447_v9 }
 0xf69   :  { %7770 = vmatmul.mubr.msk.bf16.gmra.mrb[164].mxu1 %vm200_vm3, %v5448_v34 }
 0xf7a   :  { %v7725_v28 = vpop.f32.mrb[176].mxu0 }
 0xf7b   :  { %v5260_v60 = vpop.f32.mrb[177].mxu0 }
 0xf7c   :  { %v7726_v22 = vpop.f32.mrb[178].mxu0 }
 0xf7d   :  { %v5450_v21 = vpack.c.bf16 %v7726_v22, %v7725_v28  ;;  %v5263_v50 = vpop.f32.mrb[179].mxu0 }
 0xf7e   :  { %v5449_v15 = vpack.c.bf16 %v5263_v50, %v5260_v60 }
 0xf80   :  { %7775 = vmatprep.mubr.msk.bf16.mxu1 %vm200_vm3, %v5449_v15 }
 0xf81   :  { %7776 = vmatmul.mubr.msk.bf16.vlgmr.msra.gmra.mrb[160].mxu1 %vm200_vm3, %v5450_v21 }
 0xf82   :  { %7784 = vmatpush3.bf16.msra.mxu1 %v5634_v33  ;;  %v7729_v38 = vpop.f32.mrb[180].mxu0 }
 0xf83   :  { %v5276_v16 = vpop.f32.mrb[181].mxu0  ;;  %7946 = vmatprep.subr.msk.bf16.mxu1 %vm2595_vm5, %v465_v1 }
 0xf84   :  { %v7730_v13 = vpop.f32.mrb[182].mxu0 }
 0xf85   :  { %v5452_v27 = vpack.c.bf16 %v7730_v13, %v7729_v38  ;;  %v5279_v51 = vpop.f32.mrb[183].mxu0  ;;  %v8002_v38 = vld [vmem:[%s10981_s9 + $0x10] sm:$0xff]  }
 0xf86   :  { %v5451_v54 = vpack.c.bf16 %v5279_v51, %v5276_v16  ;;  %7803 = vmatprep.subr.bf16.mxu0 %v8002_v38  ;;  %v8003_v16 = vld [vmem:[%s10981_s9 + $0x18] sm:$0xff]  }
 0xf87   :  { %7804 = vmatpush3.bf16.msra.mxu0 %v8002_v38  ;;  %v8004_v38 = vld [vmem:[%s10983_s10 + $0x20] sm:$0xff]  }
 0xf88   :  { %7779 = vmatprep.mubr.msk.bf16.mxu1 %vm200_vm3, %v5451_v54  ;;  %7805 = vmatprep.subr.bf16.mxu0 %v8003_v16 }
 0xf89   :  { %7780 = vmatmul.mubr.msk.bf16.gmra.mrb[164].mxu1 %vm200_vm3, %v5452_v27 }
 0xf8a   :  { %v7741_v48 = vpop.f32.mrb[152].mxu1 }
 0xf8b   :  { %v5337_v14 = vpop.f32.mrb[153].mxu1  ;;  %7806 = vmatpush3.bf16.msra.mxu0 %v8003_v16  ;;  %v8005_v16 = vld [vmem:[%s10983_s10 + $0x28] sm:$0xff]  }
 0xf8c   :  { %v7742_v41 = vpop.f32.mrb[154].mxu1  ;;  %7815 = vmatprep.subr.bf16.mxu0 %v8004_v38 }
 0xf8d   :  { %v5454_v40 = vpack.c.bf16 %v7742_v41, %v7741_v48  ;;  %v5340_v35 = vpop.f32.mrb[155].mxu1 }
 0xf8e   :  { %v5453_v30 = vpack.c.bf16 %v5340_v35, %v5337_v14 }
 0xf90   :  { %7785 = vmatprep.mubr.msk.bf16.mxu1 %vm200_vm3, %v5453_v30 }
 0xf91   :  { %7786 = vmatmul.mubr.msk.bf16.vlgmr.msra.gmra.mrb[160].mxu1 %vm200_vm3, %v5454_v40 }
 0xf92   :  { %7794 = vmatpush3.bf16.msra.mxu1 %v5714_v63  ;;  %v7745_v57 = vpop.f32.mrb[156].mxu1 }
 0xf93   :  { %v5353_v36 = vpop.f32.mrb[157].mxu1 }
 0xf94   :  { %v7746_v2 = vpop.f32.mrb[158].mxu1 }
 0xf95   :  { %v5456_v24 = vpack.c.bf16 %v7746_v2, %v7745_v57  ;;  %v5356_v32 = vpop.f32.mrb[159].mxu1 }
 0xf96   :  { %v5455_v55 = vpack.c.bf16 %v5356_v32, %v5353_v36 }
 0xf98   :  { %7789 = vmatprep.mubr.msk.bf16.mxu1 %vm200_vm3, %v5455_v55 }
 0xf99   :  { %7790 = vmatmul.mubr.msk.bf16.gmra.mrb[164].mxu1 %vm200_vm3, %v5456_v24 }
 0xf9b   :  { %v7757_v52 = vpop.f32.mrb[184].mxu0 }
 0xf9c   :  { %v5414_v58 = vpop.f32.mrb[185].mxu0 }
 0xf9d   :  { %v7758_v25 = vpop.f32.mrb[186].mxu0 }
 0xf9e   :  { %v5458_v61 = vpack.c.bf16 %v7758_v25, %v7757_v52  ;;  %v5417_v43 = vpop.f32.mrb[187].mxu0 }
 0xf9f   :  { %v5457_v31 = vpack.c.bf16 %v5417_v43, %v5414_v58 }
 0xfa1   :  { %7795 = vmatprep.mubr.msk.bf16.mxu1 %vm200_vm3, %v5457_v31 }
 0xfa2   :  { %7796 = vmatmul.mubr.msk.bf16.vlgmr.msra.gmra.mrb[160].mxu1 %vm200_vm3, %v5458_v61 }
 0xfa3   :  { %v7761_v47 = vpop.f32.mrb[188].mxu0 }
 0xfa4   :  { %v5430_v59 = vpop.f32.mrb[189].mxu0 }
 0xfa5   :  { %v7762_v49 = vpop.f32.mrb[190].mxu0 }
 0xfa6   :  { %v5460_v20 = vpack.c.bf16 %v7762_v49, %v7761_v47  ;;  %v5433_v62 = vpop.f32.mrb[191].mxu0 }
 0xfa7   :  { %v5459_v0 = vpack.c.bf16 %v5433_v62, %v5430_v59 }
 0xfa9   :  { %7799 = vmatprep.mubr.msk.bf16.mxu1 %vm200_vm3, %v5459_v0 }
 0xfaa   :  { %7800 = vmatmul.mubr.msk.bf16.gmra.mrb[164].mxu1 %vm200_vm3, %v5460_v20  ;;  %v6739_v20 = vld [vmem:[%s10982_s8 + $0x1] ss:$0 sm:$0xff] }
0x1075   :  { %v7797_v29 = vpop.f32.mrb[160].mxu1 }
0x1076   :  { %v5750_v42 = vpop.f32.mrb[161].mxu1  ;;  %v10687_v53 = vadd.f32 %v7797_v29, %v9750_v46 }
0x1077   :  { %v10690_v7 = vadd.f32 %v5750_v42, %v9753_v3  ;;  %v7798_v17 = vpop.f32.mrb[162].mxu1 }
0x1078   :  { %v5753_v26 = vpop.f32.mrb[163].mxu1  ;;  %v10693_v10 = vadd.f32 %v7798_v17, %v9761_v19  ;;  %v5817_v3 = vmul.f32 %v10687_v53, %v10687_v53 }
0x1079   :  { %v10696_v8 = vadd.f32 %v5753_v26, %v9756_v5  ;;  %v5815_v18 = vmul.f32 %v10690_v7, %v10690_v7 }
0x107a   :  { %v5818_v19 = vmul.f32 %v10693_v10, %v10693_v10  ;;  %v5829_v9 = vsel %vm475_vm4, %v5817_v3, 0.0 }
0x107b   :  { %v5823_v56 = vsel %vm475_vm4, %v5815_v18, 0.0  ;;  %v5816_v46 = vmul.f32 %v10696_v8, %v10696_v8 }
0x107c   :  { %5824 = vadd.xlane.f32.xlu0 %v5823_v56  ;;  %v5832_v21 = vsel %vm475_vm4, %v5818_v19, 0.0 }
0x107d   :  { %v7801_v37 = vpop.f32.mrb[164].mxu1  ;;  %v5826_v12 = vsel %vm475_vm4, %v5816_v46, 0.0 }
0x107e   :  { %5827 = vadd.xlane.f32.xlu1 %v5826_v12  ;;  %v5766_v5 = vpop.f32.mrb[165].mxu1  ;;  %v10709_v45 = vadd.f32 %v7801_v37, %v9782_v6 }
0x107f   :  { %v10712_v34 = vadd.f32 %v5766_v5, %v9770_v4  ;;  %v7802_v39 = vpop.f32.mrb[166].mxu1 }
0x1080   :  { %5830 = vadd.xlane.f32.xlu0 %v5829_v9  ;;  %v5769_v28 = vpop.f32.mrb[167].mxu1  ;;  %v10716_v60 = vadd.f32 %v7802_v39, %v9776_v11  ;;  %v5821_v15 = vmul.f32 %v10709_v45, %v10709_v45 }
0x1081   :  { %v10719_v22 = vadd.f32 %v5769_v28, %v9779_v44  ;;  %v5819_v6 = vmul.f32 %v10712_v34, %v10712_v34 }
0x1082   :  { %5833 = vadd.xlane.f32.xlu1 %v5832_v21  ;;  %v5822_v44 = vmul.f32 %v10716_v60, %v10716_v60  ;;  %v5841_v33 = vsel %vm475_vm4, %v5821_v15, 0.0 }
0x1083   :  { %v5835_v4 = vsel %vm475_vm4, %v5819_v6, 0.0  ;;  %v5820_v50 = vmul.f32 %v10719_v22, %v10719_v22 }
0x1084   :  { %5836 = vadd.xlane.f32.xlu0 %v5835_v4  ;;  %v5844_v1 = vsel %vm475_vm4, %v5822_v44, 0.0 }
0x1085   :  { %v5838_v11 = vsel %vm475_vm4, %v5820_v50, 0.0 }
0x1086   :  { %5839 = vadd.xlane.f32.xlu1 %v5838_v11 }
0x1088   :  { %5842 = vadd.xlane.f32.xlu0 %v5841_v33 }
0x108a   :  { %5845 = vadd.xlane.f32.xlu1 %v5844_v1 }
0x1109   :  { %v5825_v13 = vpop.xlane.xlu0 %5824 }
0x110a   :  { %v5847_v27 = vmul.f32 0.03125, %v5825_v13  ;;  %v8006_v13 = vld [vmem:[%s10983_s10 + $0x30] sm:$0xff]  }
0x110b   :  { %v5828_v51 = vpop.xlane.xlu1 %5827 }
0x110c   :  { %v5855_v54 = vadd.f32 1e-06, %v5847_v27  ;;  %v5848_v48 = vmul.f32 0.03125, %v5828_v51  ;;  %v8007_v27 = vld [vmem:[%s10983_s10 + $0x38] sm:$0xff]  }
0x110d   :  { %v5831_v14 = vpop.xlane.xlu0 %5830 }
0x110e   :  { %8346 = vrsqrt.f32 %v5855_v54  ;;  %v5856_v41 = vadd.f32 1e-06, %v5848_v48  ;;  %v5849_v40 = vmul.f32 0.03125, %v5831_v14 }
0x110f   :  { %v5834_v35 = vpop.xlane.xlu1 %5833 }
0x1110   :  { %8348 = vrsqrt.f32 %v5856_v41  ;;  %v5857_v30 = vadd.f32 1e-06, %v5849_v40  ;;  %v5850_v63 = vmul.f32 0.03125, %v5834_v35 }
0x1111   :  { %v5837_v57 = vpop.xlane.xlu0 %5836 }
0x1112   :  { %8350 = vrsqrt.f32 %v5857_v30  ;;  %v5858_v36 = vadd.f32 1e-06, %v5850_v63  ;;  %v5851_v2 = vmul.f32 0.03125, %v5837_v57 }
0x1113   :  { %v5840_v24 = vpop.xlane.xlu1 %5839 }
0x1114   :  { %8352 = vrsqrt.f32 %v5858_v36  ;;  %v5859_v32 = vadd.f32 1e-06, %v5851_v2  ;;  %v5852_v55 = vmul.f32 0.03125, %v5840_v24 }
0x1115   :  { %v5843_v52 = vpop.xlane.xlu0 %5842 }
0x1116   :  { %8354 = vrsqrt.f32 %v5859_v32  ;;  %v5860_v58 = vadd.f32 1e-06, %v5852_v55  ;;  %v5853_v25 = vmul.f32 0.03125, %v5843_v52 }
0x1117   :  { %v5846_v61 = vpop.xlane.xlu1 %5845 }
0x1118   :  { %v8347_v43 = vpop.eup %8346  ;;  %8356 = vrsqrt.f32 %v5860_v58  ;;  %v5861_v31 = vadd.f32 1e-06, %v5853_v25  ;;  %v5854_v47 = vmul.f32 0.03125, %v5846_v61 }
0x1119   :  { %v5871_v59 = vmul.f32 %v8347_v43, %v10690_v7 }
0x111a   :  { %v8349_v49 = vpop.eup %8348  ;;  %8358 = vrsqrt.f32 %v5861_v31  ;;  %v5862_v62 = vadd.f32 1e-06, %v5854_v47 }
0x111b   :  { %v5872_v0 = vmul.f32 %v8349_v49, %v10696_v8  ;;  %v5885_v17 = vmul.f32 %v6739_v20, %v5871_v59 }
0x111c   :  { %v8351_v29 = vpop.eup %8350  ;;  %8360 = vrsqrt.f32 %v5862_v62 }
0x111d   :  { %v5873_v42 = vmul.f32 %v8351_v29, %v10687_v53  ;;  %v5886_v26 = vmul.f32 %v6739_v20, %v5872_v0 }
0x111e   :  { %v8353_v18 = vpop.eup %8352 }
0x111f   :  { %v5874_v56 = vmul.f32 %v8353_v18, %v10693_v10  ;;  %v5893_v46 = vpack.c.bf16 %v5886_v26, %v5885_v17  ;;  %v5887_v37 = vmul.f32 %v6739_v20, %v5873_v42 }
0x1120   :  { %v8355_v3 = vpop.eup %8354 }
0x1121   :  { %v5888_v12 = vmul.f32 %v6739_v20, %v5874_v56  ;;  %7807 = vmatprep.mubr.msk.bf16.mxu0 %vm475_vm4, %v5893_v46  ;;  %v5875_v19 = vmul.f32 %v8355_v3, %v10712_v34 }
0x1122   :  { %v8357_v5 = vpop.eup %8356 }
0x1123   :  { %v5894_v39 = vpack.c.bf16 %v5888_v12, %v5887_v37  ;;  %v5876_v9 = vmul.f32 %v8357_v5, %v10719_v22  ;;  %v5889_v21 = vmul.f32 %v6739_v20, %v5875_v19 }
0x1124   :  { %v8359_v28 = vpop.eup %8358 }
0x1125   :  { %7808 = vmatmul.mubr.msk.bf16.vlgmr.msra.gmra.mrb[192].mxu0 %vm475_vm4, %v5894_v39  ;;  %v5890_v6 = vmul.f32 %v6739_v20, %v5876_v9  ;;  %v5877_v4 = vmul.f32 %v8359_v28, %v10709_v45 }
0x1126   :  { %v8361_v50 = vpop.eup %8360  ;;  %7816 = vmatpush3.bf16.msra.mxu0 %v8004_v38 }
0x1127   :  { %v5895_v15 = vpack.c.bf16 %v5890_v6, %v5889_v21  ;;  %v5878_v11 = vmul.f32 %v8361_v50, %v10716_v60  ;;  %v5891_v44 = vmul.f32 %v6739_v20, %v5877_v4  ;;  %7817 = vmatprep.subr.bf16.mxu0 %v8005_v16 }
0x1129   :  { %7811 = vmatprep.mubr.msk.bf16.mxu0 %vm475_vm4, %v5895_v15  ;;  %v5892_v33 = vmul.f32 %v6739_v20, %v5878_v11 }
0x112a   :  { %7818 = vmatpush3.bf16.msra.mxu0 %v8005_v16 }
0x112b   :  { %v5896_v1 = vpack.c.bf16 %v5892_v33, %v5891_v44  ;;  %7819 = vmatprep.subr.bf16.mxu0 %v8006_v13 }
0x112d   :  { %7812 = vmatmul.mubr.msk.bf16.gmra.mrb[196].mxu0 %vm475_vm4, %v5896_v1 }
0x112e   :  { %7820 = vmatpush3.bf16.msra.mxu0 %v8006_v13 }
0x112f   :  { %7821 = vmatprep.subr.bf16.mxu0 %v8007_v27 }
0x1132   :  { %7822 = vmatpush3.bf16.msra.mxu0 %v8007_v27 }
0x11f8   :  { %v10767_v51 = vpop.f32.mrb[192].mxu0 }
0x11f9   :  { %v10769_v54 = vpop.f32.mrb[193].mxu0  ;;  %6075 = vrot.lane.b32.xlu1 %v10767_v51, %s8426_s24  ;;  %v6001_v36 = vmul.f32 0.044715, %v10767_v51 }
0x11fa   :  { %v10773_v48 = vpop.f32.mrb[194].mxu0  ;;  %6071 = vrot.lane.b32.xlu0 %v10769_v54, %s8426_s24  ;;  %v5999_v63 = vmul.f32 0.044715, %v10769_v54 }
0x11fb   :  { %v10777_v14 = vpop.f32.mrb[195].mxu0  ;;  %v6002_v24 = vmul.f32 0.044715, %v10773_v48  ;;  %v6009_v55 = vmul.f32 %v10767_v51, %v6001_v36 }
0x11fc   :  { %v6000_v57 = vmul.f32 0.044715, %v10777_v14  ;;  %v6007_v2 = vmul.f32 %v5999_v63, %v10769_v54  ;;  %v5991_v63 = vmul.f32 0.5, %v10769_v54 }
0x11fd   :  { %6073 = vrot.lane.b32.xlu1 %v10777_v14, %s8426_s24  ;;  %v6010_v25 = vmul.f32 %v10773_v48, %v6002_v24  ;;  %v6017_v59 = vmul.f32 %v10767_v51, %v6009_v55 }
0x11fe   :  { %v6008_v32 = vmul.f32 %v6000_v57, %v10777_v14  ;;  %v6015_v58 = vmul.f32 %v6007_v2, %v10769_v54  ;;  %v5992_v57 = vmul.f32 0.5, %v10777_v14 }
0x11ff   :  { %v6018_v29 = vmul.f32 %v10773_v48, %v6010_v25  ;;  %v6025_v17 = vadd.f32 %v10767_v51, %v6017_v59  ;;  %v5993_v25 = vmul.f32 0.5, %v10767_v51 }
0x1200   :  { %v10781_v41 = vpop.f32.mrb[196].mxu0  ;;  %v6016_v43 = vmul.f32 %v6008_v32, %v10777_v14  ;;  %v6023_v49 = vadd.f32 %v6015_v58, %v10769_v54 }
0x1201   :  { %6077 = vrot.lane.b32.xlu1 %v10773_v48, %s8426_s24  ;;  %v10785_v40 = vpop.f32.mrb[197].mxu0  ;;  %v6005_v31 = vmul.f32 0.044715, %v10781_v41  ;;  %v6026_v3 = vadd.f32 %v10773_v48, %v6018_v29  ;;  %v6033_v12 = vmul.f32 0.7978846, %v6025_v17 }
0x1202   :  { %6079 = vrot.lane.b32.xlu0 %v10785_v40, %s8426_s24  ;;  %v10789_v35 = vpop.f32.mrb[198].mxu0  ;;  %v6003_v52 = vmul.f32 0.044715, %v10785_v40  ;;  %v6024_v0 = vadd.f32 %v6016_v43, %v10777_v14  ;;  %v6031_v26 = vmul.f32 0.7978846, %v6023_v49 }
0x1203   :  { %v10791_v30 = vpop.f32.mrb[199].mxu0  ;;  %v6006_v20 = vmul.f32 0.044715, %v10789_v35  ;;  %v6013_v42 = vmul.f32 %v10781_v41, %v6005_v31  ;;  %v6034_v39 = vmul.f32 0.7978846, %v6026_v3 }
0x1204   :  { %v6004_v61 = vmul.f32 0.044715, %v10791_v30  ;;  %v6011_v47 = vmul.f32 %v6003_v52, %v10785_v40  ;;  %v6032_v46 = vmul.f32 0.7978846, %v6024_v0  ;;  %8362 = vtanh.f32 %v6031_v26 }
0x1205   :  { %6081 = vrot.lane.b32.xlu1 %v10791_v30, %s8426_s24  ;;  %v6014_v56 = vmul.f32 %v10789_v35, %v6006_v20  ;;  %v6021_v5 = vmul.f32 %v10781_v41, %v6013_v42  ;;  %v5996_v51 = vmul.f32 0.5, %v10791_v30 }
0x1206   :  { %6083 = vrot.lane.b32.xlu0 %v10781_v41, %s8426_s24  ;;  %v6012_v62 = vmul.f32 %v6004_v61, %v10791_v30  ;;  %v6019_v18 = vmul.f32 %v6011_v47, %v10785_v40  ;;  %8364 = vtanh.f32 %v6032_v46  ;;  %v5994_v47 = vmul.f32 0.5, %v10773_v48 }
0x1207   :  { %v6022_v28 = vmul.f32 %v10789_v35, %v6014_v56  ;;  %8366 = vtanh.f32 %v6033_v12  ;;  %v6029_v6 = vadd.f32 %v10781_v41, %v6021_v5 }
0x1208   :  { %v6020_v37 = vmul.f32 %v6012_v62, %v10791_v30  ;;  %v6027_v19 = vadd.f32 %v6019_v18, %v10785_v40  ;;  %8368 = vtanh.f32 %v6034_v39  ;;  %v5995_v18 = vmul.f32 0.5, %v10785_v40 }
0x1209   :  { %6085 = vrot.lane.b32.xlu1 %v10789_v35, %s8426_s24  ;;  %v6030_v50 = vadd.f32 %v10789_v35, %v6022_v28  ;;  %v6037_v15 = vmul.f32 0.7978846, %v6029_v6  ;;  %v5997_v39 = vmul.f32 0.5, %v10781_v41 }
0x120a   :  { %v6028_v9 = vadd.f32 %v6020_v37, %v10791_v30  ;;  %v6035_v21 = vmul.f32 0.7978846, %v6027_v19 }
0x120b   :  { %v6038_v11 = vmul.f32 0.7978846, %v6030_v50 }
0x120c   :  { %v6036_v4 = vmul.f32 0.7978846, %v6028_v9  ;;  %8370 = vtanh.f32 %v6035_v21  ;;  %v5998_v9 = vmul.f32 0.5, %v10789_v35 }
0x120e   :  { %8372 = vtanh.f32 %v6036_v4  ;;  %v8363_v44 = vpop.eup %8362 }
0x120f   :  { %8374 = vtanh.f32 %v6037_v15  ;;  %v6047_v38 = vadd.f32 1.0, %v8363_v44 }
0x1210   :  { %v8365_v33 = vpop.eup %8364  ;;  %8376 = vtanh.f32 %v6038_v11 }
0x1211   :  { %v8367_v1 = vpop.eup %8366  ;;  %v6048_v16 = vadd.f32 1.0, %v8365_v33  ;;  %v6055_v32 = vmul.f32 %v6047_v38, %v5991_v63 }
0x1212   :  { %v8369_v13 = vpop.eup %8368  ;;  %v6049_v36 = vadd.f32 1.0, %v8367_v1 }
0x1213   :  { %v6056_v55 = vmul.f32 %v6048_v16, %v5992_v57  ;;  %v6050_v52 = vadd.f32 1.0, %v8369_v13 }
0x1214   :  { %v6057_v59 = vmul.f32 %v6049_v36, %v5993_v25 }
0x1215   :  { %v6058_v54 = vmul.f32 %v6050_v52, %v5994_v47 }
0x1216   :  { %v8371_v24 = vpop.eup %8370 }
0x1217   :  { %v6051_v62 = vadd.f32 1.0, %v8371_v24 }
0x1218   :  { %v8373_v58 = vpop.eup %8372 }
0x1219   :  { %v8375_v49 = vpop.eup %8374  ;;  %v6052_v14 = vadd.f32 1.0, %v8373_v58  ;;  %v6059_v48 = vmul.f32 %v6051_v62, %v5995_v18  ;;  %v6307_v62 = vld [vmem:[%s10984_s12 + $0x18] sm:$0xff] }
0x121a   :  { %v8377_v0 = vpop.eup %8376  ;;  %v6053_v56 = vadd.f32 1.0, %v8375_v49  ;;  %v6305_v49 = vld [vmem:[%s10984_s12 + $0x8] sm:$0xff] }
0x121b   :  { %v6060_v3 = vmul.f32 %v6052_v14, %v5996_v51  ;;  %v6054_v37 = vadd.f32 1.0, %v8377_v0 }
0x121c   :  { %v6061_v21 = vmul.f32 %v6053_v56, %v5997_v39 }
0x121d   :  { %v6062_v6 = vmul.f32 %v6054_v37, %v5998_v9 }
0x126b   :  { %v6076_v27 = vpop.permute.xlu1 %6075 }
0x126c   :  { %v6072_v2 = vpop.permute.xlu0 %6071  ;;  %v6097_v42 = vmul.f32 %v6076_v27, %v6057_v59  ;;  %v6304_v59 = vld [vmem:[%s10984_s12] sm:$0xff] }
0x126d   :  { %v6095_v43 = vmul.f32 %v6072_v2, %v6055_v32 }
0x126f   :  { %v6074_v61 = vpop.permute.xlu1 %6073 }
0x1270   :  { %v6096_v31 = vmul.f32 %v6074_v61, %v6056_v55 }
0x1272   :  { %v6103_v20 = vpack.c.bf16 %v6096_v31, %v6095_v43 }
0x1273   :  { %v6078_v29 = vpop.permute.xlu1 %6077 }
0x1274   :  { %v6098_v17 = vmul.f32 %v6078_v29, %v6058_v54  ;;  %v6080_v26 = vpop.permute.xlu0 %6079  ;;  %7823 = vmatprep.mubr.msk.bf16.mxu0 %vm49_vm0, %v6103_v20  ;;  %v7851_v20 = vpack.c.bf16 %v6305_v49, %v6304_v59  ;;  %v6306_v54 = vld [vmem:[%s10984_s12 + $0x10] sm:$0xff]  ;;  %v11040_v59 = vld [vmem:[#allocation9_spill] sm:$0xff] }
0x1275   :  { %v6099_v19 = vmul.f32 %v6080_v26, %v6059_v48  ;;  %v7855_v14 = vpack.c.bf16 %v6307_v62, %v6306_v54 }
0x1276   :  { %v6104_v46 = vpack.c.bf16 %v6098_v17, %v6097_v42  ;;  %7852 = vmatprep.subr.bf16.mxu0 %v7851_v20 }
0x1277   :  { %v6082_v12 = vpop.permute.xlu1 %6081 }
0x1278   :  { %v6100_v5 = vmul.f32 %v6082_v12, %v6060_v3  ;;  %7824 = vmatmul.mubr.msk.bf16.vlgmr.msra.gmra.mrb[200].mxu0 %vm49_vm0, %v6104_v46  ;;  %v6084_v28 = vpop.permute.xlu0 %6083 }
0x1279   :  { %v6101_v30 = vmul.f32 %v6084_v28, %v6061_v21  ;;  %7854 = vmatpush3.bf16.msra.mxu0 %v7851_v20  ;;  %v6766_v21 = vld [vmem:[%s10985_s11] ss:$0 sm:$0xff]  ;;  %v11041_v20 = vld [vmem:[#allocation8_spill] sm:$0xff] }
0x127a   :  { %v6105_v40 = vpack.c.bf16 %v6100_v5, %v6099_v19  ;;  %7856 = vmatprep.subr.bf16.mxu0 %v7855_v14 }
0x127b   :  { %v6086_v4 = vpop.permute.xlu1 %6085 }
0x127c   :  { %v6102_v50 = vmul.f32 %v6086_v4, %v6062_v6  ;;  %7827 = vmatprep.mubr.msk.bf16.mxu0 %vm49_vm0, %v6105_v40 }
0x127d   :  { %7858 = vmatpush3.bf16.msra.mxu0 %v7855_v14 }
0x127e   :  { %v6106_v15 = vpack.c.bf16 %v6102_v50, %v6101_v30 }
0x1280   :  { %7828 = vmatmul.mubr.msk.bf16.gmra.mrb[204].mxu0 %vm49_vm0, %v6106_v15 }
0x134b   :  { %v7825_v11 = vpop.f32.mrb[200].mxu0 }
0x134c   :  { %v6186_v44 = vpop.f32.mrb[201].mxu0  ;;  %v10844_v41 = vadd.f32 %v7825_v11, %v10687_v53 }
0x134d   :  { %v10847_v33 = vadd.f32 %v6186_v44, %v10690_v7  ;;  %v7826_v35 = vpop.f32.mrb[202].mxu0 }
0x134e   :  { %v6189_v1 = vpop.f32.mrb[203].mxu0  ;;  %v6228_v13 = vmul.f32 %v10844_v41, %v10844_v41  ;;  %v10857_v27 = vadd.f32 %v7826_v35, %v10693_v10 }
0x134f   :  { %v6226_v38 = vmul.f32 %v10847_v33, %v10847_v33  ;;  %v10852_v16 = vadd.f32 %v6189_v1, %v10696_v8 }
0x1350   :  { %v6229_v8 = vmul.f32 %v10857_v27, %v10857_v27  ;;  %v6240_v10 = vsel %vm475_vm4, %v6228_v13, 0.0 }
0x1351   :  { %v6227_v53 = vmul.f32 %v10852_v16, %v10852_v16  ;;  %v6234_v7 = vsel %vm475_vm4, %v6226_v38, 0.0 }
0x1352   :  { %6235 = vadd.xlane.f32.xlu0 %v6234_v7  ;;  %v6243_v61 = vsel %vm475_vm4, %v6229_v8, 0.0 }
0x1353   :  { %v7829_v63 = vpop.f32.mrb[204].mxu0  ;;  %v6237_v57 = vsel %vm475_vm4, %v6227_v53, 0.0 }
0x1354   :  { %6238 = vadd.xlane.f32.xlu1 %v6237_v57  ;;  %v6202_v36 = vpop.f32.mrb[205].mxu0  ;;  %v10876_v58 = vadd.f32 %v7829_v63, %v10709_v45 }
0x1355   :  { %v10866_v2 = vadd.f32 %v6202_v36, %v10712_v34  ;;  %v7830_v24 = vpop.f32.mrb[206].mxu0 }
0x1356   :  { %6241 = vadd.xlane.f32.xlu0 %v6240_v10  ;;  %v6205_v32 = vpop.f32.mrb[207].mxu0  ;;  %v10870_v55 = vadd.f32 %v7830_v24, %v10716_v60 }
0x1357   :  { %v10873_v52 = vadd.f32 %v6205_v32, %v10719_v22  ;;  %v6230_v25 = vmul.f32 %v10866_v2, %v10866_v2  ;;  %v6232_v22 = vmul.f32 %v10876_v58, %v10876_v58 }
0x1358   :  { %v6233_v43 = vmul.f32 %v10870_v55, %v10870_v55 }
0x1359   :  { %v6231_v34 = vmul.f32 %v10873_v52, %v10873_v52  ;;  %v6246_v45 = vsel %vm475_vm4, %v6230_v25, 0.0  ;;  %v6252_v47 = vsel %vm475_vm4, %v6232_v22, 0.0 }
0x135a   :  { %6244 = vadd.xlane.f32.xlu0 %v6243_v61  ;;  %v6255_v31 = vsel %vm475_vm4, %v6233_v43, 0.0 }
0x135b   :  { %v6249_v60 = vsel %vm475_vm4, %v6231_v34, 0.0 }
0x135c   :  { %6250 = vadd.xlane.f32.xlu1 %v6249_v60 }
0x135e   :  { %6247 = vadd.xlane.f32.xlu0 %v6246_v45 }
0x1360   :  { %6256 = vadd.xlane.f32.xlu1 %v6255_v31 }
0x1362   :  { %6253 = vadd.xlane.f32.xlu0 %v6252_v47  ;;  %v11039_v47 = vld [vmem:[#allocation2_spill] sm:$0xff] }
0x13df   :  { %v6236_v0 = vpop.xlane.xlu0 %6235 }
0x13e0   :  { %v6258_v29 = vmul.f32 0.03125, %v6236_v0 }
0x13e1   :  { %v6239_v42 = vpop.xlane.xlu1 %6238 }
0x13e2   :  { %v6266_v17 = vadd.f32 1e-06, %v6258_v29  ;;  %v6259_v26 = vmul.f32 0.03125, %v6239_v42  ;;  %v11042_v29 = vld [vmem:[#allocation4_spill] sm:$0xff] }
0x13e3   :  { %v6242_v18 = vpop.xlane.xlu0 %6241 }
0x13e4   :  { %8378 = vrsqrt.f32 %v6266_v17  ;;  %v6267_v51 = vadd.f32 1e-06, %v6259_v26  ;;  %v6260_v56 = vmul.f32 0.03125, %v6242_v18  ;;  %v11043_v17 = vld [vmem:[#allocation3_spill] sm:$0xff]  ;;  %v11044_v18 = vld [vmem:[#allocation12_spill] sm:$0xff] }
0x13e6   :  { %8380 = vrsqrt.f32 %v6267_v51  ;;  %v6268_v46 = vadd.f32 1e-06, %v6260_v56 }
0x13e7   :  { %v6245_v48 = vpop.xlane.xlu0 %6244 }
0x13e8   :  { %8382 = vrsqrt.f32 %v6268_v46  ;;  %v6261_v3 = vmul.f32 0.03125, %v6245_v48  ;;  %v11045_v46 = vld [vmem:[#allocation10_spill] sm:$0xff] }
0x13e9   :  { %v6251_v37 = vpop.xlane.xlu1 %6250 }
0x13ea   :  { %v6269_v12 = vadd.f32 1e-06, %v6261_v3  ;;  %v6263_v19 = vmul.f32 0.03125, %v6251_v37 }
0x13eb   :  { %v6248_v5 = vpop.xlane.xlu0 %6247 }
0x13ec   :  { %8384 = vrsqrt.f32 %v6269_v12  ;;  %v6271_v39 = vadd.f32 1e-06, %v6263_v19  ;;  %v6262_v9 = vmul.f32 0.03125, %v6248_v5  ;;  %v11046_v19 = vld [vmem:[#allocation6_spill] sm:$0xff] }
0x13ed   :  { %v6257_v28 = vpop.xlane.xlu1 %6256 }
0x13ee   :  { %v8379_v40 = vpop.eup %8378  ;;  %8386 = vrsqrt.f32 %v6271_v39  ;;  %v6270_v6 = vadd.f32 1e-06, %v6262_v9  ;;  %v6265_v4 = vmul.f32 0.03125, %v6257_v28  ;;  %v11047_v39 = vld [vmem:[#allocation5_spill] sm:$0xff] }
0x13ef   :  { %v6254_v30 = vpop.xlane.xlu0 %6253  ;;  %v6282_v50 = vmul.f32 %v8379_v40, %v10847_v33  ;;  %v11048_v40 = vld [vmem:[#allocation14_spill] sm:$0xff] }
0x13f0   :  { %v8381_v15 = vpop.eup %8380  ;;  %8388 = vrsqrt.f32 %v6270_v6  ;;  %v6273_v11 = vadd.f32 1e-06, %v6265_v4  ;;  %v6264_v44 = vmul.f32 0.03125, %v6254_v30  ;;  %v11049_v30 = vld [vmem:[#allocation13_spill] sm:$0xff] }
0x13f1   :  { %v6283_v35 = vmul.f32 %v8381_v15, %v10852_v16  ;;  %v6296_v1 = vmul.f32 %v6766_v21, %v6282_v50 }
0x13f2   :  { %v8383_v38 = vpop.eup %8382  ;;  %8390 = vrsqrt.f32 %v6273_v11  ;;  %v6272_v13 = vadd.f32 1e-06, %v6264_v44  ;;  %v11050_v11 = vld [vmem:[#allocation11_spill] sm:$0xff] }
0x13f3   :  { %v6297_v53 = vmul.f32 %v6766_v21, %v6283_v35  ;;  %7839 = vmatprep.mubr.msk.f32.mxu0 %vm475_vm4, %v6296_v1  ;;  %v6284_v7 = vmul.f32 %v8383_v38, %v10844_v41  ;;  %v11051_v35 = vld [vmem:[#allocation7_spill] sm:$0xff]  ;;  %v11052_v38 = vld [vmem:[#allocation16_spill] sm:$0xff] }
0x13f4   :  { %8392 = vrsqrt.f32 %v6272_v13 }
0x13f5   :  { %7840 = vmatmul.mubr.msk.f32.vlgmr.msra.gmra.mrb[208].mxu0 %vm475_vm4, %v6297_v53  ;;  %v6298_v63 = vmul.f32 %v6766_v21, %v6284_v7  ;;  %v11053_v53 = vld [vmem:[#allocation15_spill] sm:$0xff] }
0x13f6   :  { %v8385_v33 = vpop.eup %8384 }
0x13f7   :  { %7842 = vmatprep.mubr.msk.f32.mxu0 %vm475_vm4, %v6298_v63  ;;  %v6285_v57 = vmul.f32 %v8385_v33, %v10857_v27 }
0x13f8   :  { %v8387_v36 = vpop.eup %8386 }
0x13f9   :  { %v6299_v16 = vmul.f32 %v6766_v21, %v6285_v57  ;;  %v6287_v24 = vmul.f32 %v8387_v36, %v10873_v52 }
0x13fa   :  { %v8389_v8 = vpop.eup %8388 }
0x13fb   :  { %7843 = vmatmul.mubr.msk.f32.gmra.mrb[210].mxu0 %vm475_vm4, %v6299_v16  ;;  %v6286_v10 = vmul.f32 %v8389_v8, %v10866_v2  ;;  %v6301_v34 = vmul.f32 %v6766_v21, %v6287_v24  ;;  %v6767_v2 = vld [vmem:[%s10986_s13] ss:$0 sm:$0xff] }
0x13fc   :  { %v8391_v32 = vpop.eup %8390 }
0x13fd   :  { %v6300_v41 = vmul.f32 %v6766_v21, %v6286_v10  ;;  %v6289_v61 = vmul.f32 %v8391_v32, %v10870_v55 }
0x13fe   :  { %v8393_v25 = vpop.eup %8392 }
0x13ff   :  { %7845 = vmatprep.mubr.msk.f32.mxu0 %vm475_vm4, %v6300_v41  ;;  %v6288_v43 = vmul.f32 %v8393_v25, %v10876_v58  ;;  %v6303_v60 = vmul.f32 %v6766_v21, %v6289_v61 }
0x1400   :  { %7846 = vmatmul.mubr.msk.f32.gmra.mrb[212].mxu0 %vm475_vm4, %v6301_v34 }
0x1401   :  { %v6302_v27 = vmul.f32 %v6766_v21, %v6288_v43 }
0x1403   :  { %7848 = vmatprep.mubr.msk.f32.mxu0 %vm475_vm4, %v6302_v27 }
0x1404   :  { %7849 = vmatmul.mubr.msk.f32.gmra.mrb[214].mxu0 %vm475_vm4, %v6303_v60 }
0x14c8   :  { %v7841_v52 = vpop.f32.mrb[208].mxu0 }
0x14c9   :  { %v6411_v22 = vadd.f32 %v7841_v52, %v6767_v2  ;;  %v6405_v45 = vpop.f32.mrb[209].mxu0 }
0x14ca   :  { %v6406_v55 = vadd.f32 %v6767_v2, %v6405_v45 }
0x14cb   :  { %v6445_v31 = vmul.f32 %v6411_v22, %v8521_v23 }
0x14cc   :  { %v6444_v58 = vmul.f32 %v6406_v55, %v11039_v47 }
0x14cd   :  { %v6453_v49 = vadd.f32 %v6445_v31, %v11040_v59 }
0x14ce   :  { %v6452_v54 = vadd.f32 %v6444_v58, %v11041_v20  ;;  %v7844_v62 = vpop.f32.mrb[210].mxu0 }
0x14cf   :  { %6461 = vst.msk [vmem:[%s10987_s14 + $0x8] sm:$0xff] %vm200_vm3, %v6453_v49  ;;  %v6421_v14 = vadd.f32 %v7844_v62, %v6767_v2  ;;  %v6415_v0 = vpop.f32.mrb[211].mxu0 }
0x14d0   :  { %6460 = vst.msk [vmem:[%s10987_s14] sm:$0xff] %vm200_vm3, %v6452_v54  ;;  %v6416_v23 = vadd.f32 %v6767_v2, %v6415_v0 }
0x14d1   :  { %v6447_v42 = vmul.f32 %v6421_v14, %v11042_v29 }
0x14d2   :  { %v6446_v26 = vmul.f32 %v6416_v23, %v11043_v17 }
0x14d3   :  { %v6455_v51 = vadd.f32 %v6447_v42, %v11044_v18  ;;  %v7847_v56 = vpop.f32.mrb[212].mxu0 }
0x14d4   :  { %v6454_v48 = vadd.f32 %v6446_v26, %v11045_v46  ;;  %v6431_v3 = vadd.f32 %v7847_v56, %v6767_v2  ;;  %v6425_v37 = vpop.f32.mrb[213].mxu0 }
0x14d5   :  { %6463 = vst.msk [vmem:[%s10987_s14 + $0x18] sm:$0xff] %vm200_vm3, %v6455_v51  ;;  %v6426_v12 = vadd.f32 %v6767_v2, %v6425_v37 }
0x14d6   :  { %6462 = vst.msk [vmem:[%s10987_s14 + $0x10] sm:$0xff] %vm200_vm3, %v6454_v48  ;;  %v6449_v5 = vmul.f32 %v6431_v3, %v11046_v19 }
0x14d7   :  { %v6448_v9 = vmul.f32 %v6426_v12, %v11047_v39  ;;  %v7850_v28 = vpop.f32.mrb[214].mxu0 }
0x14d8   :  { %v6457_v21 = vadd.f32 %v6449_v5, %v11048_v40  ;;  %v6441_v6 = vadd.f32 %v7850_v28, %v6767_v2  ;;  %v6435_v4 = vpop.f32.mrb[215].mxu0 }
0x14d9   :  { %v6456_v50 = vadd.f32 %v6448_v9, %v11049_v30  ;;  %v6436_v15 = vadd.f32 %v6767_v2, %v6435_v4 }
0x14da   :  { %6465 = vst.msk [vmem:[%s10987_s14 + $0x28] sm:$0xff] %vm200_vm3, %v6457_v21  ;;  %v6451_v44 = vmul.f32 %v6441_v6, %v11050_v11 }
0x14db   :  { %6464 = vst.msk [vmem:[%s10987_s14 + $0x20] sm:$0xff] %vm200_vm3, %v6456_v50  ;;  %v6450_v1 = vmul.f32 %v6436_v15, %v11051_v35 }
0x14dc   :  { %v6459_v13 = vadd.f32 %v6451_v44, %v11052_v38 }
0x14dd   :  { %v6458_v7 = vadd.f32 %v6450_v1, %v11053_v53 }
0x14de   :  { %6467 = vst.msk [vmem:[%s10987_s14 + $0x38] sm:$0xff] %vm200_vm3, %v6459_v13 }
0x14df   :  { %6466 = vst.msk [vmem:[%s10987_s14 + $0x30] sm:$0xff] %vm200_vm3, %v6458_v7 }

</bundles_post_ra>
